<compile_context>
chip_gen: v6e
topology: v6e:2x2x1
jax: 0.10.0
libtpu: 0.0.40
codegen_flags: <defaults>
</compile_context>

<pallas_src>
import jax
import jax.numpy as jnp
from jax.experimental import pallas as pl
from jax.experimental.pallas import tpu as pltpu


def _make_linear_gelu_kernel(precision):
    def linear_gelu_kernel(x_ref, w_ref, b_ref, o_ref):
        # x_ref: (M, K) full rows (resident); w_ref: (K, TN) tile; b_ref: (1, TN);
        # o_ref: (M, TN) lane-dense output tile.
        acc = jnp.dot(
            x_ref[...], w_ref[...],
            preferred_element_type=jnp.float32,
            precision=precision,
        )
        acc = acc + b_ref[...]  # broadcast (1, TN) over rows, f32
        # Exact GELU (approximate='none'): 0.5 * x * (1 + erf(x / sqrt(2)))
        inv_sqrt2 = jnp.float32(0.7071067811865476)
        out = 0.5 * acc * (1.0 + jax.lax.erf(acc * inv_sqrt2))
        o_ref[...] = out.astype(o_ref.dtype)
    return linear_gelu_kernel


def linear_gelu(x, w, b, *, tn=512, precision=None):
    """Fused Linear + exact GELU.

    x: (..., K) float32
    w: (K, N)   float32 or bfloat16 (cast ONCE at init for the bf16 fast path;
                do not cast per call -- that adds an extra HBM pass)
    b: (N,)     float32
    returns (..., N) in x.dtype (f32).
    """
    lead_shape = x.shape[:-1]
    K = x.shape[-1]
    N = w.shape[1]
    M = 1
    for d in lead_shape:
        M *= d

    out_dtype = x.dtype
    x2d = x.reshape(M, K)
    b2d = b.reshape(1, N).astype(jnp.float32)

    if w.dtype == jnp.bfloat16:
        # bf16 weights halve the dominant HBM traffic (4 -> 2 MiB) and the MXU pass
        # count.  Only the tiny activation block (0.4 MiB) is cast here; bias-add
        # and GELU stay in f32 (f32 accumulator via preferred_element_type).
        x2d = x2d.astype(jnp.bfloat16)

    assert N % tn == 0, "output feature dim must be divisible by tile size"
    grid_n = N // tn  # 2048 // 512 = 4 -> pipelined, and splits 2-way on v7x

    cost = pl.CostEstimate(
        flops=2 * M * K * N,
        transcendentals=M * N,  # advisory: one erf per output element
        bytes_accessed=(M * K * x2d.dtype.itemsize      # x (fetched once)
                        + K * N * w.dtype.itemsize      # weights (dominant)
                        + N * 4                         # bias
                        + M * N * out_dtype.itemsize),  # output
    )

    out2d = pl.pallas_call(
        _make_linear_gelu_kernel(precision),
        out_shape=jax.ShapeDtypeStruct((M, N), out_dtype),
        grid_spec=pltpu.PrefetchScalarGridSpec(
            num_scalar_prefetch=0,
            grid=(grid_n,),
            in_specs=[
                # Full rows & full K, constant block index -> DMA'd once, resident.
                pl.BlockSpec((M, K), lambda j: (0, 0)),
                # Weight column tile: K=512 x tn=512 -> 1 MiB f32 (0.5 MiB bf16);
                # double-buffered it stays far under the default scoped-VMEM limit.
                pl.BlockSpec((K, tn), lambda j: (0, j)),
                # Bias tile.
                pl.BlockSpec((1, tn), lambda j: (0, j)),
            ],
            out_specs=pl.BlockSpec((M, tn), lambda j: (0, j)),
        ),
        compiler_params=pltpu.CompilerParams(
            # Independent output tiles: shard across the two v7x TensorCores.
            dimension_semantics=("parallel",),
        ),
        cost_estimate=cost,
    )(x2d, w, b2d)

    return out2d.reshape(*lead_shape, N)


if __name__ == "__main__":
    key = jax.random.PRNGKey(0)
    kx, kw, kb = jax.random.split(key, 3)

    # Shapes implied by the module: input (1, 14, 14, 512), Linear 512 -> 2048.
    x = jax.random.normal(kx, (1, 14, 14, 512), dtype=jnp.float32)
    # Deterministic synthetic parameters (~ PyTorch Linear default scale).
    bound = 1.0 / (512.0 ** 0.5)
    w = jax.random.uniform(kw, (512, 2048), dtype=jnp.float32,
                           minval=-bound, maxval=bound)
    b = jax.random.uniform(kb, (2048,), dtype=jnp.float32,
                           minval=-bound, maxval=bound)

    # ---- f32 path (default; matches JAX-on-TPU default Linear numerics) ----
    out = linear_gelu(x, w, b)
    out = jax.block_until_ready(out)

    # Pure-JAX reference at the same (default) dot precision, exact-erf GELU.
    pre = x @ w + b
    ref = 0.5 * pre * (1.0 + jax.lax.erf(pre * 0.7071067811865476))
    assert out.shape == (1, 14, 14, 2048)
    assert jnp.allclose(out, ref, atol=1e-5, rtol=1e-5)

    # ---- bf16-weight fast path (weights cast ONCE, outside the call path) ----
    w_bf16 = w.astype(jnp.bfloat16)  # persistent/init-time cast, not per call
    out_bf16 = linear_gelu(x, w_bf16, b)
    out_bf16 = jax.block_until_ready(out_bf16)
    assert out_bf16.shape == (1, 14, 14, 2048)
    assert bool(jnp.all(jnp.isfinite(out_bf16)))
    # Loose check: bf16 operands, f32 accumulation.
    assert jnp.allclose(out_bf16, ref, atol=1e-1, rtol=1e-1)

    print("KERNEL_OK")
</pallas_src>

<mosaic_0001>
module attributes {stable_mosaic.version = 11 : i64} {
  func.func @linear_gelu_kernel(%arg0: i32, %arg1: memref<196x512xf32, #tpu.memory_space<vmem>>, %arg2: memref<512x512xf32, #tpu.memory_space<vmem>>, %arg3: memref<1x512xf32, #tpu.memory_space<vmem>>, %arg4: memref<196x512xf32, #tpu.memory_space<vmem>>) attributes {dimension_semantics = [#tpu.dimension_semantics<parallel>], iteration_bounds = array<i64: 4>, scalar_prefetch = 0 : i64, scratch_operands = 0 : i64, tpu.core_type = #tpu.core_type<tc>, window_params = [{pipeline_mode = #tpu.pipeline_mode<synchronous>, transform_indices = @transform_0, window_bounds = array<i64: 196, 512>}, {transform_indices = @transform_1, window_bounds = array<i64: 512, 512>}, {transform_indices = @transform_2, window_bounds = array<i64: 1, 512>}, {transform_indices = @transform_3, window_bounds = array<i64: 196, 512>}]} {
    %c0 = arith.constant 0 : index
    %c0_0 = arith.constant 0 : index
    %0 = vector.load %arg1[%c0, %c0_0] : memref<196x512xf32, #tpu.memory_space<vmem>>, vector<196x512xf32>
    %c0_1 = arith.constant 0 : index
    %c0_2 = arith.constant 0 : index
    %1 = vector.load %arg2[%c0_1, %c0_2] : memref<512x512xf32, #tpu.memory_space<vmem>>, vector<512x512xf32>
    %cst = arith.constant dense<0.000000e+00> : vector<196x512xf32>
    %2 = tpu.matmul %0, %1, %cst {dimension_numbers = #tpu.dot_dimension_numbers<[1], [0], [0], [1], [0, 0, 1, 1], [], []>} : vector<196x512xf32>, vector<512x512xf32>, vector<196x512xf32> -> vector<196x512xf32>
    %c0_3 = arith.constant 0 : index
    %c0_4 = arith.constant 0 : index
    %3 = vector.load %arg3[%c0_3, %c0_4] : memref<1x512xf32, #tpu.memory_space<vmem>>, vector<1x512xf32>
    %4 = vector.broadcast %3 : vector<1x512xf32> to vector<196x512xf32>
    %5 = arith.addf %2, %4 : vector<196x512xf32>
    %cst_5 = arith.constant 5.000000e-01 : f32
    %6 = vector.broadcast %cst_5 : f32 to vector<196x512xf32>
    %7 = arith.mulf %6, %5 : vector<196x512xf32>
    %cst_6 = arith.constant 0.707106769 : f32
    %8 = vector.broadcast %cst_6 : f32 to vector<196x512xf32>
    %9 = arith.mulf %5, %8 : vector<196x512xf32>
    %10 = math.erf %9 : vector<196x512xf32>
    %cst_7 = arith.constant 1.000000e+00 : f32
    %11 = vector.broadcast %cst_7 : f32 to vector<196x512xf32>
    %12 = arith.addf %11, %10 : vector<196x512xf32>
    %13 = arith.mulf %7, %12 : vector<196x512xf32>
    %c0_8 = arith.constant 0 : index
    %c0_9 = arith.constant 0 : index
    %14 = vector.load %arg4[%c0_8, %c0_9] : memref<196x512xf32, #tpu.memory_space<vmem>>, vector<196x512xf32>
    tpu.vector_store %arg4[%c0_8, %c0_9], %13 {strides = array<i32>} : memref<196x512xf32, #tpu.memory_space<vmem>>, vector<196x512xf32>,
    return
  }
  func.func @transform_0(%arg0: i32) -> (i32, i32) {
    %c0_i32 = arith.constant 0 : i32
    %c0_i32_0 = arith.constant 0 : i32
    %c0_i32_1 = arith.constant 0 : i32
    return %c0_i32, %c0_i32_0 : i32, i32
  }
  func.func @transform_1(%arg0: i32) -> (i32, i32) {
    %c0_i32 = arith.constant 0 : i32
    %c0_i32_0 = arith.constant 0 : i32
    return %c0_i32, %arg0 : i32, i32
  }
  func.func @transform_2(%arg0: i32) -> (i32, i32) {
    %c0_i32 = arith.constant 0 : i32
    %c0_i32_0 = arith.constant 0 : i32
    return %c0_i32, %arg0 : i32, i32
  }
  func.func @transform_3(%arg0: i32) -> (i32, i32) {
    %c0_i32 = arith.constant 0 : i32
    %c0_i32_0 = arith.constant 0 : i32
    return %c0_i32, %arg0 : i32, i32
  }
}

</mosaic_0001>

<bundles_post_ra>
// kernel: tpu_custom_call.1
= control target key start
LH: loop header
LB: loop body
LE: loop exit
PB: predicated region body
PF: predicated region fallthrough
CT: control target
= control target key end

     0   :  { %8 = vsyncpa [#allocation3], 0  ;;  %s4160_s0 = inlined_call_operand.hbm [shape: f32[196,512], index: 0, kind: input, shape index: {}]   ;;  %s4161_s1 = inlined_call_operand.hbm [shape: f32[512,2048], index: 1, kind: input, shape index: {}]   ;;  %s4162_s2 = inlined_call_operand.hbm [shape: f32[1,2048], index: 2, kind: input, shape index: {}]   ;;  %s4163_s3 = inlined_call_operand.hbm [shape: f32[196,2048], index: 3, kind: output, shape index: {}]  }
   0x1   :  { %9 = vsyncpa [#allocation6], 0 }
   0x2   :  { %11 = vsyncpa [#allocation6 + $0x1], 0 }
   0x3   :  { %12 = vsyncpa [#allocation4], 0 }
   0x4   :  { %14 = vsyncpa [#allocation4 + $0x1], 0  ;;  %s2672_s12 = smov 0   ;;  %s2674_s13 = smov 0  }
   0x5   :  { %s2676_s14 = smov 0   ;;  %s2678_s15 = smov 0  }
   0x6 LB: > { %s2693_s16 = sadd.s32 1, %s2640_s15   ;;  %s48_s17 = sadd.s32 1, %s2636_s14  ;;  %s2640_s15 = sphi %s2678_s15, %s4315_s15   ;;  %s2636_s14 = sphi %s2676_s14, %s4314_s14   ;;  %s2632_s13 = sphi %s2674_s13, %s4313_s13   ;;  %s2628_s12 = sphi %s2672_s12, %s4312_s12  }
   0x7   : > { %s45_s18 = ssub.s32 %s2640_s15, %s2693_s16  ;;  %p55_p0 = scmp.ne.s32.totalorder %s2636_s14, %s2632_s13 }
   0x8   : > { %p46_p1 = scmp.eq.s32.totalorder %s45_s18, 0  ;;  %p56_p2 = scmp.eq.s32.totalorder %s2640_s15, 0 }
   0x9   : > { %p2247_p4 = scmp.lt.s32.totalorder %s2640_s15, 4  ;;  %s150_s20 = sand.u32 1, %s2640_s15  }
   0xa   : > { %s2702_s19 = scalar_select %p46_p1, %s2636_s14, %s48_s17  }
   0xb   : > { %p57_p3 = por %p56_p2, %p55_p0  ;;  %s152_s21 = sand.u32 1, %s2636_s14  }
   0xc   : > { %s2203_s22 = sshll.u32 %s152_s21, 11  ;;  %s2217_s23 = sshll.u32 %s2640_s15, 9 }
   0xd   : > { %s2716_s26 = scalar_lea.hbm %s4161_s1, %s2217_s23  ;;  %s154_s27 = scalar_lea.vmem [#allocation5], %s2203_s22 }
   0xe   : > { %s161_s28 = sshll.u32 %s154_s27, 4  ;;  %p2718_p5 = pnand %p2247_p4, %p57_p3  ;;  %s2722_s28 = int_to_ptr.vmem [resolvable:$true] %s161_s28 }
   0xf   : > { %s2724_s30 = scalar_lea.sflag [#allocation6], %s150_s20  ;;  %s2490_s4 = scalar_lea.hbm %s2716_s26, 32768 }
  0x10   : > { %p2491_p6 = scmp.ne.s32.totalorder %s2716_s26, %s2490_s4  ;;  %p4164_p7 = pneg %p2718_p5 }
  0x11   : > { %s2495_s7 = scalar_lea.hbm %s4161_s1, 131072  ;;  %p2496_p10 = scmp.lt.s32.totalorder %s2716_s26, %s4161_s1 }
  0x12   : > { %p2493_p8 = pnand %p4164_p7, %p2491_p6  ;;  %p2497_p11 = scmp.lt.s32.totalorder %s2495_s7, %s2490_s4 }
  0x14   : > { %p2494_p9 = pneg %p2493_p8  ;;  %p2498_p12 = por %p2497_p11, %p2496_p10 }
  0x16   : > { %p2499_p13 = pnand %p2498_p12, %p2494_p9 }
  0x18   : > { %2502 = shalt.err (!%p2499_p13)
}
  0x19   : > { %s2503_s10 = scalar_lea.vmem %s2722_s28, 32768  ;;  %s2642_s11 = smov [#allocation5]  }
  0x1a   : > { %p2504_p1 = scmp.ne.s32.totalorder %s2722_s28, %s2503_s10  ;;  %s2508_s17 = sshll.u32 %s2642_s11, 4  ;;  %s2509_s17 = int_to_ptr.vmem [resolvable:$false] %s2508_s17 }
  0x1b   : > { %s2510_s18 = scalar_lea.vmem %s2509_s17, 65536  ;;  %p2511_p4 = scmp.lt.s32.totalorder %s2722_s28, %s2509_s17 }
  0x1c   : > { %p2506_p2 = pnand %p2504_p1, %p4164_p7  ;;  %p2512_p6 = scmp.lt.s32.totalorder %s2510_s18, %s2503_s10 }
  0x1e   : > { %p2507_p3 = pneg %p2506_p2  ;;  %p2513_p8 = por %p2512_p6, %p2511_p4 }
  0x20   : > { %p2514_p10 = pnand %p2513_p8, %p2507_p3 }
  0x22   : > { %2517 = shalt.err (!%p2514_p10)
}
  0x23   : > { %s2643_s20 = smov 2048   ;;  %s2644_s22 = smov 512  }
  0x24   : > { %s2645_s23 = smov 32   ;;  %s2754_s24 = sadd.s32 4294967295, %s2640_s15  }
  0x25   : > { %2238 = dma.hbm_to_vmem [thread:$0]  (!%p2718_p5), %s2716_s26, 32768, %s2722_s28, %s2724_s30, %s2643_s20, %s2644_s22, %s2645_s23  }
  0x26   : > { %s2199_s25 = sadd.s32 4294967294, %s2640_s15   ;;  %p61_p9 = scmp.ne.s32.totalorder %s2632_s13, %s2628_s12 }
  0x27   : > { %p4166_p11 = scmp.eq.s32.totalorder %s2754_s24, 0  ;;  %p111_p12 = scmp.eq.s32.totalorder %s2754_s24, 3 }
  0x28   : > { %p117_p13 = scmp.eq.s32.totalorder %s2199_s25, 3  ;;  %p2200_p1 = scmp.ge.s32.totalorder %s2640_s15, 1 }
  0x29   : > { %p2764_p2 = por %p4166_p11, %p61_p9  ;;  %p2771_p3 = por %p111_p12, %p55_p0 }
  0x2a   : > { %p2775_p4 = por %p117_p13, %p61_p9  ;;  %p124_p6 = scmp.lt.s32.totalorder %s2640_s15, 5 }
  0x2b   : > { %s4213_s27 = scalar_select %p2764_p2, 1, 0 }
  0x2c   : > { %s4214_s26 = scalar_select %p2771_p3, 1, 0 }
  0x2d   : > { %s4215_s28 = scalar_select %p2775_p4, 1, 0 }
  0x2e   : > { %p2780_p8 = pnand %p2200_p1, %p124_p6  ;;  %s2646_s5 = smov [#allocation2]  }
  0x2f   : > { %s136_s6 = sshll.u32 %s2646_s5, 4  ;;  %s2206_s7 = sshll.u32 %s152_s21, 2  ;;  %s137_s6 = int_to_ptr.vmem [resolvable:$true] %s136_s6 }
  0x30   : > { %p2231_p10 = pneg %p2780_p8  ;;  %s2218_s8 = sshll.u32 %s2640_s15, 6 }
  0x31   : > { %s175_s9 = scalar_lea.vmem [#allocation7], %s2206_s7  ;;  %s2794_s18 = scalar_lea.hbm %s4162_s2, %s2218_s8 }
  0x32   : > { %s183_s10 = sshll.u32 %s175_s9, 4  ;;  %p2232_p0 = pnand %p2231_p10, %p4166_p11  ;;  %s2796_s10 = int_to_ptr.vmem [resolvable:$true] %s183_s10 }
  0x33   : > { %s2529_s20 = scalar_lea.vmem %s137_s6, 12800  ;;  %p2537_p6 = scmp.lt.s32.totalorder %s137_s6, %s137_s6 }
  0x34   : > { %p2520_p9 = pneg %p2232_p0  ;;  %p2530_p12 = scmp.ne.s32.totalorder %s137_s6, %s2529_s20 }
  0x35   : > { %p2538_p7 = scmp.lt.s32.totalorder %s2529_s20, %s2529_s20 }
  0x36   : > { %p2532_p13 = pnand %p2530_p12, %p2520_p9 }
  0x37   : > { %p2539_p4 = por %p2538_p7, %p2537_p6 }
  0x38   : > { %p2533_p1 = pneg %p2532_p13 }
  0x3a   : > { %p2540_p3 = pnand %p2539_p4, %p2533_p1 }
  0x3c   : > { %2543 = shalt.err (!%p2540_p3)
}
  0x3d   : > { %2234 = dma.hbm_to_vmem [thread:$0]  (!%p2232_p0), %s4160_s0, 12800, %s137_s6, [#allocation3], %s2644_s22, %s2644_s22, %s2645_s23  }
  0x3e   : > { %s2544_s5 = scalar_lea.hbm %s2794_s18, 64  ;;  %p4217_p9 = pneg %p2718_p5 }
  0x3f   : > { %p2545_p10 = scmp.ne.s32.totalorder %s2794_s18, %s2544_s5  ;;  %s2549_s9 = scalar_lea.hbm %s4162_s2, 256 }
  0x40   : > { %p2550_p7 = scmp.lt.s32.totalorder %s2794_s18, %s4162_s2  ;;  %p2551_p3 = scmp.lt.s32.totalorder %s2549_s9, %s2544_s5 }
  0x41   : > { %p2547_p12 = pnand %p2545_p10, %p4217_p9 }
  0x42   : > { %p2552_p4 = por %p2551_p3, %p2550_p7 }
  0x43   : > { %p2548_p13 = pneg %p2547_p12 }
  0x45   : > { %p2553_p1 = pnand %p2552_p4, %p2548_p13 }
  0x47   : > { %2556 = shalt.err (!%p2553_p1)
}
  0x48   : > { %s2557_s22 = scalar_lea.vmem %s2796_s10, 64  ;;  %p4218_p6 = pmov %p4217_p9 }
  0x49   : > { %p2558_p0 = scmp.ne.s32.totalorder %s2796_s10, %s2557_s22  ;;  %s2647_s23 = smov [#allocation7]  }
  0x4a   : > { %s2562_s6 = sshll.u32 %s2647_s23, 4  ;;  %s2563_s6 = int_to_ptr.vmem [resolvable:$false] %s2562_s6 }
  0x4b   : > { %p2560_p10 = pnand %p2558_p0, %p4218_p6  ;;  %s2564_s20 = scalar_lea.vmem %s2563_s6, 128 }
  0x4c   : > { %p2565_p12 = scmp.lt.s32.totalorder %s2796_s10, %s2563_s6  ;;  %p2566_p11 = scmp.lt.s32.totalorder %s2564_s20, %s2557_s22 }
  0x4d   : > { %p2561_p9 = pneg %p2560_p10 }
  0x4e   : > { %p2567_p2 = por %p2566_p11, %p2565_p12 }
  0x50   : > { %p2568_p7 = pnand %p2567_p2, %p2561_p9 }
  0x52   : > { %2571 = shalt.err (!%p2568_p7)
}
  0x53   : > { %2241 = dma.hbm_to_vmem [thread:$0]  (!%p2718_p5), %s2794_s18, 64, %s2796_s10, %s2724_s30  }
  0x54   : > { %192 = sbr.rel (%p2780_p8) target bundleno = 607 (0x25f), region = 32 }
  0x59   : > { %p4219_p13 = scmp.eq.s32.totalorder %s2754_s24, 0 }
  0x5b   : > { %2615 = dma.done.wait (%p4219_p13), [#allocation3], 12800   ;;  %p4220_p3 = pmov %p4219_p13 }
  0x5c   : > { %s198_s21 = sand.u32 1, %s2754_s24   ;;  %s2835_s25 = sand.u32 1, %s2632_s13  }
  0x5d   : > { %2617 = vsyncadd (%p4220_p3), [#allocation3], 4294954496  ;;  %s2211_s29 = sshll.u32 %s2835_s25, 11  ;;  %s199_s5 = scalar_lea.sflag [#allocation6], %s198_s21 }
  0x5e   : > { %s2838_s7 = scalar_lea.vmem [#allocation5], %s2211_s29  ;;  %p4221_p5 = scmp.ne.s32.totalorder %s4213_s27, 0 }
  0x60   : > { %2619 = dma.done.wait (%p4221_p5), %s199_s5, 32832  }
  0x61   : > { %2621 = vsyncadd (%p4221_p5), %s199_s5, 4294934464  ;;  %v403_v0 = vld [vmem:[%s2838_s7 + $0x1e8] sm:$0xff]  ;;  %v402_v1 = vld [vmem:[%s2838_s7 + $0x1e0] sm:$0xff]  ;;  %s2212_s30 = sshll.u32 %s2835_s25, 2  ;;  %s2220_s4 = smul.u32 800, %s2835_s25 }
  0x62   : > { %v531_v2 = vld [vmem:[%s2838_s7 + $0x5e8] sm:$0xff]  ;;  %620 = vmatprep.subr.mxu0 %v403_v0  ;;  %v530_v4 = vld [vmem:[%s2838_s7 + $0x5e0] sm:$0xff]  ;;  %s3479_s27 = scalar_lea.vmem [#allocation7], %s2212_s30  ;;  %s2219_s18 = sshll.u32 %s2754_s24, 9 }
  0x63   : > { %835 = vmatprep.subr.mxu1 %v531_v2  ;;  %v399_v3 = vld [vmem:[%s2838_s7 + $0x1c8] sm:$0xff]  ;;  %v398_v5 = vld [vmem:[%s2838_s7 + $0x1c0] sm:$0xff]  ;;  %621 = vmatpush1.msra.mxu0 %v402_v1  ;;  %s3555_s10 = scalar_lea.vmem [#allocation8], %s2220_s4  ;;  %s4113_s17 = scalar_lea.hbm %s4163_s3, %s2219_s18 }
  0x64   : > { %836 = vmatpush1.msra.mxu1 %v530_v4  ;;  %v527_v6 = vld [vmem:[%s2838_s7 + $0x5c8] sm:$0xff]  ;;  %v526_v8 = vld [vmem:[%s2838_s7 + $0x5c0] sm:$0xff]  ;;  %622 = vmatprep.subr.mxu0 %v399_v3  ;;  %s2094_s8 = sshll.u32 %s3555_s10, 4  ;;  %s2081_s24 = scalar_lea.sflag [#allocation4], %s2835_s25  ;;  %s4116_s8 = int_to_ptr.vmem [resolvable:$true] %s2094_s8 }
  0x65   : > { %v395_v7 = vld [vmem:[%s2838_s7 + $0x1a8] sm:$0xff]  ;;  %837 = vmatprep.subr.mxu1 %v527_v6  ;;  %v394_v9 = vld [vmem:[%s2838_s7 + $0x1a0] sm:$0xff]  ;;  %623 = vmatpush1.msra.mxu0 %v398_v5  ;;  %s2572_s22 = scalar_lea.vmem %s4116_s8, 12800  ;;  %p4310_p2 = scmp.ne.s32.totalorder %s4214_s26, 0 }
  0x66   : > { %v523_v10 = vld [vmem:[%s2838_s7 + $0x5a8] sm:$0xff]  ;;  %838 = vmatpush1.msra.mxu1 %v526_v8  ;;  %v522_v12 = vld [vmem:[%s2838_s7 + $0x5a0] sm:$0xff]  ;;  %624 = vmatprep.subr.mxu0 %v395_v7  ;;  %p2573_p11 = scmp.ne.s32.totalorder %s4116_s8, %s2572_s22  ;;  %s2648_s23 = smov [#allocation8]  }
  0x67   : > { %v391_v11 = vld [vmem:[%s2838_s7 + $0x188] sm:$0xff]  ;;  %839 = vmatprep.subr.mxu1 %v523_v10  ;;  %v390_v14 = vld [vmem:[%s2838_s7 + $0x180] sm:$0xff]  ;;  %625 = vmatpush1.msra.mxu0 %v394_v9  ;;  %s2576_s6 = sshll.u32 %s2648_s23, 4  ;;  %s2577_s6 = int_to_ptr.vmem [resolvable:$false] %s2576_s6 }
  0x68   : > { %v519_v13 = vld [vmem:[%s2838_s7 + $0x588] sm:$0xff]  ;;  %v518_v15 = vld [vmem:[%s2838_s7 + $0x580] sm:$0xff]  ;;  %840 = vmatpush1.msra.mxu1 %v522_v12  ;;  %626 = vmatprep.subr.mxu0 %v391_v11  ;;  %p2574_p8 = pnand %p2573_p11, %p4310_p2  ;;  %s2578_s20 = scalar_lea.vmem %s2577_s6, 25600 }
  0x69   : > { %v387_v16 = vld [vmem:[%s2838_s7 + $0x168] sm:$0xff]  ;;  %841 = vmatprep.subr.mxu1 %v519_v13  ;;  %v386_v18 = vld [vmem:[%s2838_s7 + $0x160] sm:$0xff]  ;;  %627 = vmatpush1.msra.mxu0 %v390_v14  ;;  %p2579_p1 = scmp.lt.s32.totalorder %s4116_s8, %s2577_s6  ;;  %p2580_p0 = scmp.lt.s32.totalorder %s2578_s20, %s2572_s22 }
  0x6a   : > { %v515_v17 = vld [vmem:[%s2838_s7 + $0x568] sm:$0xff]  ;;  %v514_v19 = vld [vmem:[%s2838_s7 + $0x560] sm:$0xff]  ;;  %842 = vmatpush1.msra.mxu1 %v518_v15  ;;  %628 = vmatprep.subr.mxu0 %v387_v16  ;;  %p2575_p4 = pneg %p2574_p8 }
  0x6b   : > { %v383_v20 = vld [vmem:[%s2838_s7 + $0x148] sm:$0xff]  ;;  %843 = vmatprep.subr.mxu1 %v515_v17  ;;  %v382_v22 = vld [vmem:[%s2838_s7 + $0x140] sm:$0xff]  ;;  %629 = vmatpush1.msra.mxu0 %v386_v18  ;;  %p2581_p6 = por %p2580_p0, %p2579_p1 }
  0x6c   : > { %v511_v21 = vld [vmem:[%s2838_s7 + $0x548] sm:$0xff]  ;;  %v510_v23 = vld [vmem:[%s2838_s7 + $0x540] sm:$0xff]  ;;  %844 = vmatpush1.msra.mxu1 %v514_v19  ;;  %630 = vmatprep.subr.mxu0 %v383_v20 }
  0x6d   : > { %v379_v24 = vld [vmem:[%s2838_s7 + $0x128] sm:$0xff]  ;;  %845 = vmatprep.subr.mxu1 %v511_v21  ;;  %v378_v26 = vld [vmem:[%s2838_s7 + $0x120] sm:$0xff]  ;;  %631 = vmatpush1.msra.mxu0 %v382_v22  ;;  %p2582_p10 = pnand %p2581_p6, %p2575_p4 }
  0x6e   : > { %v507_v25 = vld [vmem:[%s2838_s7 + $0x528] sm:$0xff]  ;;  %v506_v27 = vld [vmem:[%s2838_s7 + $0x520] sm:$0xff]  ;;  %846 = vmatpush1.msra.mxu1 %v510_v23  ;;  %632 = vmatprep.subr.mxu0 %v379_v24 }
  0x6f   : > { %v375_v28 = vld [vmem:[%s2838_s7 + $0x108] sm:$0xff]  ;;  %847 = vmatprep.subr.mxu1 %v507_v25  ;;  %v374_v30 = vld [vmem:[%s2838_s7 + $0x100] sm:$0xff]  ;;  %633 = vmatpush1.msra.mxu0 %v378_v26 }
  0x70   : > { %v503_v29 = vld [vmem:[%s2838_s7 + $0x508] sm:$0xff]  ;;  %v502_v31 = vld [vmem:[%s2838_s7 + $0x500] sm:$0xff]  ;;  %848 = vmatpush1.msra.mxu1 %v506_v27  ;;  %634 = vmatprep.subr.mxu0 %v375_v28 }
  0x71   : > { %v371_v32 = vld [vmem:[%s2838_s7 + $0xe8] sm:$0xff]  ;;  %849 = vmatprep.subr.mxu1 %v503_v29  ;;  %v370_v34 = vld [vmem:[%s2838_s7 + $0xe0] sm:$0xff]  ;;  %635 = vmatpush1.msra.mxu0 %v374_v30 }
  0x72   : > { %v499_v33 = vld [vmem:[%s2838_s7 + $0x4e8] sm:$0xff]  ;;  %v498_v35 = vld [vmem:[%s2838_s7 + $0x4e0] sm:$0xff]  ;;  %850 = vmatpush1.msra.mxu1 %v502_v31  ;;  %636 = vmatprep.subr.mxu0 %v371_v32 }
  0x73   : > { %v367_v36 = vld [vmem:[%s2838_s7 + $0xc8] sm:$0xff]  ;;  %851 = vmatprep.subr.mxu1 %v499_v33  ;;  %v366_v38 = vld [vmem:[%s2838_s7 + $0xc0] sm:$0xff]  ;;  %637 = vmatpush1.msra.mxu0 %v370_v34 }
  0x74   : > { %v495_v37 = vld [vmem:[%s2838_s7 + $0x4c8] sm:$0xff]  ;;  %v494_v39 = vld [vmem:[%s2838_s7 + $0x4c0] sm:$0xff]  ;;  %852 = vmatpush1.msra.mxu1 %v498_v35  ;;  %638 = vmatprep.subr.mxu0 %v367_v36 }
  0x75   : > { %v363_v40 = vld [vmem:[%s2838_s7 + $0xa8] sm:$0xff]  ;;  %853 = vmatprep.subr.mxu1 %v495_v37  ;;  %v362_v42 = vld [vmem:[%s2838_s7 + $0xa0] sm:$0xff]  ;;  %639 = vmatpush1.msra.mxu0 %v366_v38 }
  0x76   : > { %v491_v41 = vld [vmem:[%s2838_s7 + $0x4a8] sm:$0xff]  ;;  %v490_v43 = vld [vmem:[%s2838_s7 + $0x4a0] sm:$0xff]  ;;  %854 = vmatpush1.msra.mxu1 %v494_v39  ;;  %640 = vmatprep.subr.mxu0 %v363_v40 }
  0x77   : > { %v359_v44 = vld [vmem:[%s2838_s7 + $0x88] sm:$0xff]  ;;  %855 = vmatprep.subr.mxu1 %v491_v41  ;;  %v358_v46 = vld [vmem:[%s2838_s7 + $0x80] sm:$0xff]  ;;  %641 = vmatpush1.msra.mxu0 %v362_v42 }
  0x78   : > { %v487_v45 = vld [vmem:[%s2838_s7 + $0x488] sm:$0xff]  ;;  %v486_v47 = vld [vmem:[%s2838_s7 + $0x480] sm:$0xff]  ;;  %856 = vmatpush1.msra.mxu1 %v490_v43  ;;  %642 = vmatprep.subr.mxu0 %v359_v44 }
  0x79   : > { %v355_v48 = vld [vmem:[%s2838_s7 + $0x68] sm:$0xff]  ;;  %857 = vmatprep.subr.mxu1 %v487_v45  ;;  %v354_v50 = vld [vmem:[%s2838_s7 + $0x60] sm:$0xff]  ;;  %643 = vmatpush1.msra.mxu0 %v358_v46 }
  0x7a   : > { %v483_v49 = vld [vmem:[%s2838_s7 + $0x468] sm:$0xff]  ;;  %v482_v51 = vld [vmem:[%s2838_s7 + $0x460] sm:$0xff]  ;;  %858 = vmatpush1.msra.mxu1 %v486_v47  ;;  %644 = vmatprep.subr.mxu0 %v355_v48 }
  0x7b   : > { %v351_v52 = vld [vmem:[%s2838_s7 + $0x48] sm:$0xff]  ;;  %859 = vmatprep.subr.mxu1 %v483_v49  ;;  %v350_v54 = vld [vmem:[%s2838_s7 + $0x40] sm:$0xff]  ;;  %645 = vmatpush1.msra.mxu0 %v354_v50 }
  0x7c   : > { %v479_v53 = vld [vmem:[%s2838_s7 + $0x448] sm:$0xff]  ;;  %v478_v55 = vld [vmem:[%s2838_s7 + $0x440] sm:$0xff]  ;;  %860 = vmatpush1.msra.mxu1 %v482_v51  ;;  %646 = vmatprep.subr.mxu0 %v351_v52 }
  0x7d   : > { %v347_v56 = vld [vmem:[%s2838_s7 + $0x28] sm:$0xff]  ;;  %861 = vmatprep.subr.mxu1 %v479_v53  ;;  %v346_v58 = vld [vmem:[%s2838_s7 + $0x20] sm:$0xff]  ;;  %647 = vmatpush1.msra.mxu0 %v350_v54 }
  0x7e   : > { %v475_v57 = vld [vmem:[%s2838_s7 + $0x428] sm:$0xff]  ;;  %v474_v59 = vld [vmem:[%s2838_s7 + $0x420] sm:$0xff]  ;;  %862 = vmatpush1.msra.mxu1 %v478_v55  ;;  %648 = vmatprep.subr.mxu0 %v347_v56 }
  0x7f   : > { %v343_v60 = vld [vmem:[%s2838_s7 + $0x8] sm:$0xff]  ;;  %863 = vmatprep.subr.mxu1 %v475_v57  ;;  %v342_v62 = vld [vmem:[%s2838_s7] sm:$0xff]  ;;  %649 = vmatpush1.msra.mxu0 %v346_v58 }
  0x80   : > { %v471_v61 = vld [vmem:[%s2838_s7 + $0x408] sm:$0xff]  ;;  %v470_v63 = vld [vmem:[%s2838_s7 + $0x400] sm:$0xff]  ;;  %864 = vmatpush1.msra.mxu1 %v474_v59  ;;  %650 = vmatprep.subr.mxu0 %v343_v60 }
  0x81   : > { %v467_v0 = vld [vmem:[%s2838_s7 + $0x3e8] sm:$0xff]  ;;  %865 = vmatprep.subr.mxu1 %v471_v61  ;;  %v466_v2 = vld [vmem:[%s2838_s7 + $0x3e0] sm:$0xff]  ;;  %651 = vmatpush1.msra.mxu0 %v342_v62 }
  0x82   : > { %v595_v1 = vld [vmem:[%s2838_s7 + $0x7e8] sm:$0xff]  ;;  %v594_v3 = vld [vmem:[%s2838_s7 + $0x7e0] sm:$0xff]  ;;  %866 = vmatpush1.msra.mxu1 %v470_v63  ;;  %652 = vmatprep.subr.mxu0 %v467_v0 }
  0x83   : > { %v463_v4 = vld [vmem:[%s2838_s7 + $0x3c8] sm:$0xff]  ;;  %867 = vmatprep.subr.mxu1 %v595_v1  ;;  %v462_v6 = vld [vmem:[%s2838_s7 + $0x3c0] sm:$0xff]  ;;  %653 = vmatpush2.msra.mxu0 %v466_v2  ;;  %v2977_v2 = vld [vmem:[#allocation2 + $0x18] sm:$0xff] }
  0x84   : > { %v591_v5 = vld [vmem:[%s2838_s7 + $0x7c8] sm:$0xff]  ;;  %v590_v7 = vld [vmem:[%s2838_s7 + $0x7c0] sm:$0xff]  ;;  %868 = vmatpush2.msra.mxu1 %v594_v3  ;;  %654 = vmatprep.subr.mxu0 %v463_v4  ;;  %v405_v3 = vld [vmem:[%s2838_s7 + $0x1f8] sm:$0xff] }
  0x85   : > { %v459_v8 = vld [vmem:[%s2838_s7 + $0x3a8] sm:$0xff]  ;;  %869 = vmatprep.subr.mxu1 %v591_v5  ;;  %v458_v10 = vld [vmem:[%s2838_s7 + $0x3a0] sm:$0xff]  ;;  %655 = vmatpush2.msra.mxu0 %v462_v6  ;;  %v2980_v4 = vld [vmem:[#allocation2 + $0x10] sm:$0xff] }
  0x86   : > { %v587_v9 = vld [vmem:[%s2838_s7 + $0x7a8] sm:$0xff]  ;;  %v586_v11 = vld [vmem:[%s2838_s7 + $0x7a0] sm:$0xff]  ;;  %870 = vmatpush2.msra.mxu1 %v590_v7  ;;  %656 = vmatprep.subr.mxu0 %v459_v8  ;;  %v404_v5 = vld [vmem:[%s2838_s7 + $0x1f0] sm:$0xff] }
  0x87   : > { %v455_v12 = vld [vmem:[%s2838_s7 + $0x388] sm:$0xff]  ;;  %871 = vmatprep.subr.mxu1 %v587_v9  ;;  %v454_v14 = vld [vmem:[%s2838_s7 + $0x380] sm:$0xff]  ;;  %657 = vmatpush2.msra.mxu0 %v458_v10  ;;  %v533_v6 = vld [vmem:[%s2838_s7 + $0x5f8] sm:$0xff] }
  0x88   : > { %v583_v13 = vld [vmem:[%s2838_s7 + $0x788] sm:$0xff]  ;;  %v582_v15 = vld [vmem:[%s2838_s7 + $0x780] sm:$0xff]  ;;  %872 = vmatpush2.msra.mxu1 %v586_v11  ;;  %658 = vmatprep.subr.mxu0 %v455_v12  ;;  %v532_v8 = vld [vmem:[%s2838_s7 + $0x5f0] sm:$0xff] }
  0x89   : > { %v451_v16 = vld [vmem:[%s2838_s7 + $0x368] sm:$0xff]  ;;  %873 = vmatprep.subr.mxu1 %v583_v13  ;;  %v450_v18 = vld [vmem:[%s2838_s7 + $0x360] sm:$0xff]  ;;  %659 = vmatpush2.msra.mxu0 %v454_v14  ;;  %v2992_v10 = vld [vmem:[#allocation2 + $0x38] sm:$0xff] }
  0x8a   : > { %v579_v17 = vld [vmem:[%s2838_s7 + $0x768] sm:$0xff]  ;;  %v578_v19 = vld [vmem:[%s2838_s7 + $0x760] sm:$0xff]  ;;  %874 = vmatpush2.msra.mxu1 %v582_v15  ;;  %660 = vmatprep.subr.mxu0 %v451_v16  ;;  %v401_v11 = vld [vmem:[%s2838_s7 + $0x1d8] sm:$0xff] }
  0x8b   : > { %v447_v20 = vld [vmem:[%s2838_s7 + $0x348] sm:$0xff]  ;;  %875 = vmatprep.subr.mxu1 %v579_v17  ;;  %v446_v22 = vld [vmem:[%s2838_s7 + $0x340] sm:$0xff]  ;;  %661 = vmatpush2.msra.mxu0 %v450_v18  ;;  %v2996_v12 = vld [vmem:[#allocation2 + $0x30] sm:$0xff] }
  0x8c   : > { %v575_v21 = vld [vmem:[%s2838_s7 + $0x748] sm:$0xff]  ;;  %v574_v23 = vld [vmem:[%s2838_s7 + $0x740] sm:$0xff]  ;;  %876 = vmatpush2.msra.mxu1 %v578_v19  ;;  %662 = vmatprep.subr.mxu0 %v447_v20  ;;  %v400_v13 = vld [vmem:[%s2838_s7 + $0x1d0] sm:$0xff] }
  0x8d   : > { %v443_v24 = vld [vmem:[%s2838_s7 + $0x328] sm:$0xff]  ;;  %877 = vmatprep.subr.mxu1 %v575_v21  ;;  %v442_v26 = vld [vmem:[%s2838_s7 + $0x320] sm:$0xff]  ;;  %663 = vmatpush2.msra.mxu0 %v446_v22  ;;  %v529_v14 = vld [vmem:[%s2838_s7 + $0x5d8] sm:$0xff] }
  0x8e   : > { %v571_v25 = vld [vmem:[%s2838_s7 + $0x728] sm:$0xff]  ;;  %v570_v27 = vld [vmem:[%s2838_s7 + $0x720] sm:$0xff]  ;;  %878 = vmatpush2.msra.mxu1 %v574_v23  ;;  %664 = vmatprep.subr.mxu0 %v443_v24  ;;  %v397_v16 = vld [vmem:[%s2838_s7 + $0x1b8] sm:$0xff] }
  0x8f   : > { %v439_v28 = vld [vmem:[%s2838_s7 + $0x308] sm:$0xff]  ;;  %879 = vmatprep.subr.mxu1 %v571_v25  ;;  %v438_v30 = vld [vmem:[%s2838_s7 + $0x300] sm:$0xff]  ;;  %665 = vmatpush2.msra.mxu0 %v442_v26  ;;  %v528_v17 = vld [vmem:[%s2838_s7 + $0x5d0] sm:$0xff] }
  0x90   : > { %v567_v29 = vld [vmem:[%s2838_s7 + $0x708] sm:$0xff]  ;;  %v566_v31 = vld [vmem:[%s2838_s7 + $0x700] sm:$0xff]  ;;  %880 = vmatpush2.msra.mxu1 %v570_v27  ;;  %666 = vmatprep.subr.mxu0 %v439_v28  ;;  %v3009_v19 = vld [vmem:[#allocation2 + $0x58] sm:$0xff] }
  0x91   : > { %v435_v32 = vld [vmem:[%s2838_s7 + $0x2e8] sm:$0xff]  ;;  %881 = vmatprep.subr.mxu1 %v567_v29  ;;  %v434_v34 = vld [vmem:[%s2838_s7 + $0x2e0] sm:$0xff]  ;;  %667 = vmatpush2.msra.mxu0 %v438_v30  ;;  %v396_v20 = vld [vmem:[%s2838_s7 + $0x1b0] sm:$0xff] }
  0x92   : > { %v563_v33 = vld [vmem:[%s2838_s7 + $0x6e8] sm:$0xff]  ;;  %v562_v35 = vld [vmem:[%s2838_s7 + $0x6e0] sm:$0xff]  ;;  %882 = vmatpush2.msra.mxu1 %v566_v31  ;;  %668 = vmatprep.subr.mxu0 %v435_v32  ;;  %v3013_v21 = vld [vmem:[#allocation2 + $0x50] sm:$0xff] }
  0x93   : > { %v431_v36 = vld [vmem:[%s2838_s7 + $0x2c8] sm:$0xff]  ;;  %883 = vmatprep.subr.mxu1 %v563_v33  ;;  %v430_v38 = vld [vmem:[%s2838_s7 + $0x2c0] sm:$0xff]  ;;  %669 = vmatpush2.msra.mxu0 %v434_v34  ;;  %v525_v22 = vld [vmem:[%s2838_s7 + $0x5b8] sm:$0xff] }
  0x94   : > { %v559_v37 = vld [vmem:[%s2838_s7 + $0x6c8] sm:$0xff]  ;;  %v558_v39 = vld [vmem:[%s2838_s7 + $0x6c0] sm:$0xff]  ;;  %884 = vmatpush2.msra.mxu1 %v562_v35  ;;  %670 = vmatprep.subr.mxu0 %v431_v36  ;;  %v393_v23 = vld [vmem:[%s2838_s7 + $0x198] sm:$0xff] }
  0x95   : > { %v427_v40 = vld [vmem:[%s2838_s7 + $0x2a8] sm:$0xff]  ;;  %885 = vmatprep.subr.mxu1 %v559_v37  ;;  %v426_v42 = vld [vmem:[%s2838_s7 + $0x2a0] sm:$0xff]  ;;  %671 = vmatpush2.msra.mxu0 %v430_v38  ;;  %v524_v24 = vld [vmem:[%s2838_s7 + $0x5b0] sm:$0xff] }
  0x96   : > { %v555_v41 = vld [vmem:[%s2838_s7 + $0x6a8] sm:$0xff]  ;;  %v554_v43 = vld [vmem:[%s2838_s7 + $0x6a0] sm:$0xff]  ;;  %886 = vmatpush2.msra.mxu1 %v558_v39  ;;  %672 = vmatprep.subr.mxu0 %v427_v40  ;;  %v392_v26 = vld [vmem:[%s2838_s7 + $0x190] sm:$0xff] }
  0x97   : > { %v423_v44 = vld [vmem:[%s2838_s7 + $0x288] sm:$0xff]  ;;  %887 = vmatprep.subr.mxu1 %v555_v41  ;;  %v422_v46 = vld [vmem:[%s2838_s7 + $0x280] sm:$0xff]  ;;  %673 = vmatpush2.msra.mxu0 %v426_v42  ;;  %v3024_v27 = vld [vmem:[#allocation2 + $0x78] sm:$0xff] }
  0x98   : > { %v551_v45 = vld [vmem:[%s2838_s7 + $0x688] sm:$0xff]  ;;  %v550_v47 = vld [vmem:[%s2838_s7 + $0x680] sm:$0xff]  ;;  %888 = vmatpush2.msra.mxu1 %v554_v43  ;;  %674 = vmatprep.subr.mxu0 %v423_v44  ;;  %v521_v29 = vld [vmem:[%s2838_s7 + $0x598] sm:$0xff] }
  0x99   : > { %v419_v48 = vld [vmem:[%s2838_s7 + $0x268] sm:$0xff]  ;;  %889 = vmatprep.subr.mxu1 %v551_v45  ;;  %v418_v50 = vld [vmem:[%s2838_s7 + $0x260] sm:$0xff]  ;;  %675 = vmatpush2.msra.mxu0 %v422_v46  ;;  %v3030_v30 = vld [vmem:[#allocation2 + $0x70] sm:$0xff] }
  0x9a   : > { %v547_v49 = vld [vmem:[%s2838_s7 + $0x668] sm:$0xff]  ;;  %v546_v51 = vld [vmem:[%s2838_s7 + $0x660] sm:$0xff]  ;;  %890 = vmatpush2.msra.mxu1 %v550_v47  ;;  %676 = vmatprep.subr.mxu0 %v419_v48  ;;  %v389_v31 = vld [vmem:[%s2838_s7 + $0x178] sm:$0xff] }
  0x9b   : > { %v415_v52 = vld [vmem:[%s2838_s7 + $0x248] sm:$0xff]  ;;  %891 = vmatprep.subr.mxu1 %v547_v49  ;;  %v414_v54 = vld [vmem:[%s2838_s7 + $0x240] sm:$0xff]  ;;  %677 = vmatpush2.msra.mxu0 %v418_v50  ;;  %v520_v32 = vld [vmem:[%s2838_s7 + $0x590] sm:$0xff] }
  0x9c   : > { %v543_v53 = vld [vmem:[%s2838_s7 + $0x648] sm:$0xff]  ;;  %v542_v55 = vld [vmem:[%s2838_s7 + $0x640] sm:$0xff]  ;;  %892 = vmatpush2.msra.mxu1 %v546_v51  ;;  %678 = vmatprep.subr.mxu0 %v415_v52  ;;  %v388_v33 = vld [vmem:[%s2838_s7 + $0x170] sm:$0xff] }
  0x9d   : > { %v411_v56 = vld [vmem:[%s2838_s7 + $0x228] sm:$0xff]  ;;  %893 = vmatprep.subr.mxu1 %v543_v53  ;;  %v410_v58 = vld [vmem:[%s2838_s7 + $0x220] sm:$0xff]  ;;  %679 = vmatpush2.msra.mxu0 %v414_v54  ;;  %v517_v35 = vld [vmem:[%s2838_s7 + $0x578] sm:$0xff] }
  0x9e   : > { %v539_v57 = vld [vmem:[%s2838_s7 + $0x628] sm:$0xff]  ;;  %v538_v59 = vld [vmem:[%s2838_s7 + $0x620] sm:$0xff]  ;;  %894 = vmatpush2.msra.mxu1 %v542_v55  ;;  %680 = vmatprep.subr.mxu0 %v411_v56  ;;  %v3043_v37 = vld [vmem:[#allocation2 + $0x98] sm:$0xff] }
  0x9f   : > { %v407_v60 = vld [vmem:[%s2838_s7 + $0x208] sm:$0xff]  ;;  %895 = vmatprep.subr.mxu1 %v539_v57  ;;  %v406_v62 = vld [vmem:[%s2838_s7 + $0x200] sm:$0xff]  ;;  %681 = vmatpush2.msra.mxu0 %v410_v58  ;;  %v385_v38 = vld [vmem:[%s2838_s7 + $0x158] sm:$0xff] }
  0xa0   : > { %v2969_v61 = vld [vmem:[#allocation2 + $0x8] sm:$0xff]  ;;  %896 = vmatpush2.msra.mxu1 %v538_v59  ;;  %v2973_v0 = vld [vmem:[#allocation2] sm:$0xff]  ;;  %682 = vmatprep.subr.mxu0 %v407_v60  ;;  %v516_v39 = vld [vmem:[%s2838_s7 + $0x570] sm:$0xff] }
  0xa1   : > { %v535_v63 = vld [vmem:[%s2838_s7 + $0x608] sm:$0xff]  ;;  %v534_v1 = vld [vmem:[%s2838_s7 + $0x600] sm:$0xff]  ;;  %684 = vmatprep.mubr.f32.mxu0 %v2969_v61  ;;  %683 = vmatpush2.msra.mxu0 %v406_v62  ;;  %v3048_v40 = vld [vmem:[#allocation2 + $0x90] sm:$0xff] }
  0xa2   : > { %897 = vmatprep.subr.mxu1 %v535_v63  ;;  %685 = vmatmul.mubr.f32.vlgmr.msra.gmra.mxu0 %v2973_v0  ;;  %v2985_v7 = vld [vmem:[#allocation2 + $0x28] sm:$0xff]  ;;  %v2989_v9 = vld [vmem:[#allocation2 + $0x20] sm:$0xff]  ;;  %v384_v41 = vld [vmem:[%s2838_s7 + $0x150] sm:$0xff] }
  0xa3   : > { %898 = vmatpush2.msra.mxu1 %v534_v1  ;;  %899 = vmatprep.mubr.f32.mxu1 %v2977_v2  ;;  %v3001_v15 = vld [vmem:[#allocation2 + $0x48] sm:$0xff]  ;;  %v3007_v18 = vld [vmem:[#allocation2 + $0x40] sm:$0xff]  ;;  %v513_v42 = vld [vmem:[%s2838_s7 + $0x558] sm:$0xff] }
  0xa4   : > { %1050 = vmatprep.subr.mxu0 %v405_v3  ;;  %900 = vmatmul.mubr.f32.vlgmr.msra.gmra.mxu1 %v2980_v4  ;;  %v3020_v25 = vld [vmem:[#allocation2 + $0x68] sm:$0xff]  ;;  %v3026_v28 = vld [vmem:[#allocation2 + $0x60] sm:$0xff]  ;;  %v381_v44 = vld [vmem:[%s2838_s7 + $0x138] sm:$0xff] }
  0xa5   : > { %1051 = vmatpush1.msra.mxu0 %v404_v5  ;;  %1265 = vmatprep.subr.mxu1 %v533_v6  ;;  %v3037_v34 = vld [vmem:[#allocation2 + $0x88] sm:$0xff]  ;;  %v3041_v36 = vld [vmem:[#allocation2 + $0x80] sm:$0xff]  ;;  %v512_v45 = vld [vmem:[%s2838_s7 + $0x550] sm:$0xff] }
  0xa6   : > { %690 = vmatprep.mubr.f32.mxu0 %v2985_v7  ;;  %1266 = vmatpush1.msra.mxu1 %v532_v8  ;;  %v3054_v43 = vld [vmem:[#allocation2 + $0xa8] sm:$0xff]  ;;  %v3059_v46 = vld [vmem:[#allocation2 + $0xa0] sm:$0xff]  ;;  %v3061_v47 = vld [vmem:[#allocation2 + $0xb8] sm:$0xff] }
  0xa7   : > { %691 = vmatmul.mubr.f32.gmra.mxu0 %v2989_v9  ;;  %905 = vmatprep.mubr.f32.mxu1 %v2992_v10  ;;  %v380_v48 = vld [vmem:[%s2838_s7 + $0x130] sm:$0xff]  ;;  %v509_v50 = vld [vmem:[%s2838_s7 + $0x538] sm:$0xff]  ;;  %v3072_v53 = vld [vmem:[#allocation2 + $0xc8] sm:$0xff] }
  0xa8   : > { %1052 = vmatprep.subr.mxu0 %v401_v11  ;;  %906 = vmatmul.mubr.f32.gmra.mxu1 %v2996_v12  ;;  %v3065_v49 = vld [vmem:[#allocation2 + $0xb0] sm:$0xff]  ;;  %v377_v51 = vld [vmem:[%s2838_s7 + $0x118] sm:$0xff]  ;;  %v3078_v56 = vld [vmem:[#allocation2 + $0xc0] sm:$0xff] }
  0xa9   : > { %1053 = vmatpush1.msra.mxu0 %v400_v13  ;;  %1267 = vmatprep.subr.mxu1 %v529_v14  ;;  %v508_v52 = vld [vmem:[%s2838_s7 + $0x530] sm:$0xff]  ;;  %v3076_v55 = vld [vmem:[#allocation2 + $0xd8] sm:$0xff]  ;;  %v3089_v63 = vld [vmem:[#allocation2 + $0xe8] sm:$0xff] }
  0xaa   : > { %696 = vmatprep.mubr.f32.mxu0 %v3001_v15  ;;  %1054 = vmatprep.subr.mxu0 %v397_v16  ;;  %v376_v54 = vld [vmem:[%s2838_s7 + $0x110] sm:$0xff]  ;;  %v505_v57 = vld [vmem:[%s2838_s7 + $0x518] sm:$0xff]  ;;  %v3093_v3 = vld [vmem:[#allocation2 + $0xe0] sm:$0xff] }
  0xab   : > { %1268 = vmatpush1.msra.mxu1 %v528_v17  ;;  %697 = vmatmul.mubr.f32.gmra.mxu0 %v3007_v18  ;;  %v3082_v58 = vld [vmem:[#allocation2 + $0xd0] sm:$0xff]  ;;  %v373_v59 = vld [vmem:[%s2838_s7 + $0xf8] sm:$0xff]  ;;  %v3105_v14 = vld [vmem:[#allocation2 + $0x108] sm:$0xff] }
  0xac   : > { %911 = vmatprep.mubr.f32.mxu1 %v3009_v19  ;;  %1055 = vmatpush1.msra.mxu0 %v396_v20  ;;  %v504_v60 = vld [vmem:[%s2838_s7 + $0x510] sm:$0xff]  ;;  %v501_v1 = vld [vmem:[%s2838_s7 + $0x4f8] sm:$0xff]  ;;  %v3108_v17 = vld [vmem:[#allocation2 + $0x100] sm:$0xff] }
  0xad   : > { %912 = vmatmul.mubr.f32.gmra.mxu1 %v3013_v21  ;;  %1269 = vmatprep.subr.mxu1 %v525_v22  ;;  %v372_v62 = vld [vmem:[%s2838_s7 + $0xf0] sm:$0xff]  ;;  %v3095_v5 = vld [vmem:[#allocation2 + $0xf8] sm:$0xff] }
  0xae   : > { %1056 = vmatprep.subr.mxu0 %v393_v23  ;;  %1270 = vmatpush1.msra.mxu1 %v524_v24  ;;  %v500_v6 = vld [vmem:[%s2838_s7 + $0x4f0] sm:$0xff]  ;;  %v369_v8 = vld [vmem:[%s2838_s7 + $0xd8] sm:$0xff] }
  0xaf   : > { %702 = vmatprep.mubr.f32.mxu0 %v3020_v25  ;;  %1057 = vmatpush1.msra.mxu0 %v392_v26  ;;  %v3100_v11 = vld [vmem:[#allocation2 + $0xf0] sm:$0xff]  ;;  %v497_v16 = vld [vmem:[%s2838_s7 + $0x4d8] sm:$0xff] }
  0xb0   : > { %917 = vmatprep.mubr.f32.mxu1 %v3024_v27  ;;  %703 = vmatmul.mubr.f32.gmra.mxu0 %v3026_v28  ;;  %v368_v13 = vld [vmem:[%s2838_s7 + $0xd0] sm:$0xff]  ;;  %v3110_v20 = vld [vmem:[#allocation2 + $0x118] sm:$0xff] }
  0xb1   : > { %1271 = vmatprep.subr.mxu1 %v521_v29  ;;  %918 = vmatmul.mubr.f32.gmra.mxu1 %v3030_v30  ;;  %v365_v22 = vld [vmem:[%s2838_s7 + $0xb8] sm:$0xff]  ;;  %v496_v23 = vld [vmem:[%s2838_s7 + $0x4d0] sm:$0xff] }
  0xb2   : > { %1058 = vmatprep.subr.mxu0 %v389_v31  ;;  %1272 = vmatpush1.msra.mxu1 %v520_v32  ;;  %v3116_v24 = vld [vmem:[#allocation2 + $0x110] sm:$0xff]  ;;  %v493_v29 = vld [vmem:[%s2838_s7 + $0x4b8] sm:$0xff]  ;;  %v3122_v31 = vld [vmem:[#allocation2 + $0x128] sm:$0xff] }
  0xb3   : > { %1059 = vmatpush1.msra.mxu0 %v388_v33  ;;  %708 = vmatprep.mubr.f32.mxu0 %v3037_v34  ;;  %v364_v26 = vld [vmem:[%s2838_s7 + $0xb0] sm:$0xff]  ;;  %v361_v32 = vld [vmem:[%s2838_s7 + $0x98] sm:$0xff] }
  0xb4   : > { %1273 = vmatprep.subr.mxu1 %v517_v35  ;;  %709 = vmatmul.mubr.f32.gmra.mxu0 %v3041_v36  ;;  %v492_v33 = vld [vmem:[%s2838_s7 + $0x4b0] sm:$0xff]  ;;  %v3127_v35 = vld [vmem:[#allocation2 + $0x120] sm:$0xff] }
  0xb5   : > { %923 = vmatprep.mubr.f32.mxu1 %v3043_v37  ;;  %1060 = vmatprep.subr.mxu0 %v385_v38  ;;  %v3129_v38 = vld [vmem:[#allocation2 + $0x138] sm:$0xff] }
  0xb6   : > { %1274 = vmatpush1.msra.mxu1 %v516_v39  ;;  %1061 = vmatpush1.msra.mxu0 %v384_v41  ;;  %v360_v39 = vld [vmem:[%s2838_s7 + $0x90] sm:$0xff] }
  0xb7   : > { %924 = vmatmul.mubr.f32.gmra.mxu1 %v3048_v40  ;;  %1275 = vmatprep.subr.mxu1 %v513_v42  ;;  %v3133_v41 = vld [vmem:[#allocation2 + $0x130] sm:$0xff]  ;;  %v489_v42 = vld [vmem:[%s2838_s7 + $0x498] sm:$0xff] }
  0xb8   : > { %714 = vmatprep.mubr.f32.mxu0 %v3054_v43  ;;  %1062 = vmatprep.subr.mxu0 %v381_v44  ;;  %v357_v44 = vld [vmem:[%s2838_s7 + $0x78] sm:$0xff] }
  0xb9   : > { %1276 = vmatpush1.msra.mxu1 %v512_v45  ;;  %715 = vmatmul.mubr.f32.gmra.mxu0 %v3059_v46  ;;  %v488_v45 = vld [vmem:[%s2838_s7 + $0x490] sm:$0xff] }
  0xba   : > { %929 = vmatprep.mubr.f32.mxu1 %v3061_v47  ;;  %1063 = vmatpush1.msra.mxu0 %v380_v48  ;;  %v3140_v48 = vld [vmem:[#allocation2 + $0x148] sm:$0xff] }
  0xbb   : > { %930 = vmatmul.mubr.f32.gmra.mxu1 %v3065_v49  ;;  %1277 = vmatprep.subr.mxu1 %v509_v50  ;;  %v356_v50 = vld [vmem:[%s2838_s7 + $0x70] sm:$0xff] }
  0xbc   : > { %1064 = vmatprep.subr.mxu0 %v377_v51  ;;  %1278 = vmatpush1.msra.mxu1 %v508_v52  ;;  %v3144_v51 = vld [vmem:[#allocation2 + $0x158] sm:$0xff]  ;;  %v3146_v52 = vld [vmem:[#allocation2 + $0x140] sm:$0xff] }
  0xbd   : > { %720 = vmatprep.mubr.f32.mxu0 %v3072_v53  ;;  %1065 = vmatpush1.msra.mxu0 %v376_v54  ;;  %v485_v54 = vld [vmem:[%s2838_s7 + $0x478] sm:$0xff] }
  0xbe   : > { %935 = vmatprep.mubr.f32.mxu1 %v3076_v55  ;;  %721 = vmatmul.mubr.f32.gmra.mxu0 %v3078_v56 }
  0xbf   : > { %1279 = vmatprep.subr.mxu1 %v505_v57  ;;  %936 = vmatmul.mubr.f32.gmra.mxu1 %v3082_v58  ;;  %v3150_v57 = vld [vmem:[#allocation2 + $0x150] sm:$0xff] }
  0xc0   : > { %1066 = vmatprep.subr.mxu0 %v373_v59  ;;  %1280 = vmatpush1.msra.mxu1 %v504_v60  ;;  %v353_v59 = vld [vmem:[%s2838_s7 + $0x58] sm:$0xff]  ;;  %v484_v60 = vld [vmem:[%s2838_s7 + $0x470] sm:$0xff] }
  0xc1   : > { %1067 = vmatpush1.msra.mxu0 %v372_v62  ;;  %726 = vmatprep.mubr.f32.mxu0 %v3089_v63  ;;  %v352_v62 = vld [vmem:[%s2838_s7 + $0x50] sm:$0xff] }
  0xc2   : > { %1281 = vmatprep.subr.mxu1 %v501_v1  ;;  %727 = vmatmul.mubr.f32.gmra.mxu0 %v3093_v3  ;;  %v3157_v1 = vld [vmem:[#allocation2 + $0x168] sm:$0xff] }
  0xc3   : > { %941 = vmatprep.mubr.f32.mxu1 %v3095_v5  ;;  %1282 = vmatpush1.msra.mxu1 %v500_v6  ;;  %v481_v6 = vld [vmem:[%s2838_s7 + $0x458] sm:$0xff] }
  0xc4   : > { %1068 = vmatprep.subr.mxu0 %v369_v8  ;;  %942 = vmatmul.mubr.f32.gmra.mxu1 %v3100_v11  ;;  %v3161_v8 = vld [vmem:[#allocation2 + $0x160] sm:$0xff] }
  0xc5   : > { %1069 = vmatpush1.msra.mxu0 %v368_v13  ;;  %732 = vmatprep.mubr.f32.mxu0 %v3105_v14  ;;  %v3163_v13 = vld [vmem:[#allocation2 + $0x178] sm:$0xff] }
  0xc6   : > { %1283 = vmatprep.subr.mxu1 %v497_v16  ;;  %733 = vmatmul.mubr.f32.gmra.mxu0 %v3108_v17  ;;  %v349_v16 = vld [vmem:[%s2838_s7 + $0x38] sm:$0xff] }
  0xc7   : > { %947 = vmatprep.mubr.f32.mxu1 %v3110_v20  ;;  %1070 = vmatprep.subr.mxu0 %v365_v22  ;;  %v480_v22 = vld [vmem:[%s2838_s7 + $0x450] sm:$0xff] }
  0xc8   : > { %1284 = vmatpush1.msra.mxu1 %v496_v23  ;;  %1071 = vmatpush1.msra.mxu0 %v364_v26  ;;  %v3168_v23 = vld [vmem:[#allocation2 + $0x170] sm:$0xff] }
  0xc9   : > { %948 = vmatmul.mubr.f32.gmra.mxu1 %v3116_v24  ;;  %1285 = vmatprep.subr.mxu1 %v493_v29  ;;  %v348_v26 = vld [vmem:[%s2838_s7 + $0x30] sm:$0xff]  ;;  %v477_v29 = vld [vmem:[%s2838_s7 + $0x438] sm:$0xff] }
  0xca   : > { %738 = vmatprep.mubr.f32.mxu0 %v3122_v31  ;;  %1072 = vmatprep.subr.mxu0 %v361_v32  ;;  %v3174_v32 = vld [vmem:[#allocation2 + $0x188] sm:$0xff] }
  0xcb   : > { %1286 = vmatpush1.msra.mxu1 %v492_v33  ;;  %739 = vmatmul.mubr.f32.gmra.mxu0 %v3127_v35  ;;  %v345_v33 = vld [vmem:[%s2838_s7 + $0x18] sm:$0xff] }
  0xcc   : > { %953 = vmatprep.mubr.f32.mxu1 %v3129_v38  ;;  %1073 = vmatpush1.msra.mxu0 %v360_v39  ;;  %v476_v39 = vld [vmem:[%s2838_s7 + $0x430] sm:$0xff] }
  0xcd   : > { %954 = vmatmul.mubr.f32.gmra.mxu1 %v3133_v41  ;;  %1287 = vmatprep.subr.mxu1 %v489_v42  ;;  %v3179_v42 = vld [vmem:[#allocation2 + $0x180] sm:$0xff] }
  0xce   : > { %1074 = vmatprep.subr.mxu0 %v357_v44  ;;  %1288 = vmatpush1.msra.mxu1 %v488_v45  ;;  %v3181_v44 = vld [vmem:[#allocation2 + $0x198] sm:$0xff]  ;;  %v344_v45 = vld [vmem:[%s2838_s7 + $0x10] sm:$0xff] }
  0xcf   : > { %744 = vmatprep.mubr.f32.mxu0 %v3140_v48  ;;  %1075 = vmatpush1.msra.mxu0 %v356_v50  ;;  %v3185_v50 = vld [vmem:[#allocation2 + $0x190] sm:$0xff] }
  0xd0   : > { %959 = vmatprep.mubr.f32.mxu1 %v3144_v51  ;;  %745 = vmatmul.mubr.f32.gmra.mxu0 %v3146_v52  ;;  %4222 = vst [vmem:[#allocation12_spill] sm:$0xff] %v3185_v50 }
  0xd1   : > { %1289 = vmatprep.subr.mxu1 %v485_v54  ;;  %960 = vmatmul.mubr.f32.gmra.mxu1 %v3150_v57  ;;  %v473_v54 = vld [vmem:[%s2838_s7 + $0x418] sm:$0xff] }
  0xd2   : > { %1076 = vmatprep.subr.mxu0 %v353_v59  ;;  %1290 = vmatpush1.msra.mxu1 %v484_v60  ;;  %v469_v59 = vld [vmem:[%s2838_s7 + $0x3f8] sm:$0xff]  ;;  %v472_v60 = vld [vmem:[%s2838_s7 + $0x410] sm:$0xff] }
  0xd3   : > { %1077 = vmatpush1.msra.mxu0 %v352_v62  ;;  %750 = vmatprep.mubr.f32.mxu0 %v3157_v1  ;;  %v3192_v62 = vld [vmem:[#allocation2 + $0x1a8] sm:$0xff] }
  0xd4   : > { %1291 = vmatprep.subr.mxu1 %v481_v6  ;;  %751 = vmatmul.mubr.f32.gmra.mxu0 %v3161_v8  ;;  %v468_v6 = vld [vmem:[%s2838_s7 + $0x3f0] sm:$0xff] }
  0xd5   : > { %965 = vmatprep.mubr.f32.mxu1 %v3163_v13  ;;  %1078 = vmatprep.subr.mxu0 %v349_v16  ;;  %v3196_v16 = vld [vmem:[#allocation2 + $0x1b8] sm:$0xff] }
  0xd6   : > { %1292 = vmatpush1.msra.mxu1 %v480_v22  ;;  %1079 = vmatpush1.msra.mxu0 %v348_v26  ;;  %4223 = vst [vmem:[#allocation13_spill] sm:$0xff] %v3196_v16  ;;  %v3198_v22 = vld [vmem:[#allocation2 + $0x1a0] sm:$0xff]  ;;  %v597_v26 = vld [vmem:[%s2838_s7 + $0x7f8] sm:$0xff] }
  0xd7   : > { %966 = vmatmul.mubr.f32.gmra.mxu1 %v3168_v23  ;;  %1293 = vmatprep.subr.mxu1 %v477_v29  ;;  %4224 = vst [vmem:[#allocation14_spill] sm:$0xff] %v3198_v22  ;;  %v3202_v29 = vld [vmem:[#allocation2 + $0x1b0] sm:$0xff] }
  0xd8   : > { %756 = vmatprep.mubr.f32.mxu0 %v3174_v32  ;;  %1080 = vmatprep.subr.mxu0 %v345_v33  ;;  %4225 = vst [vmem:[#allocation15_spill] sm:$0xff] %v3202_v29  ;;  %v465_v33 = vld [vmem:[%s2838_s7 + $0x3d8] sm:$0xff] }
  0xd9   : > { %1294 = vmatpush1.msra.mxu1 %v476_v39  ;;  %757 = vmatmul.mubr.f32.gmra.mxu0 %v3179_v42  ;;  %v596_v39 = vld [vmem:[%s2838_s7 + $0x7f0] sm:$0xff] }
  0xda   : > { %971 = vmatprep.mubr.f32.mxu1 %v3181_v44  ;;  %1081 = vmatpush1.msra.mxu0 %v344_v45  ;;  %v3207_v45 = vld [vmem:[#allocation2 + $0x1c8] sm:$0xff] }
  0xdb   : > { %972 = vmatmul.mubr.f32.gmra.mxu1 %v3185_v50  ;;  %1295 = vmatprep.subr.mxu1 %v473_v54  ;;  %4226 = vst [vmem:[#allocation16_spill] sm:$0xff] %v3207_v45  ;;  %v464_v54 = vld [vmem:[%s2838_s7 + $0x3d0] sm:$0xff]  ;;  %v461_v50 = vld [vmem:[%s2838_s7 + $0x3b8] sm:$0xff] }
  0xdc   : > { %1082 = vmatprep.subr.mxu0 %v469_v59  ;;  %1296 = vmatpush1.msra.mxu1 %v472_v60  ;;  %v3211_v59 = vld [vmem:[#allocation2 + $0x1d8] sm:$0xff]  ;;  %v3214_v60 = vld [vmem:[#allocation2 + $0x1c0] sm:$0xff] }
  0xdd   : > { %762 = vmatprep.mubr.f32.mxu0 %v3192_v62  ;;  %1083 = vmatpush2.msra.mxu0 %v468_v6  ;;  %4227 = vst [vmem:[#allocation17_spill] sm:$0xff] %v3211_v59  ;;  %4228 = vst [vmem:[#allocation18_spill] sm:$0xff] %v3214_v60  ;;  %v593_v6 = vld [vmem:[%s2838_s7 + $0x7d8] sm:$0xff] }
  0xde   : > { %977 = vmatprep.mubr.f32.mxu1 %v3196_v16  ;;  %763 = vmatmul.mubr.f32.gmra.mxu0 %v3198_v22  ;;  %v3218_v16 = vld [vmem:[#allocation2 + $0x1d0] sm:$0xff] }
  0xdf   : > { %1297 = vmatprep.subr.mxu1 %v597_v26  ;;  %978 = vmatmul.mubr.f32.gmra.mxu1 %v3202_v29  ;;  %4229 = vst [vmem:[#allocation19_spill] sm:$0xff] %v3218_v16  ;;  %v592_v26 = vld [vmem:[%s2838_s7 + $0x7d0] sm:$0xff]  ;;  %v3229_v29 = vld [vmem:[#allocation2 + $0x1e0] sm:$0xff] }
  0xe0   : > { %1084 = vmatprep.subr.mxu0 %v465_v33  ;;  %1298 = vmatpush2.msra.mxu1 %v596_v39  ;;  %v460_v22 = vld [vmem:[%s2838_s7 + $0x3b0] sm:$0xff]  ;;  %v3225_v33 = vld [vmem:[#allocation2 + $0x1e8] sm:$0xff]  ;;  %v589_v39 = vld [vmem:[%s2838_s7 + $0x7b8] sm:$0xff]  ;;  %4231 = vst [vmem:[#allocation21_spill] sm:$0xff] %v3229_v29 }
  0xe1   : > { %768 = vmatprep.mubr.f32.mxu0 %v3207_v45  ;;  %1085 = vmatpush2.msra.mxu0 %v464_v54  ;;  %4230 = vst [vmem:[#allocation20_spill] sm:$0xff] %v3225_v33  ;;  %v3231_v45 = vld [vmem:[#allocation2 + $0x1f8] sm:$0xff] }
  0xe2   : > { %983 = vmatprep.mubr.f32.mxu1 %v3211_v59  ;;  %769 = vmatmul.mubr.f32.gmra.mxu0 %v3214_v60  ;;  %4232 = vst [vmem:[#allocation22_spill] sm:$0xff] %v3231_v45  ;;  %v457_v54 = vld [vmem:[%s2838_s7 + $0x398] sm:$0xff]  ;;  %v588_v59 = vld [vmem:[%s2838_s7 + $0x7b0] sm:$0xff] }
  0xe3   : > { %1299 = vmatprep.subr.mxu1 %v593_v6  ;;  %984 = vmatmul.mubr.f32.gmra.mxu1 %v3218_v16  ;;  %v3236_v6 = vld [vmem:[#allocation2 + $0x1f0] sm:$0xff]  ;;  %v3242_v16 = vld [vmem:[#allocation2 + $0x208] sm:$0xff] }
  0xe4   : > { %1086 = vmatprep.subr.mxu0 %v461_v50  ;;  %1300 = vmatpush2.msra.mxu1 %v592_v26  ;;  %4233 = vst [vmem:[#allocation23_spill] sm:$0xff] %v3236_v6  ;;  %v456_v60 = vld [vmem:[%s2838_s7 + $0x390] sm:$0xff]  ;;  %v585_v50 = vld [vmem:[%s2838_s7 + $0x798] sm:$0xff]  ;;  %4234 = vst [vmem:[#allocation24_spill] sm:$0xff] %v3242_v16 }
  0xe5   : > { %1087 = vmatpush2.msra.mxu0 %v460_v22  ;;  %774 = vmatprep.mubr.f32.mxu0 %v3225_v33  ;;  %v453_v22 = vld [vmem:[%s2838_s7 + $0x378] sm:$0xff]  ;;  %v584_v26 = vld [vmem:[%s2838_s7 + $0x790] sm:$0xff] }
  0xe6   : > { %1301 = vmatprep.subr.mxu1 %v589_v39  ;;  %775 = vmatmul.mubr.f32.gmra.mxu0 %v3229_v29  ;;  %v3247_v39 = vld [vmem:[#allocation2 + $0x200] sm:$0xff]  ;;  %v3249_v33 = vld [vmem:[#allocation2 + $0x218] sm:$0xff]  ;;  %v452_v29 = vld [vmem:[%s2838_s7 + $0x370] sm:$0xff] }
  0xe7   : > { %989 = vmatprep.mubr.f32.mxu1 %v3231_v45  ;;  %1088 = vmatprep.subr.mxu0 %v457_v54  ;;  %4235 = vst [vmem:[#allocation25_spill] sm:$0xff] %v3247_v39  ;;  %4236 = vst [vmem:[#allocation26_spill] sm:$0xff] %v3249_v33  ;;  %v3253_v45 = vld [vmem:[#allocation2 + $0x210] sm:$0xff]  ;;  %v449_v54 = vld [vmem:[%s2838_s7 + $0x358] sm:$0xff] }
  0xe8   : > { %1302 = vmatpush2.msra.mxu1 %v588_v59  ;;  %1089 = vmatpush2.msra.mxu0 %v456_v60  ;;  %4237 = vst [vmem:[#allocation27_spill] sm:$0xff] %v3253_v45  ;;  %v581_v59 = vld [vmem:[%s2838_s7 + $0x778] sm:$0xff]  ;;  %v580_v60 = vld [vmem:[%s2838_s7 + $0x770] sm:$0xff] }
  0xe9   : > { %990 = vmatmul.mubr.f32.gmra.mxu1 %v3236_v6  ;;  %1303 = vmatprep.subr.mxu1 %v585_v50  ;;  %v3260_v6 = vld [vmem:[#allocation2 + $0x228] sm:$0xff]  ;;  %v448_v50 = vld [vmem:[%s2838_s7 + $0x350] sm:$0xff] }
  0xea   : > { %780 = vmatprep.mubr.f32.mxu0 %v3242_v16  ;;  %1090 = vmatprep.subr.mxu0 %v453_v22  ;;  %4238 = vst [vmem:[#allocation28_spill] sm:$0xff] %v3260_v6  ;;  %v3264_v16 = vld [vmem:[#allocation2 + $0x238] sm:$0xff]  ;;  %v3266_v22 = vld [vmem:[#allocation2 + $0x220] sm:$0xff] }
  0xeb   : > { %1304 = vmatpush2.msra.mxu1 %v584_v26  ;;  %781 = vmatmul.mubr.f32.gmra.mxu0 %v3247_v39  ;;  %4239 = vst [vmem:[#allocation29_spill] sm:$0xff] %v3264_v16  ;;  %4240 = vst [vmem:[#allocation30_spill] sm:$0xff] %v3266_v22  ;;  %v577_v26 = vld [vmem:[%s2838_s7 + $0x758] sm:$0xff]  ;;  %v3270_v39 = vld [vmem:[#allocation2 + $0x230] sm:$0xff] }
  0xec   : > { %995 = vmatprep.mubr.f32.mxu1 %v3249_v33  ;;  %1091 = vmatpush2.msra.mxu0 %v452_v29  ;;  %4241 = vst [vmem:[#allocation31_spill] sm:$0xff] %v3270_v39  ;;  %v445_v33 = vld [vmem:[%s2838_s7 + $0x338] sm:$0xff]  ;;  %v576_v29 = vld [vmem:[%s2838_s7 + $0x750] sm:$0xff] }
  0xed   : > { %996 = vmatmul.mubr.f32.gmra.mxu1 %v3253_v45  ;;  %1305 = vmatprep.subr.mxu1 %v581_v59  ;;  %v444_v45 = vld [vmem:[%s2838_s7 + $0x330] sm:$0xff]  ;;  %v3277_v59 = vld [vmem:[#allocation2 + $0x248] sm:$0xff] }
  0xee   : > { %1092 = vmatprep.subr.mxu0 %v449_v54  ;;  %1306 = vmatpush2.msra.mxu1 %v580_v60  ;;  %4242 = vst [vmem:[#allocation32_spill] sm:$0xff] %v3277_v59  ;;  %v573_v54 = vld [vmem:[%s2838_s7 + $0x738] sm:$0xff]  ;;  %v3281_v60 = vld [vmem:[#allocation2 + $0x240] sm:$0xff] }
  0xef   : > { %786 = vmatprep.mubr.f32.mxu0 %v3260_v6  ;;  %1093 = vmatpush2.msra.mxu0 %v448_v50  ;;  %4243 = vst [vmem:[#allocation33_spill] sm:$0xff] %v3281_v60  ;;  %v3283_v6 = vld [vmem:[#allocation2 + $0x258] sm:$0xff] }
  0xf0   : > { %1001 = vmatprep.mubr.f32.mxu1 %v3264_v16  ;;  %787 = vmatmul.mubr.f32.gmra.mxu0 %v3266_v22  ;;  %4244 = vst [vmem:[#allocation34_spill] sm:$0xff] %v3283_v6  ;;  %v441_v50 = vld [vmem:[%s2838_s7 + $0x318] sm:$0xff]  ;;  %v572_v16 = vld [vmem:[%s2838_s7 + $0x730] sm:$0xff] }
  0xf1   : > { %1307 = vmatprep.subr.mxu1 %v577_v26  ;;  %1002 = vmatmul.mubr.f32.gmra.mxu1 %v3270_v39  ;;  %v3288_v26 = vld [vmem:[#allocation2 + $0x250] sm:$0xff]  ;;  %v3294_v39 = vld [vmem:[#allocation2 + $0x268] sm:$0xff] }
  0xf2   : > { %1094 = vmatprep.subr.mxu0 %v445_v33  ;;  %1308 = vmatpush2.msra.mxu1 %v576_v29  ;;  %4245 = vst [vmem:[#allocation35_spill] sm:$0xff] %v3288_v26  ;;  %v440_v22 = vld [vmem:[%s2838_s7 + $0x310] sm:$0xff]  ;;  %v569_v33 = vld [vmem:[%s2838_s7 + $0x718] sm:$0xff]  ;;  %4246 = vst [vmem:[#allocation36_spill] sm:$0xff] %v3294_v39 }
  0xf3   : > { %1095 = vmatpush2.msra.mxu0 %v444_v45  ;;  %792 = vmatprep.mubr.f32.mxu0 %v3277_v59  ;;  %v437_v45 = vld [vmem:[%s2838_s7 + $0x2f8] sm:$0xff]  ;;  %v568_v29 = vld [vmem:[%s2838_s7 + $0x710] sm:$0xff] }
  0xf4   : > { %1309 = vmatprep.subr.mxu1 %v573_v54  ;;  %793 = vmatmul.mubr.f32.gmra.mxu0 %v3281_v60  ;;  %v3299_v54 = vld [vmem:[#allocation2 + $0x260] sm:$0xff]  ;;  %v3301_v59 = vld [vmem:[#allocation2 + $0x278] sm:$0xff]  ;;  %v436_v60 = vld [vmem:[%s2838_s7 + $0x2f0] sm:$0xff] }
  0xf5   : > { %1007 = vmatprep.mubr.f32.mxu1 %v3283_v6  ;;  %1096 = vmatprep.subr.mxu0 %v441_v50  ;;  %4247 = vst [vmem:[#allocation37_spill] sm:$0xff] %v3299_v54  ;;  %4248 = vst [vmem:[#allocation38_spill] sm:$0xff] %v3301_v59  ;;  %v3305_v6 = vld [vmem:[#allocation2 + $0x270] sm:$0xff]  ;;  %v3308_v50 = vld [vmem:[#allocation2 + $0x288] sm:$0xff] }
  0xf6   : > { %1310 = vmatpush2.msra.mxu1 %v572_v16  ;;  %1097 = vmatpush2.msra.mxu0 %v440_v22  ;;  %4249 = vst [vmem:[#allocation39_spill] sm:$0xff] %v3305_v6  ;;  %v565_v16 = vld [vmem:[%s2838_s7 + $0x6f8] sm:$0xff]  ;;  %4250 = vst [vmem:[#allocation40_spill] sm:$0xff] %v3308_v50  ;;  %v564_v22 = vld [vmem:[%s2838_s7 + $0x6f0] sm:$0xff] }
  0xf7   : > { %1008 = vmatmul.mubr.f32.gmra.mxu1 %v3288_v26  ;;  %1311 = vmatprep.subr.mxu1 %v569_v33  ;;  %v433_v33 = vld [vmem:[%s2838_s7 + $0x2d8] sm:$0xff]  ;;  %v3315_v26 = vld [vmem:[#allocation2 + $0x280] sm:$0xff] }
  0xf8   : > { %798 = vmatprep.mubr.f32.mxu0 %v3294_v39  ;;  %1098 = vmatprep.subr.mxu0 %v437_v45  ;;  %4251 = vst [vmem:[#allocation41_spill] sm:$0xff] %v3315_v26  ;;  %v3317_v45 = vld [vmem:[#allocation2 + $0x298] sm:$0xff]  ;;  %v3321_v39 = vld [vmem:[#allocation2 + $0x290] sm:$0xff] }
  0xf9   : > { %1312 = vmatpush2.msra.mxu1 %v568_v29  ;;  %799 = vmatmul.mubr.f32.gmra.mxu0 %v3299_v54  ;;  %4252 = vst [vmem:[#allocation42_spill] sm:$0xff] %v3317_v45  ;;  %v432_v29 = vld [vmem:[%s2838_s7 + $0x2d0] sm:$0xff]  ;;  %4253 = vst [vmem:[#allocation43_spill] sm:$0xff] %v3321_v39  ;;  %v561_v54 = vld [vmem:[%s2838_s7 + $0x6d8] sm:$0xff] }
  0xfa   : > { %1013 = vmatprep.mubr.f32.mxu1 %v3301_v59  ;;  %1099 = vmatpush2.msra.mxu0 %v436_v60  ;;  %v429_v59 = vld [vmem:[%s2838_s7 + $0x2b8] sm:$0xff]  ;;  %v560_v60 = vld [vmem:[%s2838_s7 + $0x6d0] sm:$0xff] }
  0xfb   : > { %1014 = vmatmul.mubr.f32.gmra.mxu1 %v3305_v6  ;;  %1313 = vmatprep.subr.mxu1 %v565_v16  ;;  %v3328_v6 = vld [vmem:[#allocation2 + $0x2a8] sm:$0xff]  ;;  %v428_v16 = vld [vmem:[%s2838_s7 + $0x2b0] sm:$0xff] }
  0xfc   : > { %804 = vmatprep.mubr.f32.mxu0 %v3308_v50  ;;  %1314 = vmatpush2.msra.mxu1 %v564_v22  ;;  %4254 = vst [vmem:[#allocation44_spill] sm:$0xff] %v3328_v6  ;;  %v3332_v50 = vld [vmem:[#allocation2 + $0x2b8] sm:$0xff]  ;;  %v3334_v22 = vld [vmem:[#allocation2 + $0x2a0] sm:$0xff] }
  0xfd   : > { %1100 = vmatprep.subr.mxu0 %v433_v33  ;;  %805 = vmatmul.mubr.f32.gmra.mxu0 %v3315_v26  ;;  %4255 = vst [vmem:[#allocation45_spill] sm:$0xff] %v3332_v50  ;;  %4256 = vst [vmem:[#allocation46_spill] sm:$0xff] %v3334_v22  ;;  %v557_v33 = vld [vmem:[%s2838_s7 + $0x6b8] sm:$0xff]  ;;  %v3338_v26 = vld [vmem:[#allocation2 + $0x2b0] sm:$0xff] }
  0xfe   : > { %1019 = vmatprep.mubr.f32.mxu1 %v3317_v45  ;;  %1101 = vmatpush2.msra.mxu0 %v432_v29  ;;  %4257 = vst [vmem:[#allocation47_spill] sm:$0xff] %v3338_v26  ;;  %v425_v45 = vld [vmem:[%s2838_s7 + $0x298] sm:$0xff]  ;;  %v556_v29 = vld [vmem:[%s2838_s7 + $0x6b0] sm:$0xff] }
  0xff   : > { %1020 = vmatmul.mubr.f32.gmra.mxu1 %v3321_v39  ;;  %1315 = vmatprep.subr.mxu1 %v561_v54  ;;  %v424_v39 = vld [vmem:[%s2838_s7 + $0x290] sm:$0xff]  ;;  %v553_v54 = vld [vmem:[%s2838_s7 + $0x698] sm:$0xff] }
 0x100   : > { %1102 = vmatprep.subr.mxu0 %v429_v59  ;;  %1316 = vmatpush2.msra.mxu1 %v560_v60  ;;  %v3345_v59 = vld [vmem:[#allocation2 + $0x2c8] sm:$0xff]  ;;  %v3349_v60 = vld [vmem:[#allocation2 + $0x2c0] sm:$0xff] }
 0x101   : > { %810 = vmatprep.mubr.f32.mxu0 %v3328_v6  ;;  %1103 = vmatpush2.msra.mxu0 %v428_v16  ;;  %4258 = vst [vmem:[#allocation48_spill] sm:$0xff] %v3345_v59  ;;  %4259 = vst [vmem:[#allocation49_spill] sm:$0xff] %v3349_v60  ;;  %v3351_v6 = vld [vmem:[#allocation2 + $0x2d8] sm:$0xff] }
 0x102   : > { %1025 = vmatprep.mubr.f32.mxu1 %v3332_v50  ;;  %811 = vmatmul.mubr.f32.gmra.mxu0 %v3334_v22  ;;  %4260 = vst [vmem:[#allocation50_spill] sm:$0xff] %v3351_v6  ;;  %v421_v16 = vld [vmem:[%s2838_s7 + $0x278] sm:$0xff]  ;;  %v552_v50 = vld [vmem:[%s2838_s7 + $0x690] sm:$0xff] }
 0x103   : > { %1317 = vmatprep.subr.mxu1 %v557_v33  ;;  %1026 = vmatmul.mubr.f32.gmra.mxu1 %v3338_v26  ;;  %v3356_v33 = vld [vmem:[#allocation2 + $0x2d0] sm:$0xff]  ;;  %v3362_v26 = vld [vmem:[#allocation2 + $0x2e8] sm:$0xff] }
 0x104   : > { %1104 = vmatprep.subr.mxu0 %v425_v45  ;;  %1318 = vmatpush2.msra.mxu1 %v556_v29  ;;  %4261 = vst [vmem:[#allocation51_spill] sm:$0xff] %v3356_v33  ;;  %v420_v22 = vld [vmem:[%s2838_s7 + $0x270] sm:$0xff]  ;;  %v549_v45 = vld [vmem:[%s2838_s7 + $0x678] sm:$0xff]  ;;  %4262 = vst [vmem:[#allocation52_spill] sm:$0xff] %v3362_v26 }
 0x105   : > { %1105 = vmatpush2.msra.mxu0 %v424_v39  ;;  %816 = vmatprep.mubr.f32.mxu0 %v3345_v59  ;;  %v417_v39 = vld [vmem:[%s2838_s7 + $0x258] sm:$0xff]  ;;  %v548_v29 = vld [vmem:[%s2838_s7 + $0x670] sm:$0xff] }
 0x106   : > { %1319 = vmatprep.subr.mxu1 %v553_v54  ;;  %817 = vmatmul.mubr.f32.gmra.mxu0 %v3349_v60  ;;  %v3367_v54 = vld [vmem:[#allocation2 + $0x2e0] sm:$0xff]  ;;  %v3369_v59 = vld [vmem:[#allocation2 + $0x2f8] sm:$0xff]  ;;  %v416_v60 = vld [vmem:[%s2838_s7 + $0x250] sm:$0xff] }
 0x107   : > { %1031 = vmatprep.mubr.f32.mxu1 %v3351_v6  ;;  %1106 = vmatprep.subr.mxu0 %v421_v16  ;;  %4263 = vst [vmem:[#allocation53_spill] sm:$0xff] %v3367_v54  ;;  %4264 = vst [vmem:[#allocation54_spill] sm:$0xff] %v3369_v59  ;;  %v3373_v6 = vld [vmem:[#allocation2 + $0x2f0] sm:$0xff]  ;;  %v413_v16 = vld [vmem:[%s2838_s7 + $0x238] sm:$0xff] }
 0x108   : > { %1320 = vmatpush2.msra.mxu1 %v552_v50  ;;  %1107 = vmatpush2.msra.mxu0 %v420_v22  ;;  %4265 = vst [vmem:[#allocation55_spill] sm:$0xff] %v3373_v6  ;;  %v545_v50 = vld [vmem:[%s2838_s7 + $0x658] sm:$0xff]  ;;  %v544_v22 = vld [vmem:[%s2838_s7 + $0x650] sm:$0xff] }
 0x109   : > { %1032 = vmatmul.mubr.f32.gmra.mxu1 %v3356_v33  ;;  %1321 = vmatprep.subr.mxu1 %v549_v45  ;;  %v3380_v33 = vld [vmem:[#allocation2 + $0x308] sm:$0xf]  ;;  %v412_v45 = vld [vmem:[%s2838_s7 + $0x230] sm:$0xff] }
 0x10a   : > { %822 = vmatprep.mubr.f32.mxu0 %v3362_v26  ;;  %1108 = vmatprep.subr.mxu0 %v417_v39  ;;  %v3384_v26 = vld [vmem:[#allocation2 + $0x318] sm:$0xf]  ;;  %v3386_v39 = vld [vmem:[#allocation2 + $0x300] sm:$0xf] }
 0x10b   : > { %1322 = vmatpush2.msra.mxu1 %v548_v29  ;;  %823 = vmatmul.mubr.f32.gmra.mxu0 %v3367_v54  ;;  %v541_v29 = vld [vmem:[%s2838_s7 + $0x638] sm:$0xff]  ;;  %v3390_v54 = vld [vmem:[#allocation2 + $0x310] sm:$0xf] }
 0x10c   : > { %1037 = vmatprep.mubr.f32.mxu1 %v3369_v59  ;;  %1109 = vmatpush2.msra.mxu0 %v416_v60  ;;  %v409_v59 = vld [vmem:[%s2838_s7 + $0x218] sm:$0xff]  ;;  %v540_v60 = vld [vmem:[%s2838_s7 + $0x630] sm:$0xff] }
 0x10d   : > { %1038 = vmatmul.mubr.f32.gmra.mxu1 %v3373_v6  ;;  %1323 = vmatprep.subr.mxu1 %v545_v50  ;;  %v408_v6 = vld [vmem:[%s2838_s7 + $0x210] sm:$0xff]  ;;  %v537_v50 = vld [vmem:[%s2838_s7 + $0x618] sm:$0xff] }
 0x10e   : > { %1110 = vmatprep.subr.mxu0 %v413_v16  ;;  %1324 = vmatpush2.msra.mxu1 %v544_v22  ;;  %v536_v16 = vld [vmem:[%s2838_s7 + $0x610] sm:$0xff] }
 0x10f   : > { %828 = vmatprep.mubr.f32.mxu0 %v3380_v33  ;;  %1111 = vmatpush2.msra.mxu0 %v412_v45  ;;  %v4301_v45 = vld [vmem:[#allocation48_spill] sm:$0xff] }
 0x110   : > { %1043 = vmatprep.mubr.f32.mxu1 %v3384_v26  ;;  %829 = vmatmul.mubr.f32.gmra.mxu0 %v3386_v39 }
 0x111   : > { %1325 = vmatprep.subr.mxu1 %v541_v29  ;;  %1044 = vmatmul.mubr.f32.gmra.mxu1 %v3390_v54 }
 0x112   : > { %1112 = vmatprep.subr.mxu0 %v409_v59  ;;  %1326 = vmatpush2.msra.mxu1 %v540_v60 }
 0x113   : > { %1113 = vmatpush2.msra.mxu0 %v408_v6  ;;  %1114 = vmatprep.mubr.f32.mxu0 %v2969_v61  ;;  %v4266_v61 = vld [vmem:[#allocation12_spill] sm:$0xff]  ;;  %v4300_v6 = vld [vmem:[#allocation46_spill] sm:$0xff] }
 0x114   : > { %1327 = vmatprep.subr.mxu1 %v537_v50  ;;  %1115 = vmatmul.mubr.f32.vlgmr.msra.gmra.mxu0 %v2973_v0  ;;  %v4267_v0 = vld [vmem:[#allocation13_spill] sm:$0xff]  ;;  %v4302_v50 = vld [vmem:[#allocation47_spill] sm:$0xff] }
 0x115   : > { %1328 = vmatpush2.msra.mxu1 %v536_v16  ;;  %1329 = vmatprep.mubr.f32.mxu1 %v2977_v2  ;;  %v4268_v2 = vld [vmem:[#allocation14_spill] sm:$0xff] }
 0x116   : > { %1120 = vmatprep.mubr.f32.mxu0 %v2985_v7  ;;  %1330 = vmatmul.mubr.f32.vlgmr.msra.gmra.mxu1 %v2980_v4  ;;  %v4269_v4 = vld [vmem:[#allocation16_spill] sm:$0xff]  ;;  %v4270_v7 = vld [vmem:[#allocation15_spill] sm:$0xff] }
 0x117   : > { %1335 = vmatprep.mubr.f32.mxu1 %v2992_v10  ;;  %v4272_v10 = vld [vmem:[#allocation18_spill] sm:$0xff] }
 0x118   : > { %1121 = vmatmul.mubr.f32.gmra.mxu0 %v2989_v9  ;;  %v4271_v9 = vld [vmem:[#allocation17_spill] sm:$0xff] }
 0x119   : > { %1126 = vmatprep.mubr.f32.mxu0 %v3001_v15  ;;  %v4274_v15 = vld [vmem:[#allocation19_spill] sm:$0xff] }
 0x11a   : > { %1336 = vmatmul.mubr.f32.gmra.mxu1 %v2996_v12  ;;  %v4273_v12 = vld [vmem:[#allocation20_spill] sm:$0xff] }
 0x11b   : > { %1341 = vmatprep.mubr.f32.mxu1 %v3009_v19  ;;  %v4276_v19 = vld [vmem:[#allocation21_spill] sm:$0xff] }
 0x11c   : > { %1127 = vmatmul.mubr.f32.gmra.mxu0 %v3007_v18  ;;  %v4275_v18 = vld [vmem:[#allocation22_spill] sm:$0xff] }
 0x11d   : > { %1132 = vmatprep.mubr.f32.mxu0 %v3020_v25  ;;  %v4278_v25 = vld [vmem:[#allocation23_spill] sm:$0xff] }
 0x11e   : > { %1342 = vmatmul.mubr.f32.gmra.mxu1 %v3013_v21  ;;  %v4277_v21 = vld [vmem:[#allocation24_spill] sm:$0xff] }
 0x11f   : > { %1347 = vmatprep.mubr.f32.mxu1 %v3024_v27  ;;  %v4279_v27 = vld [vmem:[#allocation26_spill] sm:$0xff] }
 0x120   : > { %1133 = vmatmul.mubr.f32.gmra.mxu0 %v3026_v28  ;;  %v600_v28 = vlaneseq }
 0x121   : > { %1138 = vmatprep.mubr.f32.mxu0 %v3037_v34  ;;  %v4281_v34 = vld [vmem:[#allocation28_spill] sm:$0xff] }
 0x122   : > { %1348 = vmatmul.mubr.f32.gmra.mxu1 %v3030_v30  ;;  %v4280_v30 = vld [vmem:[#allocation25_spill] sm:$0xff] }
 0x123   : > { %1353 = vmatprep.mubr.f32.mxu1 %v3043_v37  ;;  %v4283_v37 = vld [vmem:[#allocation29_spill] sm:$0xff] }
 0x124   : > { %1139 = vmatmul.mubr.f32.gmra.mxu0 %v3041_v36  ;;  %v4282_v36 = vld [vmem:[#allocation27_spill] sm:$0xff] }
 0x125   : > { %1144 = vmatprep.mubr.f32.mxu0 %v3054_v43  ;;  %v4284_v43 = vld [vmem:[#allocation30_spill] sm:$0xff] }
 0x126   : > { %1354 = vmatmul.mubr.f32.gmra.mxu1 %v3048_v40  ;;  %v3471_v40 = vshrl.u32 %v600_v28, 7 }
 0x127   : > { %1359 = vmatprep.mubr.f32.mxu1 %v3061_v47  ;;  %v4286_v47 = vld [vmem:[#allocation31_spill] sm:$0xff] }
 0x128   : > { %1145 = vmatmul.mubr.f32.gmra.mxu0 %v3059_v46  ;;  %v4285_v46 = vld [vmem:[#allocation32_spill] sm:$0xff] }
 0x129   : > { %1150 = vmatprep.mubr.f32.mxu0 %v3072_v53  ;;  %v602_v53 = vsub.s32 0, %v3471_v40 }
 0x12a   : > { %1360 = vmatmul.mubr.f32.gmra.mxu1 %v3065_v49  ;;  %v4287_v49 = vld [vmem:[#allocation34_spill] sm:$0xff] }
 0x12b   : > { %1365 = vmatprep.mubr.f32.mxu1 %v3076_v55  ;;  %v4288_v55 = vld [vmem:[#allocation33_spill] sm:$0xff] }
 0x12c   : > { %1151 = vmatmul.mubr.f32.gmra.mxu0 %v3078_v56  ;;  %v3482_v56 = vld [vmem:[%s3479_s27] sm:$0xf] }
 0x12d   : > { %1156 = vmatprep.mubr.f32.mxu0 %v3089_v63  ;;  %v606_v63 = vsub.s32 1, %v3471_v40 }
 0x12e   : > { %1366 = vmatmul.mubr.f32.gmra.mxu1 %v3082_v58  ;;  %v4289_v58 = vld [vmem:[#allocation36_spill] sm:$0xff] }
 0x12f   : > { %1371 = vmatprep.mubr.f32.mxu1 %v3095_v5  ;;  %v4291_v5 = vld [vmem:[#allocation38_spill] sm:$0xff] }
 0x130   : > { %1157 = vmatmul.mubr.f32.gmra.mxu0 %v3093_v3  ;;  %v4290_v3 = vld [vmem:[#allocation35_spill] sm:$0xff] }
 0x131   : > { %1162 = vmatprep.mubr.f32.mxu0 %v3105_v14  ;;  %v4292_v14 = vld [vmem:[#allocation37_spill] sm:$0xff] }
 0x132   : > { %1372 = vmatmul.mubr.f32.gmra.mxu1 %v3100_v11  ;;  %v3489_v11 = vrot.slane %v3482_v56, %v602_v53 }
 0x133   : > { %1377 = vmatprep.mubr.f32.mxu1 %v3110_v20  ;;  %v3494_v20 = vrot.slane %v3482_v56, %v606_v63 }
 0x134   : > { %1163 = vmatmul.mubr.f32.gmra.mxu0 %v3108_v17  ;;  %v4293_v17 = vld [vmem:[#allocation40_spill] sm:$0xff] }
 0x135   : > { %1168 = vmatprep.mubr.f32.mxu0 %v3122_v31 }
 0x136   : > { %1378 = vmatmul.mubr.f32.gmra.mxu1 %v3116_v24  ;;  %v4294_v24 = vld [vmem:[#allocation39_spill] sm:$0xff] }
 0x137   : > { %1383 = vmatprep.mubr.f32.mxu1 %v3129_v38 }
 0x138   : > { %1169 = vmatmul.mubr.f32.gmra.mxu0 %v3127_v35  ;;  %v4295_v35 = vld [vmem:[#allocation42_spill] sm:$0xff] }
 0x139   : > { %1174 = vmatprep.mubr.f32.mxu0 %v3140_v48 }
 0x13a   : > { %1384 = vmatmul.mubr.f32.gmra.mxu1 %v3133_v41  ;;  %v4296_v41 = vld [vmem:[#allocation41_spill] sm:$0xff] }
 0x13b   : > { %1389 = vmatprep.mubr.f32.mxu1 %v3144_v51 }
 0x13c   : > { %1175 = vmatmul.mubr.f32.gmra.mxu0 %v3146_v52  ;;  %v4297_v52 = vld [vmem:[#allocation44_spill] sm:$0xff] }
 0x13d   : > { %1180 = vmatprep.mubr.f32.mxu0 %v3157_v1 }
 0x13e   : > { %1390 = vmatmul.mubr.f32.gmra.mxu1 %v3150_v57 }
 0x13f   : > { %1395 = vmatprep.mubr.f32.mxu1 %v3163_v13 }
 0x140   : > { %1181 = vmatmul.mubr.f32.gmra.mxu0 %v3161_v8  ;;  %v4298_v8 = vld [vmem:[#allocation43_spill] sm:$0xff] }
 0x141   : > { %1186 = vmatprep.mubr.f32.mxu0 %v3174_v32  ;;  %v4299_v32 = vld [vmem:[#allocation45_spill] sm:$0xff] }
 0x142   : > { %1396 = vmatmul.mubr.f32.gmra.mxu1 %v3168_v23 }
 0x143   : > { %1401 = vmatprep.mubr.f32.mxu1 %v3181_v44 }
 0x144   : > { %1187 = vmatmul.mubr.f32.gmra.mxu0 %v3179_v42 }
 0x145   : > { %1192 = vmatprep.mubr.f32.mxu0 %v3192_v62 }
 0x146   : > { %1402 = vmatmul.mubr.f32.gmra.mxu1 %v4266_v61 }
 0x147   : > { %1407 = vmatprep.mubr.f32.mxu1 %v4267_v0  ;;  %v4303_v0 = vld [vmem:[#allocation50_spill] sm:$0xff] }
 0x148   : > { %1193 = vmatmul.mubr.f32.gmra.mxu0 %v4268_v2 }
 0x149   : > { %1198 = vmatprep.mubr.f32.mxu0 %v4269_v4 }
 0x14a   : > { %1408 = vmatmul.mubr.f32.gmra.mxu1 %v4270_v7  ;;  %v4304_v7 = vld [vmem:[#allocation49_spill] sm:$0xff] }
 0x14b   : > { %1413 = vmatprep.mubr.f32.mxu1 %v4271_v9 }
 0x14c   : > { %1199 = vmatmul.mubr.f32.gmra.mxu0 %v4272_v10 }
 0x14d   : > { %1204 = vmatprep.mubr.f32.mxu0 %v4273_v12 }
 0x14e   : > { %1414 = vmatmul.mubr.f32.gmra.mxu1 %v4274_v15  ;;  %v4305_v15 = vld [vmem:[#allocation52_spill] sm:$0xff] }
 0x14f   : > { %1419 = vmatprep.mubr.f32.mxu1 %v4275_v18 }
 0x150   : > { %1205 = vmatmul.mubr.f32.gmra.mxu0 %v4276_v19  ;;  %v4306_v19 = vld [vmem:[#allocation51_spill] sm:$0xff] }
 0x151   : > { %1210 = vmatprep.mubr.f32.mxu0 %v4277_v21 }
 0x152   : > { %1420 = vmatmul.mubr.f32.gmra.mxu1 %v4278_v25 }
 0x153   : > { %1425 = vmatprep.mubr.f32.mxu1 %v4279_v27 }
 0x154   : > { %1211 = vmatmul.mubr.f32.gmra.mxu0 %v4280_v30  ;;  %v4307_v30 = vld [vmem:[#allocation54_spill] sm:$0xff] }
 0x155   : > { %1216 = vmatprep.mubr.f32.mxu0 %v4281_v34  ;;  %v4308_v34 = vld [vmem:[#allocation53_spill] sm:$0xff] }
 0x156   : > { %1426 = vmatmul.mubr.f32.gmra.mxu1 %v4282_v36 }
 0x157   : > { %1431 = vmatprep.mubr.f32.mxu1 %v4283_v37 }
 0x158   : > { %1217 = vmatmul.mubr.f32.gmra.mxu0 %v4284_v43 }
 0x159   : > { %1222 = vmatprep.mubr.f32.mxu0 %v4285_v46 }
 0x15a   : > { %1432 = vmatmul.mubr.f32.gmra.mxu1 %v4286_v47 }
 0x15b   : > { %1437 = vmatprep.mubr.f32.mxu1 %v4287_v49  ;;  %v4309_v49 = vld [vmem:[#allocation55_spill] sm:$0xff] }
 0x15c   : > { %1223 = vmatmul.mubr.f32.gmra.mxu0 %v4288_v55 }
 0x15d   : > { %1228 = vmatprep.mubr.f32.mxu0 %v4289_v58 }
 0x15e   : > { %1438 = vmatmul.mubr.f32.gmra.mxu1 %v4290_v3 }
 0x15f   : > { %1443 = vmatprep.mubr.f32.mxu1 %v4291_v5 }
 0x160   : > { %1229 = vmatmul.mubr.f32.gmra.mxu0 %v4292_v14 }
 0x161   : > { %1234 = vmatprep.mubr.f32.mxu0 %v4293_v17 }
 0x162   : > { %1444 = vmatmul.mubr.f32.gmra.mxu1 %v4294_v24  ;;  %v686_v31 = vpop.f32.mrf.mxu0 }
 0x163   : > { %1449 = vmatprep.mubr.f32.mxu1 %v4295_v35  ;;  %v687_v38 = vadd.f32 %v686_v31, %v3489_v11 }
 0x164   : > { %1235 = vmatmul.mubr.f32.gmra.mxu0 %v4296_v41  ;;  %v901_v48 = vpop.f32.mrf.mxu1  ;;  %v688_v51 = vpop.f32.mrf.mxu0 }
 0x165   : > { %1240 = vmatprep.mubr.f32.mxu0 %v4297_v52  ;;  %v902_v57 = vadd.f32 %v901_v48, %v687_v38  ;;  %v689_v1 = vadd.f32 %v688_v51, %v3494_v20 }
 0x166   : > { %1450 = vmatmul.mubr.f32.gmra.mxu1 %v4298_v8  ;;  %v903_v13 = vpop.f32.mrf.mxu1 }
 0x167   : > { %v692_v23 = vpop.f32.mrf.mxu0  ;;  %1455 = vmatprep.mubr.f32.mxu1 %v4299_v32  ;;  %v1580_v42 = vmul.f32 0.70710677, %v902_v57  ;;  %v3504_v44 = vadd.f32 %v903_v13, %v689_v1  ;;  %v1480_v35 = vmul.f32 0.5, %v902_v57 }
 0x168   : > { %v693_v62 = vadd.f32 %v692_v23, %v3489_v11  ;;  %1241 = vmatmul.mubr.f32.gmra.mxu0 %v4300_v6  ;;  %v907_v59 = vpop.f32.mrf.mxu1 }
 0x169   : > { %v694_v22 = vpop.f32.mrf.mxu0  ;;  %1246 = vmatprep.mubr.f32.mxu0 %v4301_v45  ;;  %2289 = verf.f32 %v1580_v42  ;;  %v1581_v29 = vmul.f32 0.70710677, %v3504_v44  ;;  %v1481_v8 = vmul.f32 0.5, %v3504_v44 }
 0x16a   : > { %v3510_v60 = vadd.f32 %v907_v59, %v693_v62  ;;  %1456 = vmatmul.mubr.f32.gmra.mxu1 %v4302_v50  ;;  %v695_v16 = vadd.f32 %v694_v22, %v3494_v20  ;;  %v909_v61 = vpop.f32.mrf.mxu1 }
 0x16b   : > { %1461 = vmatprep.mubr.f32.mxu1 %v4303_v0  ;;  %2291 = verf.f32 %v1581_v29  ;;  %v698_v4 = vpop.f32.mrf.mxu0 }
 0x16c   : > { %v1584_v2 = vmul.f32 0.70710677, %v3510_v60  ;;  %1247 = vmatmul.mubr.f32.gmra.mxu0 %v4304_v7  ;;  %v3517_v9 = vadd.f32 %v909_v61, %v695_v16  ;;  %v699_v10 = vadd.f32 %v698_v4, %v3489_v11  ;;  %v1484_v59 = vmul.f32 0.5, %v3510_v60 }
 0x16d   : > { %v913_v12 = vpop.f32.mrf.mxu1  ;;  %1252 = vmatprep.mubr.f32.mxu0 %v4305_v15  ;;  %v700_v18 = vpop.f32.mrf.mxu0 }
 0x16e   : > { %2293 = verf.f32 %v1584_v2  ;;  %1462 = vmatmul.mubr.f32.gmra.mxu1 %v4306_v19  ;;  %v1585_v21 = vmul.f32 0.70710677, %v3517_v9  ;;  %v3523_v25 = vadd.f32 %v913_v12, %v699_v10  ;;  %v701_v27 = vadd.f32 %v700_v18, %v3494_v20 }
 0x16f   : > { %v915_v28 = vpop.f32.mrf.mxu1  ;;  %1467 = vmatprep.mubr.f32.mxu1 %v4307_v30  ;;  %v1485_v2 = vmul.f32 0.5, %v3517_v9 }
 0x170   : > { %1253 = vmatmul.mubr.f32.gmra.mxu0 %v4308_v34  ;;  %2295 = verf.f32 %v1585_v21  ;;  %v1588_v36 = vmul.f32 0.70710677, %v3523_v25  ;;  %v3529_v37 = vadd.f32 %v915_v28, %v701_v27  ;;  %v704_v43 = vpop.f32.mrf.mxu0  ;;  %v1488_v21 = vmul.f32 0.5, %v3523_v25 }
 0x171   : > { %1258 = vmatprep.mubr.f32.mxu0 %v3380_v33  ;;  %v705_v46 = vadd.f32 %v704_v43, %v3489_v11  ;;  %v919_v47 = vpop.f32.mrf.mxu1 }
 0x172   : > { %1468 = vmatmul.mubr.f32.gmra.mxu1 %v4309_v49  ;;  %2297 = verf.f32 %v1588_v36  ;;  %v1589_v53 = vmul.f32 0.70710677, %v3529_v37  ;;  %v706_v55 = vpop.f32.mrf.mxu0 }
 0x173   : > { %1473 = vmatprep.mubr.f32.mxu1 %v3384_v26  ;;  %v3536_v58 = vadd.f32 %v919_v47, %v705_v46  ;;  %v707_v63 = vadd.f32 %v706_v55, %v3494_v20  ;;  %v921_v3 = vpop.f32.mrf.mxu1  ;;  %v1489_v47 = vmul.f32 0.5, %v3529_v37 }
 0x174   : > { %1259 = vmatmul.mubr.f32.gmra.mxu0 %v3386_v39  ;;  %2299 = verf.f32 %v1589_v53  ;;  %v710_v33 = vpop.f32.mrf.mxu0 }
 0x175   : > { %v1592_v5 = vmul.f32 0.70710677, %v3536_v58  ;;  %v3542_v14 = vadd.f32 %v921_v3, %v707_v63  ;;  %v711_v17 = vadd.f32 %v710_v33, %v3489_v11 }
 0x176   : > { %v2290_v24 = vpop.eup %2289  ;;  %1474 = vmatmul.mubr.f32.gmra.mxu1 %v3390_v54  ;;  %v712_v31 = vpop.f32.mrf.mxu0 }
 0x177   : > { %v925_v26 = vpop.f32.mrf.mxu1  ;;  %v1780_v38 = vadd.f32 1.0, %v2290_v24  ;;  %2301 = verf.f32 %v1592_v5  ;;  %v1593_v41 = vmul.f32 0.70710677, %v3542_v14  ;;  %v713_v51 = vadd.f32 %v712_v31, %v3494_v20 }
 0x178   : > { %v2292_v48 = vpop.eup %2291  ;;  %v3547_v39 = vadd.f32 %v925_v26, %v711_v17  ;;  %v1492_v24 = vmul.f32 0.5, %v3536_v58 }
 0x179   : > { %v927_v52 = vpop.f32.mrf.mxu1  ;;  %v1880_v1 = vmul.f32 %v1780_v38, %v1480_v35  ;;  %v1781_v13 = vadd.f32 1.0, %v2292_v48  ;;  %2303 = verf.f32 %v1593_v41  ;;  %v716_v23 = vpop.f32.mrf.mxu0  ;;  %v1493_v35 = vmul.f32 0.5, %v3542_v14 }
 0x17a   : > { %v1596_v32 = vmul.f32 0.70710677, %v3547_v39  ;;  %v3552_v57 = vadd.f32 %v927_v52, %v713_v51  ;;  %v717_v42 = vadd.f32 %v716_v23, %v3489_v11 }
 0x17b   : > { %v2294_v54 = vpop.eup %2293  ;;  %v931_v62 = vpop.f32.mrf.mxu1  ;;  %1980 = vst [vmem:[%s3555_s10] sm:$0xff] %v1880_v1  ;;  %v1881_v6 = vmul.f32 %v1781_v13, %v1481_v8 }
 0x17c   : > { %v1784_v44 = vadd.f32 1.0, %v2294_v54  ;;  %v718_v22 = vpop.f32.mrf.mxu0  ;;  %2305 = verf.f32 %v1596_v32  ;;  %v1597_v45 = vmul.f32 0.70710677, %v3552_v57  ;;  %v3560_v29 = vadd.f32 %v931_v62, %v717_v42 }
 0x17d   : > { %v933_v50 = vpop.f32.mrf.mxu1  ;;  %v2296_v16 = vpop.eup %2295  ;;  %1981 = vst [vmem:[%s3555_s10 + $0x8] sm:$0xff] %v1881_v6  ;;  %v719_v0 = vadd.f32 %v718_v22, %v3494_v20  ;;  %v1496_v6 = vmul.f32 0.5, %v3547_v39 }
 0x17e   : > { %v1884_v61 = vmul.f32 %v1784_v44, %v1484_v59  ;;  %v1785_v4 = vadd.f32 1.0, %v2296_v16  ;;  %2307 = verf.f32 %v1597_v45  ;;  %v1600_v60 = vmul.f32 0.70710677, %v3560_v29  ;;  %v722_v7 = vpop.f32.mrf.mxu0 }
 0x17f   : > { %v2298_v10 = vpop.eup %2297  ;;  %v3567_v12 = vadd.f32 %v933_v50, %v719_v0  ;;  %v723_v15 = vadd.f32 %v722_v7, %v3489_v11  ;;  %v937_v18 = vpop.f32.mrf.mxu1  ;;  %v1497_v50 = vmul.f32 0.5, %v3552_v57 }
 0x180   : > { %1984 = vst [vmem:[%s3555_s10 + $0x20] sm:$0xff] %v1884_v61  ;;  %v1885_v19 = vmul.f32 %v1785_v4, %v1485_v2  ;;  %v1788_v27 = vadd.f32 1.0, %v2298_v10  ;;  %2309 = verf.f32 %v1600_v60  ;;  %v724_v9 = vpop.f32.mrf.mxu0  ;;  %v1500_v10 = vmul.f32 0.5, %v3560_v29 }
 0x181   : > { %v2300_v28 = vpop.eup %2299  ;;  %v1601_v30 = vmul.f32 0.70710677, %v3567_v12  ;;  %v3572_v34 = vadd.f32 %v937_v18, %v723_v15  ;;  %v725_v36 = vadd.f32 %v724_v9, %v3494_v20  ;;  %v939_v43 = vpop.f32.mrf.mxu1 }
 0x182   : > { %1985 = vst [vmem:[%s3555_s10 + $0x28] sm:$0xff] %v1885_v19  ;;  %v1888_v46 = vmul.f32 %v1788_v27, %v1488_v21  ;;  %v1789_v49 = vadd.f32 1.0, %v2300_v28  ;;  %v728_v53 = vpop.f32.mrf.mxu0 }
 0x183   : > { %2311 = verf.f32 %v1601_v30  ;;  %v1604_v25 = vmul.f32 0.70710677, %v3572_v34  ;;  %v3578_v55 = vadd.f32 %v939_v43, %v725_v36  ;;  %v729_v33 = vadd.f32 %v728_v53, %v3489_v11 }
 0x184   : > { %v2302_v63 = vpop.eup %2301  ;;  %1988 = vst [vmem:[%s3555_s10 + $0x40] sm:$0xff] %v1888_v46  ;;  %v1889_v3 = vmul.f32 %v1789_v49, %v1489_v47  ;;  %v943_v5 = vpop.f32.mrf.mxu1  ;;  %v1501_v46 = vmul.f32 0.5, %v3567_v12 }
 0x185   : > { %v730_v17 = vpop.f32.mrf.mxu0  ;;  %v1792_v26 = vadd.f32 1.0, %v2302_v63  ;;  %2313 = verf.f32 %v1604_v25  ;;  %v1605_v37 = vmul.f32 0.70710677, %v3578_v55  ;;  %v3586_v38 = vadd.f32 %v943_v5, %v729_v33 }
 0x186   : > { %v2304_v31 = vpop.eup %2303  ;;  %1989 = vst [vmem:[%s3555_s10 + $0x48] sm:$0xff] %v1889_v3  ;;  %v731_v41 = vadd.f32 %v730_v17, %v3494_v20  ;;  %v945_v48 = vpop.f32.mrf.mxu1  ;;  %v1504_v63 = vmul.f32 0.5, %v3572_v34 }
 0x187   : > { %v734_v51 = vpop.f32.mrf.mxu0  ;;  %v1892_v52 = vmul.f32 %v1792_v26, %v1492_v24  ;;  %v1793_v1 = vadd.f32 1.0, %v2304_v31  ;;  %2315 = verf.f32 %v1605_v37  ;;  %v1608_v8 = vmul.f32 0.70710677, %v3586_v38 }
 0x188   : > { %v735_v58 = vadd.f32 %v734_v51, %v3489_v11  ;;  %v3591_v13 = vadd.f32 %v945_v48, %v731_v41  ;;  %v1505_v41 = vmul.f32 0.5, %v3578_v55 }
 0x189   : > { %v949_v23 = vpop.f32.mrf.mxu1  ;;  %v736_v54 = vpop.f32.mrf.mxu0  ;;  %1992 = vst [vmem:[%s3555_s10 + $0x60] sm:$0xff] %v1892_v52  ;;  %v1893_v14 = vmul.f32 %v1793_v1, %v1493_v35  ;;  %2317 = verf.f32 %v1608_v8 }
 0x18a   : > { %v2306_v32 = vpop.eup %2305  ;;  %v3594_v42 = vadd.f32 %v949_v23, %v735_v58  ;;  %v737_v62 = vadd.f32 %v736_v54, %v3494_v20  ;;  %v1609_v44 = vmul.f32 0.70710677, %v3591_v13 }
 0x18b   : > { %v1796_v59 = vadd.f32 1.0, %v2306_v32  ;;  %v951_v22 = vpop.f32.mrf.mxu1  ;;  %v2308_v45 = vpop.eup %2307  ;;  %1993 = vst [vmem:[%s3555_s10 + $0x68] sm:$0xff] %v1893_v14  ;;  %v1508_v32 = vmul.f32 0.5, %v3586_v38 }
 0x18c   : > { %v1612_v16 = vmul.f32 0.70710677, %v3594_v42  ;;  %v3602_v61 = vadd.f32 %v951_v22, %v737_v62  ;;  %v740_v0 = vpop.f32.mrf.mxu0  ;;  %v1797_v4 = vadd.f32 1.0, %v2308_v45  ;;  %2319 = verf.f32 %v1609_v44 }
 0x18d   : > { %v1896_v2 = vmul.f32 %v1796_v59, %v1496_v6  ;;  %v741_v39 = vadd.f32 %v740_v0, %v3489_v11  ;;  %v955_v60 = vpop.f32.mrf.mxu1  ;;  %v2310_v7 = vpop.eup %2309  ;;  %v1512_v38 = vmul.f32 0.5, %v3594_v42 }
 0x18e   : > { %2321 = verf.f32 %v1612_v16  ;;  %v1613_v15 = vmul.f32 0.70710677, %v3602_v61  ;;  %v742_v18 = vpop.f32.mrf.mxu0  ;;  %v1897_v57 = vmul.f32 %v1797_v4, %v1497_v50  ;;  %v1800_v19 = vadd.f32 1.0, %v2310_v7 }
 0x18f   : > { %1996 = vst [vmem:[%s3555_s10 + $0x80] sm:$0xff] %v1896_v2  ;;  %v3608_v21 = vadd.f32 %v955_v60, %v741_v39  ;;  %v743_v27 = vadd.f32 %v742_v18, %v3494_v20  ;;  %v957_v9 = vpop.f32.mrf.mxu1  ;;  %v1509_v16 = vmul.f32 0.5, %v3591_v13 }
 0x190   : > { %2323 = verf.f32 %v1613_v15  ;;  %v2312_v28 = vpop.eup %2311  ;;  %1997 = vst [vmem:[%s3555_s10 + $0x88] sm:$0xff] %v1897_v57  ;;  %v1900_v30 = vmul.f32 %v1800_v19, %v1500_v10  ;;  %v746_v43 = vpop.f32.mrf.mxu0 }
 0x191   : > { %v1616_v36 = vmul.f32 0.70710677, %v3608_v21  ;;  %v3613_v29 = vadd.f32 %v957_v9, %v743_v27  ;;  %v1801_v47 = vadd.f32 1.0, %v2312_v28  ;;  %v747_v49 = vadd.f32 %v746_v43, %v3489_v11  ;;  %v961_v53 = vpop.f32.mrf.mxu1 }
 0x192   : > { %v2314_v25 = vpop.eup %2313  ;;  %2000 = vst [vmem:[%s3555_s10 + $0xa0] sm:$0xff] %v1900_v30  ;;  %v748_v33 = vpop.f32.mrf.mxu0  ;;  %v1513_v27 = vmul.f32 0.5, %v3602_v61 }
 0x193   : > { %2325 = verf.f32 %v1616_v36  ;;  %v1617_v3 = vmul.f32 0.70710677, %v3613_v29  ;;  %v1901_v5 = vmul.f32 %v1801_v47, %v1501_v46  ;;  %v1804_v17 = vadd.f32 1.0, %v2314_v25  ;;  %v963_v26 = vpop.f32.mrf.mxu1 }
 0x194   : > { %v3620_v24 = vadd.f32 %v961_v53, %v747_v49  ;;  %v749_v12 = vadd.f32 %v748_v33, %v3494_v20  ;;  %v2316_v37 = vpop.eup %2315  ;;  %v752_v31 = vpop.f32.mrf.mxu0  ;;  %v1516_v49 = vmul.f32 0.5, %v3608_v21 }
 0x195   : > { %2327 = verf.f32 %v1617_v3  ;;  %2001 = vst [vmem:[%s3555_s10 + $0xa8] sm:$0xff] %v1901_v5  ;;  %v1904_v35 = vmul.f32 %v1804_v17, %v1504_v63  ;;  %v1805_v34 = vadd.f32 1.0, %v2316_v37  ;;  %v753_v52 = vadd.f32 %v752_v31, %v3489_v11 }
 0x196   : > { %v1620_v48 = vmul.f32 0.70710677, %v3620_v24  ;;  %v3626_v51 = vadd.f32 %v963_v26, %v749_v12  ;;  %v754_v58 = vpop.f32.mrf.mxu0  ;;  %v2318_v8 = vpop.eup %2317  ;;  %v1517_v26 = vmul.f32 0.5, %v3613_v29 }
 0x197   : > { %v967_v1 = vpop.f32.mrf.mxu1  ;;  %2004 = vst [vmem:[%s3555_s10 + $0xc0] sm:$0xff] %v1904_v35  ;;  %v1905_v23 = vmul.f32 %v1805_v34, %v1505_v41  ;;  %v755_v54 = vadd.f32 %v754_v58, %v3494_v20  ;;  %v1808_v14 = vadd.f32 1.0, %v2318_v8  ;;  %v1520_v58 = vmul.f32 0.5, %v3620_v24 }
 0x198   : > { %2329 = verf.f32 %v1620_v48  ;;  %v1621_v55 = vmul.f32 0.70710677, %v3626_v51  ;;  %v3633_v62 = vadd.f32 %v967_v1, %v753_v52 }
 0x199   : > { %v969_v6 = vpop.f32.mrf.mxu1  ;;  %v2320_v59 = vpop.eup %2319  ;;  %2005 = vst [vmem:[%s3555_s10 + $0xc8] sm:$0xff] %v1905_v23  ;;  %v1908_v50 = vmul.f32 %v1808_v14, %v1508_v32 }
 0x19a   : > { %v3636_v44 = vadd.f32 %v969_v6, %v755_v54  ;;  %v758_v22 = vpop.f32.mrf.mxu0  ;;  %v1809_v0 = vadd.f32 1.0, %v2320_v59  ;;  %2331 = verf.f32 %v1621_v55  ;;  %v1624_v39 = vmul.f32 0.70710677, %v3633_v62 }
 0x19b   : > { %v2322_v45 = vpop.eup %2321  ;;  %v973_v2 = vpop.f32.mrf.mxu1  ;;  %2008 = vst [vmem:[%s3555_s10 + $0xe0] sm:$0xff] %v1908_v50  ;;  %v759_v18 = vadd.f32 %v758_v22, %v3489_v11  ;;  %v1521_v22 = vmul.f32 0.5, %v3626_v51 }
 0x19c   : > { %v1812_v4 = vadd.f32 1.0, %v2322_v45  ;;  %v1625_v60 = vmul.f32 0.70710677, %v3636_v44  ;;  %v760_v7 = vpop.f32.mrf.mxu0  ;;  %v1909_v15 = vmul.f32 %v1809_v0, %v1509_v16  ;;  %2333 = verf.f32 %v1624_v39 }
 0x19d   : > { %v2324_v10 = vpop.eup %2323  ;;  %v761_v13 = vadd.f32 %v760_v7, %v3494_v20  ;;  %v975_v57 = vpop.f32.mrf.mxu1  ;;  %v3647_v42 = vadd.f32 %v973_v2, %v759_v18 }
 0x19e   : > { %v1912_v19 = vmul.f32 %v1812_v4, %v1512_v38  ;;  %v1813_v9 = vadd.f32 1.0, %v2324_v10  ;;  %2009 = vst [vmem:[%s3555_s10 + $0xe8] sm:$0xff] %v1909_v15  ;;  %2335 = verf.f32 %v1625_v60  ;;  %v764_v30 = vpop.f32.mrf.mxu0  ;;  %v1524_v10 = vmul.f32 0.5, %v3633_v62 }
 0x19f   : > { %v3649_v28 = vadd.f32 %v975_v57, %v761_v13  ;;  %v765_v46 = vadd.f32 %v764_v30, %v3489_v11  ;;  %v979_v47 = vpop.f32.mrf.mxu1  ;;  %v1628_v61 = vmul.f32 0.70710677, %v3647_v42 }
 0x1a0   : > { %v2326_v36 = vpop.eup %2325  ;;  %2012 = vst [vmem:[%s3555_s10 + $0x100] sm:$0xff] %v1912_v19  ;;  %v1913_v43 = vmul.f32 %v1813_v9, %v1513_v27  ;;  %v766_v25 = vpop.f32.mrf.mxu0  ;;  %v1525_v19 = vmul.f32 0.5, %v3636_v44 }
 0x1a1   : > { %v1816_v53 = vadd.f32 1.0, %v2326_v36  ;;  %v1629_v3 = vmul.f32 0.70710677, %v3649_v28  ;;  %v3657_v33 = vadd.f32 %v979_v47, %v765_v46  ;;  %v767_v5 = vadd.f32 %v766_v25, %v3494_v20  ;;  %v981_v17 = vpop.f32.mrf.mxu1 }
 0x1a2   : > { %v2328_v63 = vpop.eup %2327  ;;  %2013 = vst [vmem:[%s3555_s10 + $0x108] sm:$0xff] %v1913_v43  ;;  %2337 = verf.f32 %v1628_v61  ;;  %v770_v21 = vpop.f32.mrf.mxu0  ;;  %v1528_v25 = vmul.f32 0.5, %v3647_v42 }
 0x1a3   : > { %v1916_v12 = vmul.f32 %v1816_v53, %v1516_v49  ;;  %v1817_v37 = vadd.f32 1.0, %v2328_v63  ;;  %2339 = verf.f32 %v1629_v3  ;;  %v1632_v31 = vmul.f32 0.70710677, %v3657_v33  ;;  %v985_v41 = vpop.f32.mrf.mxu1 }
 0x1a4   : > { %v3662_v35 = vadd.f32 %v981_v17, %v767_v5  ;;  %v771_v52 = vadd.f32 %v770_v21, %v3489_v11  ;;  %v772_v1 = vpop.f32.mrf.mxu0 }
 0x1a5   : > { %v2330_v34 = vpop.eup %2329  ;;  %2016 = vst [vmem:[%s3555_s10 + $0x120] sm:$0xff] %v1916_v12  ;;  %v1917_v48 = vmul.f32 %v1817_v37, %v1517_v26  ;;  %2341 = verf.f32 %v1632_v31  ;;  %v987_v23 = vpop.f32.mrf.mxu1  ;;  %v773_v32 = vadd.f32 %v772_v1, %v3494_v20  ;;  %v1529_v12 = vmul.f32 0.5, %v3649_v28 }
 0x1a6   : > { %v1820_v8 = vadd.f32 1.0, %v2330_v34  ;;  %v1633_v29 = vmul.f32 0.70710677, %v3662_v35  ;;  %v3669_v54 = vadd.f32 %v985_v41, %v771_v52  ;;  %v776_v14 = vpop.f32.mrf.mxu0  ;;  %v1532_v34 = vmul.f32 0.5, %v3657_v33 }
 0x1a7   : > { %2017 = vst [vmem:[%s3555_s10 + $0x128] sm:$0xff] %v1917_v48  ;;  %v2332_v55 = vpop.eup %2331  ;;  %v777_v59 = vadd.f32 %v776_v14, %v3489_v11  ;;  %v3675_v50 = vadd.f32 %v987_v23, %v773_v32  ;;  %v1533_v33 = vmul.f32 0.5, %v3662_v35 }
 0x1a8   : > { %v1920_v6 = vmul.f32 %v1820_v8, %v1520_v58  ;;  %2343 = verf.f32 %v1633_v29  ;;  %v1821_v24 = vadd.f32 1.0, %v2332_v55  ;;  %v1636_v45 = vmul.f32 0.70710677, %v3669_v54  ;;  %v778_v0 = vpop.f32.mrf.mxu0 }
 0x1a9   : > { %v991_v16 = vpop.f32.mrf.mxu1  ;;  %v779_v38 = vadd.f32 %v778_v0, %v3494_v20  ;;  %v2334_v4 = vpop.eup %2333  ;;  %v1637_v60 = vmul.f32 0.70710677, %v3675_v50 }
 0x1aa   : > { %2020 = vst [vmem:[%s3555_s10 + $0x140] sm:$0xff] %v1920_v6  ;;  %v3678_v2 = vadd.f32 %v991_v16, %v777_v59  ;;  %v1921_v39 = vmul.f32 %v1821_v24, %v1521_v22  ;;  %2345 = verf.f32 %v1636_v45  ;;  %v1824_v15 = vadd.f32 1.0, %v2334_v4 }
 0x1ab   : > { %v993_v7 = vpop.f32.mrf.mxu1  ;;  %v2336_v51 = vpop.eup %2335  ;;  %2347 = verf.f32 %v1637_v60 }
 0x1ac   : > { %v1640_v18 = vmul.f32 0.70710677, %v3678_v2  ;;  %v3684_v13 = vadd.f32 %v993_v7, %v779_v38  ;;  %v782_v57 = vpop.f32.mrf.mxu0  ;;  %2021 = vst [vmem:[%s3555_s10 + $0x148] sm:$0xff] %v1921_v39  ;;  %v1825_v27 = vadd.f32 1.0, %v2336_v51  ;;  %v1924_v36 = vmul.f32 %v1824_v15, %v1524_v10 }
 0x1ad   : > { %v783_v9 = vadd.f32 %v782_v57, %v3489_v11  ;;  %v997_v30 = vpop.f32.mrf.mxu1  ;;  %v1536_v38 = vmul.f32 0.5, %v3669_v54  ;;  %v1537_v57 = vmul.f32 0.5, %v3675_v50  ;;  %v1540_v54 = vmul.f32 0.5, %v3678_v2 }
 0x1ae   : > { %2349 = verf.f32 %v1640_v18  ;;  %v1641_v62 = vmul.f32 0.70710677, %v3684_v13  ;;  %v784_v43 = vpop.f32.mrf.mxu0  ;;  %v1925_v46 = vmul.f32 %v1825_v27, %v1525_v19  ;;  %2024 = vst [vmem:[%s3555_s10 + $0x160] sm:$0xff] %v1924_v36 }
 0x1af   : > { %v3690_v47 = vadd.f32 %v997_v30, %v783_v9  ;;  %v785_v49 = vadd.f32 %v784_v43, %v3494_v20  ;;  %v999_v53 = vpop.f32.mrf.mxu1  ;;  %v2338_v61 = vpop.eup %2337 }
 0x1b0   : > { %2351 = verf.f32 %v1641_v62  ;;  %v2340_v44 = vpop.eup %2339  ;;  %2025 = vst [vmem:[%s3555_s10 + $0x168] sm:$0xff] %v1925_v46  ;;  %v1828_v63 = vadd.f32 1.0, %v2338_v61  ;;  %v788_v17 = vpop.f32.mrf.mxu0 }
 0x1b1   : > { %v1644_v3 = vmul.f32 0.70710677, %v3690_v47  ;;  %v3697_v5 = vadd.f32 %v999_v53, %v785_v49  ;;  %v1829_v26 = vadd.f32 1.0, %v2340_v44  ;;  %v789_v37 = vadd.f32 %v788_v17, %v3489_v11  ;;  %v1003_v21 = vpop.f32.mrf.mxu1 }
 0x1b2   : > { %v2342_v31 = vpop.eup %2341  ;;  %v1928_v41 = vmul.f32 %v1828_v63, %v1528_v25  ;;  %v790_v48 = vpop.f32.mrf.mxu0  ;;  %v1541_v44 = vmul.f32 0.5, %v3684_v13 }
 0x1b3   : > { %2353 = verf.f32 %v1644_v3  ;;  %v1645_v42 = vmul.f32 0.70710677, %v3697_v5  ;;  %v1929_v52 = vmul.f32 %v1829_v26, %v1529_v12  ;;  %v1832_v1 = vadd.f32 1.0, %v2342_v31  ;;  %v1005_v8 = vpop.f32.mrf.mxu1 }
 0x1b4   : > { %v3703_v58 = vadd.f32 %v1003_v21, %v789_v37  ;;  %v791_v28 = vadd.f32 %v790_v48, %v3494_v20  ;;  %2028 = vst [vmem:[%s3555_s10 + $0x180] sm:$0xff] %v1928_v41  ;;  %v794_v23 = vpop.f32.mrf.mxu0  ;;  %v1544_v31 = vmul.f32 0.5, %v3690_v47 }
 0x1b5   : > { %v2344_v29 = vpop.eup %2343  ;;  %2355 = verf.f32 %v1645_v42  ;;  %2029 = vst [vmem:[%s3555_s10 + $0x188] sm:$0xff] %v1929_v52  ;;  %v1932_v32 = vmul.f32 %v1832_v1, %v1532_v34  ;;  %v795_v59 = vadd.f32 %v794_v23, %v3489_v11 }
 0x1b6   : > { %v1833_v14 = vadd.f32 1.0, %v2344_v29  ;;  %v1648_v55 = vmul.f32 0.70710677, %v3703_v58  ;;  %v3710_v6 = vadd.f32 %v1005_v8, %v791_v28  ;;  %v796_v24 = vpop.f32.mrf.mxu0  ;;  %v1545_v8 = vmul.f32 0.5, %v3697_v5 }
 0x1b7   : > { %v1009_v22 = vpop.f32.mrf.mxu1  ;;  %v2346_v45 = vpop.eup %2345  ;;  %2032 = vst [vmem:[%s3555_s10 + $0x1a0] sm:$0xff] %v1932_v32  ;;  %v797_v0 = vadd.f32 %v796_v24, %v3494_v20  ;;  %v1548_v24 = vmul.f32 0.5, %v3703_v58 }
 0x1b8   : > { %v1933_v16 = vmul.f32 %v1833_v14, %v1533_v33  ;;  %2357 = verf.f32 %v1648_v55  ;;  %v1836_v4 = vadd.f32 1.0, %v2346_v45  ;;  %v1649_v35 = vmul.f32 0.70710677, %v3710_v6  ;;  %v2348_v7 = vpop.eup %2347 }
 0x1b9   : > { %v3717_v39 = vadd.f32 %v1009_v22, %v795_v59  ;;  %v1011_v60 = vpop.f32.mrf.mxu1  ;;  %v800_v10 = vpop.f32.mrf.mxu0  ;;  %v1837_v19 = vadd.f32 1.0, %v2348_v7 }
 0x1ba   : > { %2033 = vst [vmem:[%s3555_s10 + $0x1a8] sm:$0xff] %v1933_v16  ;;  %v3720_v51 = vadd.f32 %v1011_v60, %v797_v0  ;;  %v1936_v18 = vmul.f32 %v1836_v4, %v1536_v38  ;;  %2359 = verf.f32 %v1649_v35  ;;  %v801_v49 = vadd.f32 %v800_v10, %v3489_v11 }
 0x1bb   : > { %v2350_v15 = vpop.eup %2349  ;;  %v1015_v27 = vpop.f32.mrf.mxu1  ;;  %v1652_v30 = vmul.f32 0.70710677, %v3717_v39  ;;  %v1937_v46 = vmul.f32 %v1837_v19, %v1537_v57  ;;  %v1549_v10 = vmul.f32 0.5, %v3710_v6  ;;  %v610_v6 = vsub.s32 2, %v3471_v40 }
 0x1bc   : > { %v1840_v9 = vadd.f32 1.0, %v2350_v15  ;;  %v1653_v36 = vmul.f32 0.70710677, %v3720_v51  ;;  %v802_v62 = vpop.f32.mrf.mxu0  ;;  %2036 = vst [vmem:[%s3555_s10 + $0x1c0] sm:$0xff] %v1936_v18  ;;  %v3731_v63 = vadd.f32 %v1015_v27, %v801_v49 }
 0x1bd   : > { %v2352_v43 = vpop.eup %2351  ;;  %v803_v50 = vadd.f32 %v802_v62, %v3494_v20  ;;  %v1017_v53 = vpop.f32.mrf.mxu1  ;;  %2361 = verf.f32 %v1652_v30  ;;  %2037 = vst [vmem:[%s3555_s10 + $0x1c8] sm:$0xff] %v1937_v46  ;;  %v1552_v46 = vmul.f32 0.5, %v3717_v39 }
 0x1be   : > { %v1940_v61 = vmul.f32 %v1840_v9, %v1540_v54  ;;  %v1841_v2 = vadd.f32 1.0, %v2352_v43  ;;  %v806_v25 = vpop.f32.mrf.mxu0  ;;  %2363 = verf.f32 %v1653_v36  ;;  %v1656_v41 = vmul.f32 0.70710677, %v3731_v63 }
 0x1bf   : > { %v3733_v3 = vadd.f32 %v1017_v53, %v803_v50  ;;  %v807_v17 = vadd.f32 %v806_v25, %v3489_v11  ;;  %v1021_v12 = vpop.f32.mrf.mxu1 }
 0x1c0   : > { %v2354_v26 = vpop.eup %2353  ;;  %2040 = vst [vmem:[%s3555_s10 + $0x1e0] sm:$0xff] %v1940_v61  ;;  %v1941_v37 = vmul.f32 %v1841_v2, %v1541_v44  ;;  %v808_v21 = vpop.f32.mrf.mxu0  ;;  %2365 = verf.f32 %v1656_v41  ;;  %v1553_v44 = vmul.f32 0.5, %v3720_v51 }
 0x1c1   : > { %v1844_v13 = vadd.f32 1.0, %v2354_v26  ;;  %v1023_v34 = vpop.f32.mrf.mxu1  ;;  %v1657_v48 = vmul.f32 0.70710677, %v3733_v3  ;;  %v3741_v52 = vadd.f32 %v1021_v12, %v807_v17  ;;  %v809_v1 = vadd.f32 %v808_v21, %v3494_v20 }
 0x1c2   : > { %v2356_v42 = vpop.eup %2355  ;;  %2041 = vst [vmem:[%s3555_s10 + $0x1e8] sm:$0xff] %v1941_v37  ;;  %v812_v47 = vpop.f32.mrf.mxu0  ;;  %v614_v37 = vsub.s32 3, %v3471_v40 }
 0x1c3   : > { %v1944_v28 = vmul.f32 %v1844_v13, %v1544_v31  ;;  %v1845_v29 = vadd.f32 1.0, %v2356_v42  ;;  %2367 = verf.f32 %v1657_v48  ;;  %v1660_v23 = vmul.f32 0.70710677, %v3741_v52  ;;  %v1027_v33 = vpop.f32.mrf.mxu1 }
 0x1c4   : > { %v3746_v32 = vadd.f32 %v1023_v34, %v809_v1  ;;  %v813_v59 = vadd.f32 %v812_v47, %v3489_v11  ;;  %v814_v22 = vpop.f32.mrf.mxu0  ;;  %v3781_v34 = vrot.slane %v3482_v56, %v610_v6  ;;  %v1556_v48 = vmul.f32 0.5, %v3731_v63 }
 0x1c5   : > { %v2358_v14 = vpop.eup %2357  ;;  %2044 = vst [vmem:[%s3555_s10 + $0x200] sm:$0xff] %v1944_v28  ;;  %v1945_v55 = vmul.f32 %v1845_v29, %v1545_v8  ;;  %2369 = verf.f32 %v1660_v23  ;;  %v1029_v16 = vpop.f32.mrf.mxu1  ;;  %v815_v38 = vadd.f32 %v814_v22, %v3494_v20  ;;  %v1557_v29 = vmul.f32 0.5, %v3733_v3 }
 0x1c6   : > { %v1848_v45 = vadd.f32 1.0, %v2358_v14  ;;  %v1661_v5 = vmul.f32 0.70710677, %v3746_v32  ;;  %v3753_v0 = vadd.f32 %v1027_v33, %v813_v59  ;;  %v818_v4 = vpop.f32.mrf.mxu0  ;;  %v2489_v14 = vld [vmem:[%s3479_s27] sm:$0xf]  ;;  %v1560_v63 = vmul.f32 0.5, %v3741_v52 }
 0x1c7   : > { %2045 = vst [vmem:[%s3555_s10 + $0x208] sm:$0xff] %v1945_v55  ;;  %v2360_v35 = vpop.eup %2359  ;;  %v819_v7 = vadd.f32 %v818_v4, %v3489_v11  ;;  %v3759_v18 = vadd.f32 %v1029_v16, %v815_v38  ;;  %v3791_v56 = vrot.slane %v2489_v14, %v614_v37  ;;  %v1561_v52 = vmul.f32 0.5, %v3746_v32 }
 0x1c8   : > { %v1948_v60 = vmul.f32 %v1848_v45, %v1548_v24  ;;  %2371 = verf.f32 %v1661_v5  ;;  %v1849_v58 = vadd.f32 1.0, %v2360_v35  ;;  %v1664_v15 = vmul.f32 0.70710677, %v3753_v0  ;;  %v820_v19 = vpop.f32.mrf.mxu0 }
 0x1c9   : > { %v1033_v57 = vpop.f32.mrf.mxu1  ;;  %v821_v54 = vadd.f32 %v820_v19, %v3494_v20  ;;  %v1665_v36 = vmul.f32 0.70710677, %v3759_v18 }
 0x1ca   : > { %2048 = vst [vmem:[%s3555_s10 + $0x220] sm:$0xff] %v1948_v60  ;;  %v3762_v27 = vadd.f32 %v1033_v57, %v819_v7  ;;  %v2362_v9 = vpop.eup %2361  ;;  %v1949_v30 = vmul.f32 %v1849_v58, %v1549_v10  ;;  %2373 = verf.f32 %v1664_v15 }
 0x1cb   : > { %v1035_v62 = vpop.f32.mrf.mxu1  ;;  %v2364_v43 = vpop.eup %2363  ;;  %v1852_v49 = vadd.f32 1.0, %v2362_v9  ;;  %2375 = verf.f32 %v1665_v36  ;;  %v1564_v9 = vmul.f32 0.5, %v3753_v0 }
 0x1cc   : > { %v1668_v50 = vmul.f32 0.70710677, %v3762_v27  ;;  %v3769_v53 = vadd.f32 %v1035_v62, %v821_v54  ;;  %v824_v61 = vpop.f32.mrf.mxu0  ;;  %2049 = vst [vmem:[%s3555_s10 + $0x228] sm:$0xff] %v1949_v30  ;;  %v1853_v2 = vadd.f32 1.0, %v2364_v43 }
 0x1cd   : > { %v825_v25 = vadd.f32 %v824_v61, %v3489_v11  ;;  %v1039_v17 = vpop.f32.mrf.mxu1  ;;  %v1952_v12 = vmul.f32 %v1852_v49, %v1552_v46  ;;  %v2366_v51 = vpop.eup %2365 }
 0x1ce   : > { %2377 = verf.f32 %v1668_v50  ;;  %v1669_v39 = vmul.f32 0.70710677, %v3769_v53  ;;  %v826_v26 = vpop.f32.mrf.mxu0  ;;  %v1953_v21 = vmul.f32 %v1853_v2, %v1553_v44  ;;  %v1856_v1 = vadd.f32 1.0, %v2366_v51 }
 0x1cf   : > { %v3776_v31 = vadd.f32 %v1039_v17, %v825_v25  ;;  %v827_v13 = vadd.f32 %v826_v26, %v3494_v20  ;;  %v1041_v41 = vpop.f32.mrf.mxu1  ;;  %2052 = vst [vmem:[%s3555_s10 + $0x240] sm:$0xff] %v1952_v12  ;;  %v1565_v44 = vmul.f32 0.5, %v3759_v18  ;;  %v1568_v17 = vmul.f32 0.5, %v3762_v27 }
 0x1d0   : > { %2379 = verf.f32 %v1669_v39  ;;  %v2368_v42 = vpop.eup %2367  ;;  %2053 = vst [vmem:[%s3555_s10 + $0x248] sm:$0xff] %v1953_v21  ;;  %v830_v8 = vpop.f32.mrf.mxu0  ;;  %v1956_v59 = vmul.f32 %v1856_v1, %v1556_v48 }
 0x1d1   : > { %v1672_v40 = vmul.f32 0.70710677, %v3776_v31  ;;  %v3786_v28 = vadd.f32 %v1041_v41, %v827_v13  ;;  %v1857_v47 = vadd.f32 1.0, %v2368_v42  ;;  %v831_v23 = vadd.f32 %v830_v8, %v3489_v11  ;;  %v1045_v33 = vpop.f32.mrf.mxu1 }
 0x1d2   : > { %v2370_v55 = vpop.eup %2369  ;;  %v832_v24 = vpop.f32.mrf.mxu0  ;;  %2056 = vst [vmem:[%s3555_s10 + $0x260] sm:$0xff] %v1956_v59  ;;  %v1569_v13 = vmul.f32 0.5, %v3769_v53 }
 0x1d3   : > { %2381 = verf.f32 %v1672_v40  ;;  %v1673_v22 = vmul.f32 0.70710677, %v3786_v28  ;;  %v1957_v45 = vmul.f32 %v1857_v47, %v1557_v29  ;;  %v1860_v5 = vadd.f32 1.0, %v2370_v55  ;;  %v1047_v16 = vpop.f32.mrf.mxu1 }
 0x1d4   : > { %v3795_v3 = vadd.f32 %v1045_v33, %v831_v23  ;;  %v833_v11 = vadd.f32 %v832_v24, %v3494_v20  ;;  %v1116_v4 = vpop.f32.mrf.mxu0  ;;  %v1572_v55 = vmul.f32 0.5, %v3776_v31 }
 0x1d5   : > { %v2372_v38 = vpop.eup %2371  ;;  %2383 = verf.f32 %v1673_v22  ;;  %2057 = vst [vmem:[%s3555_s10 + $0x268] sm:$0xff] %v1957_v45  ;;  %v1960_v35 = vmul.f32 %v1860_v5, %v1560_v63  ;;  %v1117_v58 = vadd.f32 %v1116_v4, %v3781_v34  ;;  %v1573_v4 = vmul.f32 0.5, %v3786_v28 }
 0x1d6   : > { %v1861_v60 = vadd.f32 1.0, %v2372_v38  ;;  %v1676_v7 = vmul.f32 0.70710677, %v3795_v3  ;;  %v3802_v10 = vadd.f32 %v1047_v16, %v833_v11  ;;  %v1331_v15 = vpop.f32.mrf.mxu1  ;;  %v1118_v20 = vpop.f32.mrf.mxu0 }
 0x1d7   : > { %v2374_v57 = vpop.eup %2373  ;;  %2060 = vst [vmem:[%s3555_s10 + $0x280] sm:$0xff] %v1960_v35  ;;  %v1119_v54 = vadd.f32 %v1118_v20, %v3791_v56  ;;  %v3809_v36 = vadd.f32 %v1331_v15, %v1117_v58 }
 0x1d8   : > { %v1961_v19 = vmul.f32 %v1861_v60, %v1561_v52  ;;  %2385 = verf.f32 %v1676_v7  ;;  %v1864_v30 = vadd.f32 1.0, %v2374_v57  ;;  %v1677_v32 = vmul.f32 0.70710677, %v3802_v10  ;;  %v1333_v62 = vpop.f32.mrf.mxu1  ;;  %v1122_v6 = vpop.f32.mrf.mxu0 }
 0x1d9   : > { %v2376_v43 = vpop.eup %2375  ;;  %v3812_v46 = vadd.f32 %v1333_v62, %v1119_v54  ;;  %v1123_v49 = vadd.f32 %v1122_v6, %v3781_v34  ;;  %v1582_v39 = vmul.f32 0.70710677, %v3809_v36  ;;  %v1576_v54 = vmul.f32 0.5, %v3795_v3 }
 0x1da   : > { %2061 = vst [vmem:[%s3555_s10 + $0x288] sm:$0xff] %v1961_v19  ;;  %v1964_v61 = vmul.f32 %v1864_v30, %v1564_v9  ;;  %v1865_v2 = vadd.f32 1.0, %v2376_v43  ;;  %2387 = verf.f32 %v1677_v32  ;;  %v1337_v0 = vpop.f32.mrf.mxu1  ;;  %v1124_v25 = vpop.f32.mrf.mxu0 }
 0x1db   : > { %v2378_v50 = vpop.eup %2377  ;;  %v1583_v26 = vmul.f32 0.70710677, %v3812_v46  ;;  %v3821_v41 = vadd.f32 %v1337_v0, %v1123_v49  ;;  %v1125_v18 = vadd.f32 %v1124_v25, %v3791_v56  ;;  %2389 = verf.f32 %v1582_v39 }
 0x1dc   : > { %v1868_v12 = vadd.f32 1.0, %v2378_v50  ;;  %2064 = vst [vmem:[%s3555_s10 + $0x2a0] sm:$0xff] %v1964_v61  ;;  %v1965_v21 = vmul.f32 %v1865_v2, %v1565_v44  ;;  %v1339_v51 = vpop.f32.mrf.mxu1  ;;  %v1128_v42 = vpop.f32.mrf.mxu0  ;;  %v1577_v61 = vmul.f32 0.5, %v3802_v10 }
 0x1dd   : > { %v2380_v37 = vpop.eup %2379  ;;  %v1129_v1 = vadd.f32 %v1128_v42, %v3781_v34  ;;  %2391 = verf.f32 %v1583_v26  ;;  %v1586_v40 = vmul.f32 0.70710677, %v3821_v41  ;;  %v3827_v8 = vadd.f32 %v1339_v51, %v1125_v18 }
 0x1de   : > { %v1968_v48 = vmul.f32 %v1868_v12, %v1568_v17  ;;  %v1869_v27 = vadd.f32 1.0, %v2380_v37  ;;  %2065 = vst [vmem:[%s3555_s10 + $0x2a8] sm:$0xff] %v1965_v21  ;;  %v1343_v53 = vpop.f32.mrf.mxu1  ;;  %v1130_v29 = vpop.f32.mrf.mxu0  ;;  %v1482_v18 = vmul.f32 0.5, %v3809_v36  ;;  %v1486_v36 = vmul.f32 0.5, %v3821_v41 }
 0x1df   : > { %v3830_v33 = vadd.f32 %v1343_v53, %v1129_v1  ;;  %v1131_v14 = vadd.f32 %v1130_v29, %v3791_v56  ;;  %2393 = verf.f32 %v1586_v40  ;;  %v1587_v63 = vmul.f32 0.70710677, %v3827_v8 }
 0x1e0   : > { %v2382_v47 = vpop.eup %2381  ;;  %2068 = vst [vmem:[%s3555_s10 + $0x2c0] sm:$0xff] %v1968_v48  ;;  %v1969_v23 = vmul.f32 %v1869_v27, %v1569_v13  ;;  %v1345_v22 = vpop.f32.mrf.mxu1  ;;  %v1483_v27 = vmul.f32 0.5, %v3812_v46 }
 0x1e1   : > { %v1872_v59 = vadd.f32 1.0, %v2382_v47  ;;  %v1134_v24 = vpop.f32.mrf.mxu0  ;;  %v1590_v5 = vmul.f32 0.70710677, %v3830_v33  ;;  %v3837_v11 = vadd.f32 %v1345_v22, %v1131_v14  ;;  %2395 = verf.f32 %v1587_v63 }
 0x1e2   : > { %v2384_v45 = vpop.eup %2383  ;;  %2069 = vst [vmem:[%s3555_s10 + $0x2c8] sm:$0xff] %v1969_v23  ;;  %v1135_v16 = vadd.f32 %v1134_v24, %v3781_v34  ;;  %v1349_v31 = vpop.f32.mrf.mxu1 }
 0x1e3   : > { %v1972_v38 = vmul.f32 %v1872_v59, %v1572_v55  ;;  %v1873_v35 = vadd.f32 1.0, %v2384_v45  ;;  %v1136_v52 = vpop.f32.mrf.mxu0  ;;  %2397 = verf.f32 %v1590_v5  ;;  %v1591_v60 = vmul.f32 0.70710677, %v3837_v11 }
 0x1e4   : > { %v3842_v7 = vadd.f32 %v1349_v31, %v1135_v16  ;;  %v1137_v20 = vadd.f32 %v1136_v52, %v3791_v56  ;;  %v1351_v57 = vpop.f32.mrf.mxu1  ;;  %v1487_v5 = vmul.f32 0.5, %v3827_v8 }
 0x1e5   : > { %v2386_v58 = vpop.eup %2385  ;;  %2072 = vst [vmem:[%s3555_s10 + $0x2e0] sm:$0xff] %v1972_v38  ;;  %v1973_v15 = vmul.f32 %v1873_v35, %v1573_v4  ;;  %v1140_v19 = vpop.f32.mrf.mxu0  ;;  %2399 = verf.f32 %v1591_v60  ;;  %v1490_v35 = vmul.f32 0.5, %v3830_v33 }
 0x1e6   : > { %v1876_v28 = vadd.f32 1.0, %v2386_v58  ;;  %v1594_v9 = vmul.f32 0.70710677, %v3842_v7  ;;  %v3849_v30 = vadd.f32 %v1351_v57, %v1137_v20  ;;  %v1141_v32 = vadd.f32 %v1140_v19, %v3781_v34  ;;  %v1355_v62 = vpop.f32.mrf.mxu1 }
 0x1e7   : > { %2073 = vst [vmem:[%s3555_s10 + $0x2e8] sm:$0xff] %v1973_v15  ;;  %v1142_v6 = vpop.f32.mrf.mxu0  ;;  %v2388_v43 = vpop.eup %2387 }
 0x1e8   : > { %v1976_v49 = vmul.f32 %v1876_v28, %v1576_v54  ;;  %2401 = verf.f32 %v1594_v9  ;;  %v1143_v50 = vadd.f32 %v1142_v6, %v3791_v56  ;;  %v1877_v3 = vadd.f32 1.0, %v2388_v43  ;;  %v1357_v0 = vpop.f32.mrf.mxu1  ;;  %v2390_v39 = vpop.eup %2389 }
 0x1e9   : > { %v1595_v44 = vmul.f32 0.70710677, %v3849_v30  ;;  %v3855_v2 = vadd.f32 %v1355_v62, %v1141_v32  ;;  %v1146_v25 = vpop.f32.mrf.mxu0  ;;  %v1782_v51 = vadd.f32 1.0, %v2390_v39  ;;  %v1491_v9 = vmul.f32 0.5, %v3837_v11 }
 0x1ea   : > { %2076 = vst [vmem:[%s3555_s10 + $0x300] sm:$0xf] %v1976_v49  ;;  %v3858_v17 = vadd.f32 %v1357_v0, %v1143_v50  ;;  %v1147_v12 = vadd.f32 %v1146_v25, %v3781_v34  ;;  %v1977_v26 = vmul.f32 %v1877_v3, %v1577_v61  ;;  %v1361_v21 = vpop.f32.mrf.mxu1  ;;  %v2392_v13 = vpop.eup %2391  ;;  %v1494_v43 = vmul.f32 0.5, %v3842_v7 }
 0x1eb   : > { %2403 = verf.f32 %v1595_v44  ;;  %v1598_v37 = vmul.f32 0.70710677, %v3855_v2  ;;  %v1148_v10 = vpop.f32.mrf.mxu0  ;;  %v1783_v1 = vadd.f32 1.0, %v2392_v13  ;;  %v1882_v23 = vmul.f32 %v1782_v51, %v1482_v18 }
 0x1ec   : > { %v1599_v42 = vmul.f32 0.70710677, %v3858_v17  ;;  %v3864_v48 = vadd.f32 %v1361_v21, %v1147_v12  ;;  %2077 = vst [vmem:[%s3555_s10 + $0x308] sm:$0xf] %v1977_v26  ;;  %v1149_v40 = vadd.f32 %v1148_v10, %v3791_v56  ;;  %v1363_v53 = vpop.f32.mrf.mxu1  ;;  %v2394_v47 = vpop.eup %2393  ;;  %v1495_v18 = vmul.f32 0.5, %v3849_v30 }
 0x1ed   : > { %2405 = verf.f32 %v1598_v37  ;;  %v1152_v29 = vpop.f32.mrf.mxu0  ;;  %v1883_v55 = vmul.f32 %v1783_v1, %v1483_v27  ;;  %v1786_v59 = vadd.f32 1.0, %v2394_v47  ;;  %1982 = vst [vmem:[%s3555_s10 + $0x10] sm:$0xff] %v1882_v23 }
 0x1ee   : > { %2407 = verf.f32 %v1599_v42  ;;  %v1602_v14 = vmul.f32 0.70710677, %v3864_v48  ;;  %v3871_v63 = vadd.f32 %v1363_v53, %v1149_v40  ;;  %v1153_v46 = vadd.f32 %v1152_v29, %v3781_v34  ;;  %v1367_v22 = vpop.f32.mrf.mxu1  ;;  %v2396_v45 = vpop.eup %2395 }
 0x1ef   : > { %v1154_v24 = vpop.f32.mrf.mxu0  ;;  %1983 = vst [vmem:[%s3555_s10 + $0x18] sm:$0xff] %v1883_v55  ;;  %v1886_v38 = vmul.f32 %v1786_v59, %v1486_v36  ;;  %v1787_v4 = vadd.f32 1.0, %v2396_v45 }
 0x1f0   : > { %2409 = verf.f32 %v1602_v14  ;;  %v1155_v16 = vadd.f32 %v1154_v24, %v3791_v56  ;;  %v2398_v41 = vpop.eup %2397  ;;  %v1603_v31 = vmul.f32 0.70710677, %v3871_v63  ;;  %v1369_v52 = vpop.f32.mrf.mxu1  ;;  %v3880_v15 = vadd.f32 %v1367_v22, %v1153_v46 }
 0x1f1   : > { %v1158_v60 = vpop.f32.mrf.mxu0  ;;  %v1790_v58 = vadd.f32 1.0, %v2398_v41  ;;  %1986 = vst [vmem:[%s3555_s10 + $0x30] sm:$0xff] %v1886_v38  ;;  %v1887_v19 = vmul.f32 %v1787_v4, %v1487_v5  ;;  %v1498_v14 = vmul.f32 0.5, %v3855_v2  ;;  %v1499_v46 = vmul.f32 0.5, %v3858_v17 }
 0x1f2   : > { %v3882_v20 = vadd.f32 %v1369_v52, %v1155_v16  ;;  %v1159_v8 = vadd.f32 %v1158_v60, %v3781_v34  ;;  %v2400_v57 = vpop.eup %2399  ;;  %2411 = verf.f32 %v1603_v31  ;;  %v1373_v54 = vpop.f32.mrf.mxu1  ;;  %v1606_v62 = vmul.f32 0.70710677, %v3880_v15 }
 0x1f3   : > { %v1160_v28 = vpop.f32.mrf.mxu0  ;;  %v1890_v33 = vmul.f32 %v1790_v58, %v1490_v35  ;;  %v1791_v32 = vadd.f32 1.0, %v2400_v57  ;;  %1987 = vst [vmem:[%s3555_s10 + $0x38] sm:$0xff] %v1887_v19  ;;  %v1502_v16 = vmul.f32 0.5, %v3864_v48 }
 0x1f4   : > { %v1607_v49 = vmul.f32 0.70710677, %v3882_v20  ;;  %v3891_v50 = vadd.f32 %v1373_v54, %v1159_v8  ;;  %v1161_v61 = vadd.f32 %v1160_v28, %v3791_v56  ;;  %v1375_v3 = vpop.f32.mrf.mxu1  ;;  %2413 = verf.f32 %v1606_v62 }
 0x1f5   : > { %v2402_v6 = vpop.eup %2401  ;;  %v1164_v44 = vpop.f32.mrf.mxu0  ;;  %1990 = vst [vmem:[%s3555_s10 + $0x50] sm:$0xff] %v1890_v33  ;;  %v1891_v0 = vmul.f32 %v1791_v32, %v1491_v9  ;;  %v1503_v28 = vmul.f32 0.5, %v3871_v63 }
 0x1f6   : > { %v1794_v25 = vadd.f32 1.0, %v2402_v6  ;;  %v1165_v11 = vadd.f32 %v1164_v44, %v3781_v34  ;;  %2415 = verf.f32 %v1607_v49  ;;  %v1610_v12 = vmul.f32 0.70710677, %v3891_v50  ;;  %v1379_v39 = vpop.f32.mrf.mxu1 }
 0x1f7   : > { %v3897_v7 = vadd.f32 %v1375_v3, %v1161_v61  ;;  %v1166_v26 = vpop.f32.mrf.mxu0  ;;  %1991 = vst [vmem:[%s3555_s10 + $0x58] sm:$0xff] %v1891_v0 }
 0x1f8   : > { %v2404_v37 = vpop.eup %2403  ;;  %v1894_v21 = vmul.f32 %v1794_v25, %v1494_v43  ;;  %v3900_v10 = vadd.f32 %v1379_v39, %v1165_v11  ;;  %v1167_v13 = vadd.f32 %v1166_v26, %v3791_v56  ;;  %2417 = verf.f32 %v1610_v12  ;;  %v1381_v27 = vpop.f32.mrf.mxu1 }
 0x1f9   : > { %v1795_v51 = vadd.f32 1.0, %v2404_v37  ;;  %v1611_v42 = vmul.f32 0.70710677, %v3897_v7  ;;  %v1170_v1 = vpop.f32.mrf.mxu0  ;;  %v1506_v25 = vmul.f32 0.5, %v3880_v15  ;;  %v1507_v39 = vmul.f32 0.5, %v3882_v20 }
 0x1fa   : > { %v2406_v40 = vpop.eup %2405  ;;  %1994 = vst [vmem:[%s3555_s10 + $0x70] sm:$0xff] %v1894_v21  ;;  %v1614_v53 = vmul.f32 0.70710677, %v3900_v10  ;;  %v3907_v29 = vadd.f32 %v1381_v27, %v1167_v13  ;;  %v1171_v47 = vadd.f32 %v1170_v1, %v3781_v34  ;;  %v1385_v55 = vpop.f32.mrf.mxu1  ;;  %v1510_v1 = vmul.f32 0.5, %v3891_v50 }
 0x1fb   : > { %v2408_v23 = vpop.eup %2407  ;;  %v1895_v36 = vmul.f32 %v1795_v51, %v1495_v18  ;;  %v1798_v30 = vadd.f32 1.0, %v2406_v40  ;;  %2419 = verf.f32 %v1611_v42  ;;  %v1172_v59 = vpop.f32.mrf.mxu0 }
 0x1fc   : > { %v1799_v22 = vadd.f32 1.0, %v2408_v23  ;;  %2421 = verf.f32 %v1614_v53  ;;  %v1615_v24 = vmul.f32 0.70710677, %v3907_v29  ;;  %v3915_v41 = vadd.f32 %v1385_v55, %v1171_v47  ;;  %v1387_v38 = vpop.f32.mrf.mxu1 }
 0x1fd   : > { %v2410_v45 = vpop.eup %2409  ;;  %1995 = vst [vmem:[%s3555_s10 + $0x78] sm:$0xff] %v1895_v36  ;;  %v1898_v5 = vmul.f32 %v1798_v30, %v1498_v14  ;;  %v1173_v2 = vadd.f32 %v1172_v59, %v3791_v56  ;;  %v1176_v4 = vpop.f32.mrf.mxu0 }
 0x1fe   : > { %v1899_v35 = vmul.f32 %v1799_v22, %v1499_v46  ;;  %v1802_v31 = vadd.f32 1.0, %v2410_v45  ;;  %2423 = verf.f32 %v1615_v24  ;;  %v1177_v17 = vadd.f32 %v1176_v4, %v3781_v34  ;;  %v1391_v58 = vpop.f32.mrf.mxu1 }
 0x1ff   : > { %1998 = vst [vmem:[%s3555_s10 + $0x90] sm:$0xff] %v1898_v5  ;;  %v1618_v52 = vmul.f32 0.70710677, %v3915_v41  ;;  %v3921_v60 = vadd.f32 %v1387_v38, %v1173_v2  ;;  %v1178_v8 = vpop.f32.mrf.mxu0  ;;  %v2412_v48 = vpop.eup %2411  ;;  %v1511_v46 = vmul.f32 0.5, %v3897_v7  ;;  %v1514_v45 = vmul.f32 0.5, %v3900_v10 }
 0x200   : > { %1999 = vst [vmem:[%s3555_s10 + $0x98] sm:$0xff] %v1899_v35  ;;  %v1902_v57 = vmul.f32 %v1802_v31, %v1502_v16  ;;  %v3924_v19 = vadd.f32 %v1391_v58, %v1177_v17  ;;  %v1179_v54 = vadd.f32 %v1178_v8, %v3791_v56  ;;  %v1803_v33 = vadd.f32 1.0, %v2412_v48  ;;  %v1393_v32 = vpop.f32.mrf.mxu1 }
 0x201   : > { %2425 = verf.f32 %v1618_v52  ;;  %v1619_v9 = vmul.f32 0.70710677, %v3921_v60  ;;  %v1182_v62 = vpop.f32.mrf.mxu0  ;;  %v2414_v61 = vpop.eup %2413  ;;  %v1515_v16 = vmul.f32 0.5, %v3907_v29 }
 0x202   : > { %2002 = vst [vmem:[%s3555_s10 + $0xb0] sm:$0xff] %v1902_v57  ;;  %v1622_v6 = vmul.f32 0.70710677, %v3924_v19  ;;  %v3931_v43 = vadd.f32 %v1393_v32, %v1179_v54  ;;  %v1183_v49 = vadd.f32 %v1182_v62, %v3781_v34  ;;  %v1903_v3 = vmul.f32 %v1803_v33, %v1503_v28  ;;  %v1397_v44 = vpop.f32.mrf.mxu1 }
 0x203   : > { %2427 = verf.f32 %v1619_v9  ;;  %v1184_v0 = vpop.f32.mrf.mxu0  ;;  %v2416_v63 = vpop.eup %2415  ;;  %v1806_v11 = vadd.f32 1.0, %v2414_v61  ;;  %v1518_v62 = vmul.f32 0.5, %v3915_v41 }
 0x204   : > { %2429 = verf.f32 %v1622_v6  ;;  %v1623_v12 = vmul.f32 0.70710677, %v3931_v43  ;;  %2003 = vst [vmem:[%s3555_s10 + $0xb8] sm:$0xff] %v1903_v3  ;;  %v1807_v26 = vadd.f32 1.0, %v2416_v63  ;;  %v3938_v37 = vadd.f32 %v1397_v44, %v1183_v49  ;;  %v1399_v13 = vpop.f32.mrf.mxu1 }
 0x205   : > { %v1185_v21 = vadd.f32 %v1184_v0, %v3791_v56  ;;  %v1188_v18 = vpop.f32.mrf.mxu0  ;;  %v2418_v51 = vpop.eup %2417  ;;  %v1906_v42 = vmul.f32 %v1806_v11, %v1506_v25 }
 0x206   : > { %2431 = verf.f32 %v1623_v12  ;;  %v1189_v15 = vadd.f32 %v1188_v18, %v3781_v34  ;;  %v1907_v27 = vmul.f32 %v1807_v26, %v1507_v39  ;;  %v1810_v40 = vadd.f32 1.0, %v2418_v51  ;;  %v1403_v53 = vpop.f32.mrf.mxu1 }
 0x207   : > { %v1626_v20 = vmul.f32 0.70710677, %v3938_v37  ;;  %v1190_v47 = vpop.f32.mrf.mxu0  ;;  %2006 = vst [vmem:[%s3555_s10 + $0xd0] sm:$0xff] %v1906_v42  ;;  %v3945_v36 = vadd.f32 %v1399_v13, %v1185_v21  ;;  %v1519_v39 = vmul.f32 0.5, %v3921_v60  ;;  %v1522_v13 = vmul.f32 0.5, %v3924_v19 }
 0x208   : > { %v2420_v23 = vpop.eup %2419  ;;  %v3947_v14 = vadd.f32 %v1403_v53, %v1189_v15  ;;  %v1191_v30 = vadd.f32 %v1190_v47, %v3791_v56  ;;  %2007 = vst [vmem:[%s3555_s10 + $0xd8] sm:$0xff] %v1907_v27  ;;  %v1910_v59 = vmul.f32 %v1810_v40, %v1510_v1  ;;  %v1405_v22 = vpop.f32.mrf.mxu1  ;;  %v1523_v27 = vmul.f32 0.5, %v3931_v43 }
 0x209   : > { %v2422_v55 = vpop.eup %2421  ;;  %v1811_v50 = vadd.f32 1.0, %v2420_v23  ;;  %2433 = verf.f32 %v1626_v20  ;;  %v1194_v24 = vpop.f32.mrf.mxu0  ;;  %v1627_v2 = vmul.f32 0.70710677, %v3945_v36 }
 0x20a   : > { %v1814_v5 = vadd.f32 1.0, %v2422_v55  ;;  %2010 = vst [vmem:[%s3555_s10 + $0xf0] sm:$0xff] %v1910_v59  ;;  %v1630_v35 = vmul.f32 0.70710677, %v3947_v14  ;;  %v3957_v31 = vadd.f32 %v1405_v22, %v1191_v30  ;;  %v1195_v7 = vadd.f32 %v1194_v24, %v3781_v34  ;;  %v1409_v17 = vpop.f32.mrf.mxu1 }
 0x20b   : > { %v2424_v38 = vpop.eup %2423  ;;  %v1911_v4 = vmul.f32 %v1811_v50, %v1511_v46  ;;  %v1196_v52 = vpop.f32.mrf.mxu0  ;;  %2435 = verf.f32 %v1627_v2  ;;  %v1526_v24 = vmul.f32 0.5, %v3938_v37 }
 0x20c   : > { %v1914_v58 = vmul.f32 %v1814_v5, %v1514_v45  ;;  %v1815_v10 = vadd.f32 1.0, %v2424_v38  ;;  %v1197_v8 = vadd.f32 %v1196_v52, %v3791_v56  ;;  %2437 = verf.f32 %v1630_v35  ;;  %v1411_v57 = vpop.f32.mrf.mxu1 }
 0x20d   : > { %2011 = vst [vmem:[%s3555_s10 + $0xf8] sm:$0xff] %v1911_v4  ;;  %v1631_v29 = vmul.f32 0.70710677, %v3957_v31  ;;  %v3963_v48 = vadd.f32 %v1409_v17, %v1195_v7  ;;  %v1200_v54 = vpop.f32.mrf.mxu0 }
 0x20e   : > { %v2426_v28 = vpop.eup %2425  ;;  %2014 = vst [vmem:[%s3555_s10 + $0x110] sm:$0xff] %v1914_v58  ;;  %v1915_v33 = vmul.f32 %v1815_v10, %v1515_v16  ;;  %v3966_v9 = vadd.f32 %v1411_v57, %v1197_v8  ;;  %v1201_v32 = vadd.f32 %v1200_v54, %v3781_v34  ;;  %v1415_v61 = vpop.f32.mrf.mxu1  ;;  %v1527_v10 = vmul.f32 0.5, %v3945_v36 }
 0x20f   : > { %v1818_v6 = vadd.f32 1.0, %v2426_v28  ;;  %2439 = verf.f32 %v1631_v29  ;;  %v1634_v49 = vmul.f32 0.70710677, %v3963_v48  ;;  %v1202_v3 = vpop.f32.mrf.mxu0  ;;  %v1530_v57 = vmul.f32 0.5, %v3947_v14 }
 0x210   : > { %v2428_v44 = vpop.eup %2427  ;;  %2015 = vst [vmem:[%s3555_s10 + $0x118] sm:$0xff] %v1915_v33  ;;  %v1635_v0 = vmul.f32 0.70710677, %v3966_v9  ;;  %v3973_v63 = vadd.f32 %v1415_v61, %v1201_v32  ;;  %v1203_v25 = vadd.f32 %v1202_v3, %v3791_v56  ;;  %v1417_v26 = vpop.f32.mrf.mxu1  ;;  %v1531_v3 = vmul.f32 0.5, %v3957_v31 }
 0x211   : > { %v2430_v11 = vpop.eup %2429  ;;  %v1918_v12 = vmul.f32 %v1818_v6, %v1518_v62  ;;  %v1819_v41 = vadd.f32 1.0, %v2428_v44  ;;  %2441 = verf.f32 %v1634_v49  ;;  %v1206_v21 = vpop.f32.mrf.mxu0 }
 0x212   : > { %v1822_v18 = vadd.f32 1.0, %v2430_v11  ;;  %2443 = verf.f32 %v1635_v0  ;;  %v1638_v51 = vmul.f32 0.70710677, %v3973_v63  ;;  %v3981_v1 = vadd.f32 %v1417_v26, %v1203_v25  ;;  %v1421_v40 = vpop.f32.mrf.mxu1 }
 0x213   : > { %v2432_v42 = vpop.eup %2431  ;;  %2018 = vst [vmem:[%s3555_s10 + $0x130] sm:$0xff] %v1918_v12  ;;  %v1919_v15 = vmul.f32 %v1819_v41, %v1519_v39  ;;  %v1207_v60 = vadd.f32 %v1206_v21, %v3781_v34  ;;  %v1208_v20 = vpop.f32.mrf.mxu0 }
 0x214   : > { %v1922_v53 = vmul.f32 %v1822_v18, %v1522_v13  ;;  %v1823_v47 = vadd.f32 1.0, %v2432_v42  ;;  %2445 = verf.f32 %v1638_v51  ;;  %v1209_v19 = vadd.f32 %v1208_v20, %v3791_v56  ;;  %v1423_v55 = vpop.f32.mrf.mxu1 }
 0x215   : > { %2019 = vst [vmem:[%s3555_s10 + $0x138] sm:$0xff] %v1919_v15  ;;  %v1639_v23 = vmul.f32 0.70710677, %v3981_v1  ;;  %v3987_v30 = vadd.f32 %v1421_v40, %v1207_v60  ;;  %v1212_v59 = vpop.f32.mrf.mxu0  ;;  %v1534_v13 = vmul.f32 0.5, %v3963_v48  ;;  %v1535_v42 = vmul.f32 0.5, %v3966_v9 }
 0x216   : > { %v2434_v43 = vpop.eup %2433  ;;  %2022 = vst [vmem:[%s3555_s10 + $0x150] sm:$0xff] %v1922_v53  ;;  %v1923_v46 = vmul.f32 %v1823_v47, %v1523_v27  ;;  %v3990_v50 = vadd.f32 %v1423_v55, %v1209_v19  ;;  %v1213_v22 = vadd.f32 %v1212_v59, %v3781_v34  ;;  %v1427_v16 = vpop.f32.mrf.mxu1  ;;  %v1538_v27 = vmul.f32 0.5, %v3973_v63 }
 0x217   : > { %v1826_v45 = vadd.f32 1.0, %v2434_v43  ;;  %2447 = verf.f32 %v1639_v23  ;;  %v1642_v5 = vmul.f32 0.70710677, %v3987_v30  ;;  %v1214_v2 = vpop.f32.mrf.mxu0 }
 0x218   : > { %2023 = vst [vmem:[%s3555_s10 + $0x158] sm:$0xff] %v1923_v46  ;;  %v1643_v38 = vmul.f32 0.70710677, %v3990_v50  ;;  %v3997_v4 = vadd.f32 %v1427_v16, %v1213_v22  ;;  %v1215_v35 = vadd.f32 %v1214_v2, %v3791_v56  ;;  %v2436_v7 = vpop.eup %2435  ;;  %v1429_v52 = vpop.f32.mrf.mxu1  ;;  %v1539_v2 = vmul.f32 0.5, %v3981_v1 }
 0x219   : > { %v1926_v17 = vmul.f32 %v1826_v45, %v1526_v24  ;;  %2449 = verf.f32 %v1642_v5  ;;  %v1218_v58 = vpop.f32.mrf.mxu0  ;;  %v2438_v37 = vpop.eup %2437  ;;  %v1827_v8 = vadd.f32 1.0, %v2436_v7 }
 0x21a   : > { %2451 = verf.f32 %v1643_v38  ;;  %v1646_v29 = vmul.f32 0.70710677, %v3997_v4  ;;  %v1830_v54 = vadd.f32 1.0, %v2438_v37  ;;  %v4004_v28 = vadd.f32 %v1429_v52, %v1215_v35  ;;  %v1433_v32 = vpop.f32.mrf.mxu1 }
 0x21b   : > { %2026 = vst [vmem:[%s3555_s10 + $0x170] sm:$0xff] %v1926_v17  ;;  %v1219_v33 = vadd.f32 %v1218_v58, %v3781_v34  ;;  %v1220_v62 = vpop.f32.mrf.mxu0  ;;  %v1927_v49 = vmul.f32 %v1827_v8, %v1527_v10 }
 0x21c   : > { %v2440_v6 = vpop.eup %2439  ;;  %2453 = verf.f32 %v1646_v29  ;;  %v1221_v36 = vadd.f32 %v1220_v62, %v3791_v56  ;;  %v1930_v61 = vmul.f32 %v1830_v54, %v1530_v57  ;;  %v1647_v14 = vmul.f32 0.70710677, %v4004_v28  ;;  %v1435_v0 = vpop.f32.mrf.mxu1 }
 0x21d   : > { %v1831_v44 = vadd.f32 1.0, %v2440_v6  ;;  %v1224_v25 = vpop.f32.mrf.mxu0  ;;  %2027 = vst [vmem:[%s3555_s10 + $0x178] sm:$0xff] %v1927_v49  ;;  %v4011_v12 = vadd.f32 %v1433_v32, %v1219_v33  ;;  %v1542_v57 = vmul.f32 0.5, %v3987_v30  ;;  %v1543_v32 = vmul.f32 0.5, %v3990_v50 }
 0x21e   : > { %v2442_v11 = vpop.eup %2441  ;;  %v4013_v39 = vadd.f32 %v1435_v0, %v1221_v36  ;;  %v1225_v41 = vadd.f32 %v1224_v25, %v3781_v34  ;;  %2030 = vst [vmem:[%s3555_s10 + $0x190] sm:$0xff] %v1930_v61  ;;  %2455 = verf.f32 %v1647_v14  ;;  %v1439_v18 = vpop.f32.mrf.mxu1  ;;  %v1546_v61 = vmul.f32 0.5, %v3997_v4 }
 0x21f   : > { %v2444_v26 = vpop.eup %2443  ;;  %v1931_v21 = vmul.f32 %v1831_v44, %v1531_v3  ;;  %v1834_v31 = vadd.f32 1.0, %v2442_v11  ;;  %v1226_v51 = vpop.f32.mrf.mxu0  ;;  %v1650_v60 = vmul.f32 0.70710677, %v4011_v12 }
 0x220   : > { %v1835_v15 = vadd.f32 1.0, %v2444_v26  ;;  %v1651_v53 = vmul.f32 0.70710677, %v4013_v39  ;;  %v4023_v47 = vadd.f32 %v1439_v18, %v1225_v41  ;;  %v1227_v48 = vadd.f32 %v1226_v51, %v3791_v56  ;;  %v1441_v19 = vpop.f32.mrf.mxu1 }
 0x221   : > { %v2446_v40 = vpop.eup %2445  ;;  %2031 = vst [vmem:[%s3555_s10 + $0x198] sm:$0xff] %v1931_v21  ;;  %v1934_v20 = vmul.f32 %v1834_v31, %v1534_v13  ;;  %v1230_v23 = vpop.f32.mrf.mxu0  ;;  %2457 = verf.f32 %v1650_v60  ;;  %v1547_v51 = vmul.f32 0.5, %v4004_v28 }
 0x222   : > { %v1935_v55 = vmul.f32 %v1835_v15, %v1535_v42  ;;  %v1838_v9 = vadd.f32 1.0, %v2446_v40  ;;  %v1231_v59 = vadd.f32 %v1230_v23, %v3781_v34  ;;  %2459 = verf.f32 %v1651_v53  ;;  %v1445_v46 = vpop.f32.mrf.mxu1 }
 0x223   : > { %2034 = vst [vmem:[%s3555_s10 + $0x1b0] sm:$0xff] %v1934_v20  ;;  %v1654_v63 = vmul.f32 0.70710677, %v4023_v47  ;;  %v4029_v43 = vadd.f32 %v1441_v19, %v1227_v48  ;;  %v1232_v22 = vpop.f32.mrf.mxu0 }
 0x224   : > { %v2448_v24 = vpop.eup %2447  ;;  %2035 = vst [vmem:[%s3555_s10 + $0x1b8] sm:$0xff] %v1935_v55  ;;  %v1938_v45 = vmul.f32 %v1838_v9, %v1538_v27  ;;  %v4032_v5 = vadd.f32 %v1445_v46, %v1231_v59  ;;  %v1233_v16 = vadd.f32 %v1232_v22, %v3791_v56  ;;  %v1447_v7 = vpop.f32.mrf.mxu1  ;;  %v1550_v9 = vmul.f32 0.5, %v4011_v12 }
 0x225   : > { %v1839_v38 = vadd.f32 1.0, %v2448_v24  ;;  %2461 = verf.f32 %v1654_v63  ;;  %v1655_v35 = vmul.f32 0.70710677, %v4029_v43  ;;  %v1236_v17 = vpop.f32.mrf.mxu0  ;;  %v1551_v46 = vmul.f32 0.5, %v4013_v39 }
 0x226   : > { %v2450_v52 = vpop.eup %2449  ;;  %2038 = vst [vmem:[%s3555_s10 + $0x1d0] sm:$0xff] %v1938_v45  ;;  %v1658_v58 = vmul.f32 0.70710677, %v4032_v5  ;;  %v4039_v37 = vadd.f32 %v1447_v7, %v1233_v16  ;;  %v1237_v10 = vadd.f32 %v1236_v17, %v3781_v34  ;;  %v1451_v54 = vpop.f32.mrf.mxu1  ;;  %v1554_v17 = vmul.f32 0.5, %v4023_v47 }
 0x227   : > { %v2452_v8 = vpop.eup %2451  ;;  %v1939_v29 = vmul.f32 %v1839_v38, %v1539_v2  ;;  %v1842_v1 = vadd.f32 1.0, %v2450_v52  ;;  %2463 = verf.f32 %v1655_v35  ;;  %v1238_v33 = vpop.f32.mrf.mxu0 }
 0x228   : > { %v1843_v62 = vadd.f32 1.0, %v2452_v8  ;;  %2465 = verf.f32 %v1658_v58  ;;  %v1659_v6 = vmul.f32 0.70710677, %v4039_v37  ;;  %v4047_v3 = vadd.f32 %v1451_v54, %v1237_v10  ;;  %v1453_v44 = vpop.f32.mrf.mxu1 }
 0x229   : > { %v2454_v49 = vpop.eup %2453  ;;  %2039 = vst [vmem:[%s3555_s10 + $0x1d8] sm:$0xff] %v1939_v29  ;;  %v1942_v36 = vmul.f32 %v1842_v1, %v1542_v57  ;;  %v1239_v30 = vadd.f32 %v1238_v33, %v3791_v56  ;;  %v1242_v14 = vpop.f32.mrf.mxu0 }
 0x22a   : > { %v1943_v0 = vmul.f32 %v1843_v62, %v1543_v32  ;;  %v1846_v25 = vadd.f32 1.0, %v2454_v49  ;;  %2467 = verf.f32 %v1659_v6  ;;  %v1243_v50 = vadd.f32 %v1242_v14, %v3781_v34  ;;  %v1457_v26 = vpop.f32.mrf.mxu1 }
 0x22b   : > { %2042 = vst [vmem:[%s3555_s10 + $0x1f0] sm:$0xff] %v1942_v36  ;;  %v1662_v11 = vmul.f32 0.70710677, %v4047_v3  ;;  %v4053_v41 = vadd.f32 %v1453_v44, %v1239_v30  ;;  %v1244_v21 = vpop.f32.mrf.mxu0  ;;  %v2456_v4 = vpop.eup %2455  ;;  %v1555_v32 = vmul.f32 0.5, %v4029_v43  ;;  %v1558_v49 = vmul.f32 0.5, %v4032_v5 }
 0x22c   : > { %2043 = vst [vmem:[%s3555_s10 + $0x1f8] sm:$0xff] %v1943_v0  ;;  %v1946_v13 = vmul.f32 %v1846_v25, %v1546_v61  ;;  %v4056_v31 = vadd.f32 %v1457_v26, %v1243_v50  ;;  %v1245_v18 = vadd.f32 %v1244_v21, %v3791_v56  ;;  %v1847_v42 = vadd.f32 1.0, %v2456_v4  ;;  %v1459_v27 = vpop.f32.mrf.mxu1 }
 0x22d   : > { %2469 = verf.f32 %v1662_v11  ;;  %v1663_v15 = vmul.f32 0.70710677, %v4053_v41  ;;  %v1248_v60 = vpop.f32.mrf.mxu0  ;;  %v1559_v61 = vmul.f32 0.5, %v4039_v37 }
 0x22e   : > { %2046 = vst [vmem:[%s3555_s10 + $0x210] sm:$0xff] %v1946_v13  ;;  %v1666_v40 = vmul.f32 0.70710677, %v4056_v31  ;;  %v4063_v20 = vadd.f32 %v1459_v27, %v1245_v18  ;;  %v1249_v53 = vadd.f32 %v1248_v60, %v3781_v34  ;;  %v2458_v48 = vpop.eup %2457  ;;  %v1947_v19 = vmul.f32 %v1847_v42, %v1547_v51  ;;  %v1463_v23 = vpop.f32.mrf.mxu1 }
 0x22f   : > { %2471 = verf.f32 %v1663_v15  ;;  %v1250_v55 = vpop.f32.mrf.mxu0  ;;  %v2460_v28 = vpop.eup %2459  ;;  %v1850_v59 = vadd.f32 1.0, %v2458_v48  ;;  %v1562_v15 = vmul.f32 0.5, %v4047_v3  ;;  %v1563_v48 = vmul.f32 0.5, %v4053_v41 }
 0x230   : > { %2473 = verf.f32 %v1666_v40  ;;  %v1667_v63 = vmul.f32 0.70710677, %v4063_v20  ;;  %2047 = vst [vmem:[%s3555_s10 + $0x218] sm:$0xff] %v1947_v19  ;;  %v1851_v22 = vadd.f32 1.0, %v2460_v28  ;;  %v4070_v24 = vadd.f32 %v1463_v23, %v1249_v53  ;;  %v1465_v16 = vpop.f32.mrf.mxu1 }
 0x231   : > { %v1251_v45 = vadd.f32 %v1250_v55, %v3791_v56  ;;  %v1254_v2 = vpop.f32.mrf.mxu0  ;;  %v1950_v35 = vmul.f32 %v1850_v59, %v1550_v9  ;;  %v1566_v23 = vmul.f32 0.5, %v4056_v31  ;;  %v1567_v59 = vmul.f32 0.5, %v4063_v20 }
 0x232   : > { %v2462_v38 = vpop.eup %2461  ;;  %2475 = verf.f32 %v1667_v63  ;;  %v1255_v12 = vadd.f32 %v1254_v2, %v3781_v34  ;;  %v1951_v7 = vmul.f32 %v1851_v22, %v1551_v46  ;;  %v1670_v39 = vmul.f32 0.70710677, %v4070_v24  ;;  %v1469_v58 = vpop.f32.mrf.mxu1 }
 0x233   : > { %v1854_v52 = vadd.f32 1.0, %v2462_v38  ;;  %v1256_v10 = vpop.f32.mrf.mxu0  ;;  %2050 = vst [vmem:[%s3555_s10 + $0x230] sm:$0xff] %v1950_v35  ;;  %v4077_v29 = vadd.f32 %v1465_v16, %v1251_v45  ;;  %v1570_v41 = vmul.f32 0.5, %v4070_v24 }
 0x234   : > { %v2464_v8 = vpop.eup %2463  ;;  %v4079_v57 = vadd.f32 %v1469_v58, %v1255_v12  ;;  %v1257_v1 = vadd.f32 %v1256_v10, %v3791_v56  ;;  %2051 = vst [vmem:[%s3555_s10 + $0x238] sm:$0xff] %v1951_v7  ;;  %2477 = verf.f32 %v1670_v39  ;;  %v1471_v62 = vpop.f32.mrf.mxu1 }
 0x235   : > { %v2466_v54 = vpop.eup %2465  ;;  %v1954_v33 = vmul.f32 %v1854_v52, %v1554_v17  ;;  %v1855_v47 = vadd.f32 1.0, %v2464_v8  ;;  %v1260_v6 = vpop.f32.mrf.mxu0  ;;  %v1671_v30 = vmul.f32 0.70710677, %v4077_v29  ;;  %v1571_v38 = vmul.f32 0.5, %v4077_v29 }
 0x236   : > { %v1858_v36 = vadd.f32 1.0, %v2466_v54  ;;  %v1674_v0 = vmul.f32 0.70710677, %v4079_v57  ;;  %v1472_v25 = vadd.f32 %v1471_v62, %v1257_v1  ;;  %v1261_v43 = vadd.f32 %v1260_v6, %v3781_v34  ;;  %v1475_v50 = vpop.f32.mrf.mxu1 }
 0x237   : > { %v2468_v44 = vpop.eup %2467  ;;  %2054 = vst [vmem:[%s3555_s10 + $0x250] sm:$0xff] %v1954_v33  ;;  %v1955_v14 = vmul.f32 %v1855_v47, %v1555_v32  ;;  %v1262_v11 = vpop.f32.mrf.mxu0  ;;  %2479 = verf.f32 %v1671_v30  ;;  %v1574_v20 = vmul.f32 0.5, %v4079_v57 }
 0x238   : > { %v1958_v26 = vmul.f32 %v1858_v36, %v1558_v49  ;;  %v1859_v21 = vadd.f32 1.0, %v2468_v44  ;;  %v1263_v5 = vadd.f32 %v1262_v11, %v3791_v56  ;;  %2481 = verf.f32 %v1674_v0  ;;  %v1477_v13 = vpop.f32.mrf.mxu1 }
 0x239   : > { %2055 = vst [vmem:[%s3555_s10 + $0x258] sm:$0xff] %v1955_v14  ;;  %v1675_v37 = vmul.f32 0.70710677, %v1472_v25  ;;  %v1476_v4 = vadd.f32 %v1475_v50, %v1261_v43  ;;  %v1575_v52 = vmul.f32 0.5, %v1472_v25 }
 0x23a   : > { %v2470_v18 = vpop.eup %2469  ;;  %2058 = vst [vmem:[%s3555_s10 + $0x270] sm:$0xff] %v1958_v26  ;;  %v1959_v51 = vmul.f32 %v1859_v21, %v1559_v61  ;;  %v1478_v42 = vadd.f32 %v1477_v13, %v1263_v5 }
 0x23b   : > { %v1862_v34 = vadd.f32 1.0, %v2470_v18  ;;  %2483 = verf.f32 %v1675_v37  ;;  %v1678_v27 = vmul.f32 0.70710677, %v1476_v4  ;;  %v1578_v29 = vmul.f32 0.5, %v1476_v4 }
 0x23c   : > { %v2472_v60 = vpop.eup %2471  ;;  %2059 = vst [vmem:[%s3555_s10 + $0x278] sm:$0xff] %v1959_v51  ;;  %v1679_v40 = vmul.f32 0.70710677, %v1478_v42  ;;  %v1579_v1 = vmul.f32 0.5, %v1478_v42 }
 0x23d   : > { %v2474_v56 = vpop.eup %2473  ;;  %v1962_v53 = vmul.f32 %v1862_v34, %v1562_v15  ;;  %v1863_v19 = vadd.f32 1.0, %v2472_v60  ;;  %2485 = verf.f32 %v1678_v27 }
 0x23e   : > { %v1866_v55 = vadd.f32 1.0, %v2474_v56  ;;  %2487 = verf.f32 %v1679_v40 }
 0x23f   : > { %v2476_v3 = vpop.eup %2475  ;;  %2062 = vst [vmem:[%s3555_s10 + $0x290] sm:$0xff] %v1962_v53  ;;  %v1963_v28 = vmul.f32 %v1863_v19, %v1563_v48 }
 0x240   : > { %v1966_v9 = vmul.f32 %v1866_v55, %v1566_v23  ;;  %v1867_v63 = vadd.f32 1.0, %v2476_v3 }
 0x241   : > { %2063 = vst [vmem:[%s3555_s10 + $0x298] sm:$0xff] %v1963_v28  ;;  %v2478_v46 = vpop.eup %2477 }
 0x242   : > { %2066 = vst [vmem:[%s3555_s10 + $0x2b0] sm:$0xff] %v1966_v9  ;;  %v1967_v22 = vmul.f32 %v1867_v63, %v1567_v59  ;;  %v1870_v45 = vadd.f32 1.0, %v2478_v46 }
 0x244   : > { %2067 = vst [vmem:[%s3555_s10 + $0x2b8] sm:$0xff] %v1967_v22  ;;  %v2480_v31 = vpop.eup %2479  ;;  %v1970_v16 = vmul.f32 %v1870_v45, %v1570_v41 }
 0x245   : > { %v2482_v2 = vpop.eup %2481  ;;  %v1871_v35 = vadd.f32 1.0, %v2480_v31 }
 0x246   : > { %2070 = vst [vmem:[%s3555_s10 + $0x2d0] sm:$0xff] %v1970_v16  ;;  %v1874_v12 = vadd.f32 1.0, %v2482_v2 }
 0x247   : > { %v1971_v17 = vmul.f32 %v1871_v35, %v1571_v38 }
 0x248   : > { %v2484_v7 = vpop.eup %2483  ;;  %v1974_v24 = vmul.f32 %v1874_v12, %v1574_v20 }
 0x249   : > { %v1875_v39 = vadd.f32 1.0, %v2484_v7  ;;  %2071 = vst [vmem:[%s3555_s10 + $0x2d8] sm:$0xff] %v1971_v17 }
 0x24a   : > { %v2486_v58 = vpop.eup %2485  ;;  %2074 = vst [vmem:[%s3555_s10 + $0x2f0] sm:$0xff] %v1974_v24 }
 0x24b   : > { %v2488_v10 = vpop.eup %2487  ;;  %v1975_v8 = vmul.f32 %v1875_v39, %v1575_v52  ;;  %v1878_v57 = vadd.f32 1.0, %v2486_v58 }
 0x24c   : > { %v1879_v54 = vadd.f32 1.0, %v2488_v10 }
 0x24d   : > { %2075 = vst [vmem:[%s3555_s10 + $0x2f8] sm:$0xff] %v1975_v8  ;;  %v1978_v33 = vmul.f32 %v1878_v57, %v1578_v29 }
 0x24e   : > { %v1979_v32 = vmul.f32 %v1879_v54, %v1579_v1 }
 0x24f   : > { %2078 = vst [vmem:[%s3555_s10 + $0x310] sm:$0xf] %v1978_v33 }
 0x250   : > { %2079 = vst [vmem:[%s3555_s10 + $0x318] sm:$0xf] %v1979_v32 }
 0x251   : > { %2585 = shalt.err (!%p2582_p10)
}
 0x252   : > { %s2586_s21 = scalar_lea.hbm %s4113_s17, 12800  ;;  %s2590_s7 = scalar_lea.hbm %s4163_s3, 51200 }
 0x253   : > { %p2587_p9 = scmp.ne.s32.totalorder %s4113_s17, %s2586_s21  ;;  %p2591_p13 = scmp.lt.s32.totalorder %s4113_s17, %s4163_s3 }
 0x254   : > { %p2592_p3 = scmp.lt.s32.totalorder %s2590_s7, %s2586_s21 }
 0x255   : > { %p2588_p12 = pnand %p2587_p9, %p4310_p2 }
 0x256   : > { %p2593_p5 = por %p2592_p3, %p2591_p13 }
 0x257   : > { %p2589_p7 = pneg %p2588_p12 }
 0x259   : > { %p2594_p11 = pnand %p2593_p5, %p2589_p7 }
 0x25b   : > { %2597 = shalt.err (!%p2594_p11)
}
 0x25c   : > { %s2649_s4 = smov 512   ;;  %s2650_s10 = smov 2048  }
 0x25d   : > { %s2651_s18 = smov 32  }
 0x25e   : > { %2229 = dma.vmem_to_hbm [thread:$0]  (%p4310_p2), %s4116_s8, 12800, %s4113_s17, %s2081_s24, %s2649_s4, %s2650_s10, %s2651_s18  }
 0x25f PF: > { %p2249_p8 = scmp.ge.s32.totalorder %s2640_s15, 2  ;;  %s2109_s9 = sand.u32 1, %s2628_s12  }
 0x260   : > { %p4311_p4 = scmp.ne.s32.totalorder %s4215_s28, 0  ;;  %s2110_s11 = scalar_lea.sflag [#allocation4], %s2109_s9 }
 0x262   : > { %p2243_p1 = pnand %p2249_p8, %p4311_p4 }
 0x264   : > { %p2244_p0 = pneg %p2243_p1 }
 0x266   : > { %2623 = dma.done.wait (%p2244_p0), %s2110_s11, 12800  }
 0x267   : > { %2625 = vsyncadd (%p2244_p0), %s2110_s11, 4294954496  ;;  %p17_p6 = scmp.ge.s32.totalorder %s2693_s16, 6   ;;  %s4312_s12 = smov %s2632_s13 }
 0x268   : > { %s4313_s13 = smov %s2636_s14  ;;  %s4314_s14 = smov %s2702_s19 }
 0x269   : > { %s4315_s15 = smov %s2693_s16  ;;  %19 = sbr.rel (!%p17_p6) target bundleno = 6 (0x6), region = 93 }
 0x26e   :  { %2115 = vsyncpa [#allocation3], 1 }
 0x26f   :  { %2117 = vsyncpa [#allocation3 + $0x1], 1 }
 0x270   :  { %2118 = vsyncpa [#allocation6], 1 }
 0x271   :  { %2120 = vsyncpa [#allocation6 + $0x1], 1 }
 0x272   :  { %2121 = vsyncpa [#allocation4], 1 }
 0x273   :  { %2123 = vsyncpa [#allocation4 + $0x1], 1 }

</bundles_post_ra>
